<compile_context>
chip_gen: v5e
topology: v5e:2x2
jax: 0.10.0
libtpu: 0.0.40
codegen_flags: <defaults>
</compile_context>

<pallas_src>
import jax
import jax.numpy as jnp
from jax import lax
from jax.experimental import pallas as pl
from jax.experimental.pallas import tpu as pltpu

EPS = 1e-5
_VMEM_LIMIT = 48 * 1024 * 1024   # above every chip's scoped default, below v7x physical


# -----------------------------------------------------------------------------
# Fused bottleneck kernel (one grid step == one batch element)
# -----------------------------------------------------------------------------
def _make_bottleneck_kernel(stride, has_proj):
    def kernel(*refs):
        if has_proj:
            (x_ref, w1_ref, b1_ref, w2_ref, b2_ref, w3_ref, b3_ref,
             ws_ref, bs_ref, o_ref, y1p_ref) = refs
        else:
            (x_ref, w1_ref, b1_ref, w2_ref, b2_ref, w3_ref, b3_ref,
             o_ref, y1p_ref) = refs
            ws_ref = bs_ref = None

        Ho, Wo, C3 = o_ref.shape
        Cin = x_ref.shape[-1]
        Cmid = w1_ref.shape[1]
        Mo = Ho * Wo

        # Zero the halo scratch (interior is fully overwritten below; the
        # border must be zero for the 3x3 "same" padding). Unconditional so it
        # is correct even when the 'parallel' grid axis is sharded across
        # TensorCores (each core owns its own scratch).
        y1p_ref[...] = jnp.zeros_like(y1p_ref)

        # ---- load (and stride-subsample) the input tile --------------------
        xs = x_ref[...]                                   # (H, W, Cin) bf16
        if stride != 1:
            # TODO(synk): strided value slice; only traced for stride > 1.
            xs = xs[::stride, ::stride, :]                # (Ho, Wo, Cin)
        xs2 = xs.reshape(Mo, Cin)

        # ---- conv1 (1x1, stride folded above) + bn1 + relu ------------------
        a1 = jnp.dot(xs2, w1_ref[...], preferred_element_type=jnp.float32)
        y1 = jnp.maximum(a1 + b1_ref[...], 0.0)
        y1p_ref[1:Ho + 1, 1:Wo + 1, :] = (
            y1.reshape(Ho, Wo, Cmid).astype(y1p_ref.dtype))

        # ---- conv2 (3x3, pad 1) + bn2 + relu: 9 shifted-slice MXU dots ------
        acc2 = jnp.zeros((Mo, Cmid), jnp.float32)
        for dh in range(3):
            for dw in range(3):
                patch = y1p_ref[dh:dh + Ho, dw:dw + Wo, :].reshape(Mo, Cmid)
                acc2 = acc2 + jnp.dot(patch, w2_ref[dh, dw],
                                      preferred_element_type=jnp.float32)
        y2 = jnp.maximum(acc2 + b2_ref[...], 0.0).astype(jnp.bfloat16)

        # ---- conv3 (1x1) + bn3 + shortcut + residual relu -------------------
        a3 = jnp.dot(y2, w3_ref[...], preferred_element_type=jnp.float32)
        a3 = a3 + b3_ref[...]
        if has_proj:
            sc = jnp.dot(xs2, ws_ref[...], preferred_element_type=jnp.float32)
            sc = sc + bs_ref[...]
        else:
            sc = xs2.astype(jnp.float32)                  # identity shortcut
        out = jnp.maximum(a3 + sc, 0.0)
        o_ref[...] = out.reshape(Ho, Wo, C3).astype(o_ref.dtype)

    return kernel


# -----------------------------------------------------------------------------
# BN folding and forward wrapper
# -----------------------------------------------------------------------------
def fold_bn(p):
    scale = p["gamma"] / jnp.sqrt(p["var"] + EPS)
    bias = p["beta"] - p["mean"] * scale
    return scale.astype(jnp.float32), bias.astype(jnp.float32)


def bottleneck_forward(x_nchw, params, stride):
    # NCHW -> NHWC (channels on the lane axis); bf16 activations for the MXU,
    # f32 accumulation inside the kernel.
    x = jnp.transpose(x_nchw, (0, 2, 3, 1)).astype(jnp.bfloat16)
    N, H, W, Cin = x.shape
    Ho = (H - 1) // stride + 1
    Wo = (W - 1) // stride + 1

    s1, b1 = fold_bn(params["bn1"])
    s2, b2 = fold_bn(params["bn2"])
    s3, b3 = fold_bn(params["bn3"])
    # Fold BN scale into the conv weights in f32, THEN cast to bf16.
    w1 = (params["w1"] * s1[None, :]).astype(jnp.bfloat16)              # (Cin, Cmid)
    w2 = (params["w2"] * s2[None, None, None, :]).astype(jnp.bfloat16)  # (3,3,Cmid,Cmid)
    w3 = (params["w3"] * s3[None, :]).astype(jnp.bfloat16)              # (Cmid, C3)
    Cmid, C3 = w1.shape[1], w3.shape[1]

    has_proj = params["ws"] is not None
    operands = [x, w1, b1.reshape(1, Cmid), w2, b2.reshape(1, Cmid),
                w3, b3.reshape(1, C3)]
    in_specs = [
        pl.BlockSpec((None, H, W, Cin), lambda n: (n, 0, 0, 0)),
        pl.BlockSpec((Cin, Cmid), lambda n: (0, 0)),
        pl.BlockSpec((1, Cmid), lambda n: (0, 0)),
        pl.BlockSpec((3, 3, Cmid, Cmid), lambda n: (0, 0, 0, 0)),
        pl.BlockSpec((1, Cmid), lambda n: (0, 0)),
        pl.BlockSpec((Cmid, C3), lambda n: (0, 0)),
        pl.BlockSpec((1, C3), lambda n: (0, 0)),
    ]
    w_bytes = (w1.size + w2.size + w3.size) * 2
    if has_proj:
        ss, bs = fold_bn(params["bns"])
        ws = (params["ws"] * ss[None, :]).astype(jnp.bfloat16)          # (Cin, C3)
        operands += [ws, bs.reshape(1, C3)]
        in_specs += [pl.BlockSpec((Cin, C3), lambda n: (0, 0)),
                     pl.BlockSpec((1, C3), lambda n: (0, 0))]
        w_bytes += ws.size * 2
    else:
        assert stride == 1 and Cin == C3, "identity shortcut needs in == out*mul"

    flops_per_px = 2 * (Cin * Cmid + 9 * Cmid * Cmid + Cmid * C3
                        + (Cin * C3 if has_proj else 0))
    cost = pl.CostEstimate(
        flops=int(N * Ho * Wo * flops_per_px),
        transcendentals=0,
        bytes_accessed=int(x.size * 2 + w_bytes + N * Ho * Wo * C3 * 2),
    )

    out = pl.pallas_call(
        _make_bottleneck_kernel(stride, has_proj),
        out_shape=jax.ShapeDtypeStruct((N, Ho, Wo, C3), jnp.bfloat16),
        grid=(N,),
        in_specs=in_specs,
        out_specs=pl.BlockSpec((None, Ho, Wo, C3), lambda n: (n, 0, 0, 0)),
        scratch_shapes=[pltpu.VMEM((Ho + 2, Wo + 2, Cmid), jnp.bfloat16)],
        compiler_params=pltpu.CompilerParams(
            dimension_semantics=("parallel",),
            vmem_limit_bytes=_VMEM_LIMIT),
        cost_estimate=cost,
    )(*operands)

    # bf16 NHWC -> NCHW, then upcast to f32 (after the transpose).
    return jnp.transpose(out, (0, 3, 1, 2)).astype(jnp.float32)


# -----------------------------------------------------------------------------
# Pure-JAX reference (for correctness check)
# -----------------------------------------------------------------------------
def bottleneck_reference(x_nchw, params, stride):
    def bn(y, p):
        s = p["gamma"] / jnp.sqrt(p["var"] + EPS)
        return y * s + (p["beta"] - p["mean"] * s)

    x = jnp.transpose(x_nchw, (0, 2, 3, 1))
    xs = x[:, ::stride, ::stride, :]
    out = jnp.einsum("nhwc,co->nhwo", xs, params["w1"])
    out = jax.nn.relu(bn(out, params["bn1"]))
    out = lax.conv_general_dilated(out, params["w2"], (1, 1), "SAME",
                                   dimension_numbers=("NHWC", "HWIO", "NHWC"))
    out = jax.nn.relu(bn(out, params["bn2"]))
    out = jnp.einsum("nhwc,co->nhwo", out, params["w3"])
    out = bn(out, params["bn3"])
    if params["ws"] is not None:
        sc = bn(jnp.einsum("nhwc,co->nhwo", xs, params["ws"]), params["bns"])
    else:
        sc = xs
    return jnp.transpose(jax.nn.relu(out + sc), (0, 3, 1, 2))


# -----------------------------------------------------------------------------
# Parameter construction (deterministic, matches BottleNeck(__init__) shapes)
# -----------------------------------------------------------------------------
def make_params(key, in_planes, out_planes, stride, mul=4):
    keys = jax.random.split(key, 12)

    def bn_params(k, c):
        k1, k2, k3, k4 = jax.random.split(k, 4)
        return {
            "gamma": 0.5 + jax.random.uniform(k1, (c,), jnp.float32),
            "beta": 0.1 * jax.random.normal(k2, (c,), jnp.float32),
            "mean": 0.1 * jax.random.normal(k3, (c,), jnp.float32),
            "var": 0.5 + jax.random.uniform(k4, (c,), jnp.float32),
        }

    c_out3 = out_planes * mul
    params = {
        # conv weights stored in matmul / HWIO layouts
        "w1": 0.1 * jax.random.normal(keys[0], (in_planes, out_planes), jnp.float32),
        "w2": 0.1 * jax.random.normal(keys[1], (3, 3, out_planes, out_planes), jnp.float32),
        "w3": 0.1 * jax.random.normal(keys[2], (out_planes, c_out3), jnp.float32),
        "bn1": bn_params(keys[3], out_planes),
        "bn2": bn_params(keys[4], out_planes),
        "bn3": bn_params(keys[5], c_out3),
    }
    if stride != 1 or in_planes != c_out3:
        params["ws"] = 0.1 * jax.random.normal(keys[6], (in_planes, c_out3), jnp.float32)
        params["bns"] = bn_params(keys[7], c_out3)
    else:
        params["ws"] = None
        params["bns"] = None
    return params


# -----------------------------------------------------------------------------
if __name__ == "__main__":
    key = jax.random.PRNGKey(0)
    k_x, k_p = jax.random.split(key)

    # BottleNeck(in_planes=4, out_planes=4, stride=1) -> projection shortcut (4 != 16)
    N, C_in, H, W = 2, 4, 16, 16
    in_planes, out_planes, stride = 4, 4, 1

    x = jax.random.normal(k_x, (N, C_in, H, W), jnp.float32)   # NCHW like PyTorch
    params = make_params(k_p, in_planes, out_planes, stride)

    out = jax.block_until_ready(bottleneck_forward(x, params, stride))
    ref = jax.block_until_ready(bottleneck_reference(x, params, stride))

    assert out.shape == (N, out_planes * 4, H // stride, W // stride), out.shape
    # bf16 activations/weights along the whole fused path -> looser tolerance.
    assert jnp.allclose(out, ref, rtol=3e-2, atol=3e-2), float(jnp.max(jnp.abs(out - ref)))

    print("KERNEL_OK")
</pallas_src>

<mosaic_0001>
module attributes {stable_mosaic.version = 11 : i64} {
  func.func @kernel(%arg0: i32, %arg1: memref<1x16x16x4xbf16, #tpu.memory_space<vmem>>, %arg2: memref<4x4xbf16, #tpu.memory_space<vmem>>, %arg3: memref<1x4xf32, #tpu.memory_space<vmem>>, %arg4: memref<3x3x4x4xbf16, #tpu.memory_space<vmem>>, %arg5: memref<1x4xf32, #tpu.memory_space<vmem>>, %arg6: memref<4x16xbf16, #tpu.memory_space<vmem>>, %arg7: memref<1x16xf32, #tpu.memory_space<vmem>>, %arg8: memref<4x16xbf16, #tpu.memory_space<vmem>>, %arg9: memref<1x16xf32, #tpu.memory_space<vmem>>, %arg10: memref<1x16x16x16xbf16, #tpu.memory_space<vmem>>, %arg11: memref<18x18x4xbf16, #tpu.memory_space<vmem>>) attributes {dimension_semantics = [#tpu.dimension_semantics<parallel>], iteration_bounds = array<i64: 2>, scalar_prefetch = 0 : i64, scratch_operands = 1 : i64, tpu.core_type = #tpu.core_type<tc>, window_params = [{transform_indices = @transform_0, window_bounds = array<i64: 1, 16, 16, 4>}, {pipeline_mode = #tpu.pipeline_mode<synchronous>, transform_indices = @transform_1, window_bounds = array<i64: 4, 4>}, {pipeline_mode = #tpu.pipeline_mode<synchronous>, transform_indices = @transform_2, window_bounds = array<i64: 1, 4>}, {pipeline_mode = #tpu.pipeline_mode<synchronous>, transform_indices = @transform_3, window_bounds = array<i64: 3, 3, 4, 4>}, {pipeline_mode = #tpu.pipeline_mode<synchronous>, transform_indices = @transform_4, window_bounds = array<i64: 1, 4>}, {pipeline_mode = #tpu.pipeline_mode<synchronous>, transform_indices = @transform_5, window_bounds = array<i64: 4, 16>}, {pipeline_mode = #tpu.pipeline_mode<synchronous>, transform_indices = @transform_6, window_bounds = array<i64: 1, 16>}, {pipeline_mode = #tpu.pipeline_mode<synchronous>, transform_indices = @transform_7, window_bounds = array<i64: 4, 16>}, {pipeline_mode = #tpu.pipeline_mode<synchronous>, transform_indices = @transform_8, window_bounds = array<i64: 1, 16>}, {transform_indices = @transform_9, window_bounds = array<i64: 1, 16, 16, 16>}]} {
    %cst = arith.constant 0.000000e+00 : bf16
    %0 = vector.broadcast %cst : bf16 to vector<18x18x4xbf16>
    %c0 = arith.constant 0 : index
    %c0_0 = arith.constant 0 : index
    %c0_1 = arith.constant 0 : index
    %1 = vector.load %arg11[%c0, %c0_0, %c0_1] : memref<18x18x4xbf16, #tpu.memory_space<vmem>>, vector<18x18x4xbf16>
    tpu.vector_store %arg11[%c0, %c0_0, %c0_1], %0 {strides = array<i32>} : memref<18x18x4xbf16, #tpu.memory_space<vmem>>, vector<18x18x4xbf16>,
    %c0_2 = arith.constant 0 : index
    %c0_3 = arith.constant 0 : index
    %c0_4 = arith.constant 0 : index
    %c0_5 = arith.constant 0 : index
    %2 = vector.load %arg1[%c0_2, %c0_3, %c0_4, %c0_5] : memref<1x16x16x4xbf16, #tpu.memory_space<vmem>>, vector<1x16x16x4xbf16>
    %3 = vector.shape_cast %2 : vector<1x16x16x4xbf16> to vector<16x16x4xbf16>
    %4 = vector.shape_cast %3 : vector<16x16x4xbf16> to vector<256x4xbf16>
    %c0_6 = arith.constant 0 : index
    %c0_7 = arith.constant 0 : index
    %5 = vector.load %arg2[%c0_6, %c0_7] : memref<4x4xbf16, #tpu.memory_space<vmem>>, vector<4x4xbf16>
    %cst_8 = arith.constant dense<0.000000e+00> : vector<256x4xf32>
    %6 = tpu.matmul %4, %5, %cst_8 {dimension_numbers = #tpu.dot_dimension_numbers<[1], [0], [0], [1], [0, 0, 1, 1], [], []>} : vector<256x4xbf16>, vector<4x4xbf16>, vector<256x4xf32> -> vector<256x4xf32>
    %c0_9 = arith.constant 0 : index
    %c0_10 = arith.constant 0 : index
    %7 = vector.load %arg3[%c0_9, %c0_10] : memref<1x4xf32, #tpu.memory_space<vmem>>, vector<1x4xf32>
    %8 = vector.broadcast %7 : vector<1x4xf32> to vector<256x4xf32>
    %9 = arith.addf %6, %8 : vector<256x4xf32>
    %cst_11 = arith.constant 0.000000e+00 : f32
    %10 = vector.broadcast %cst_11 : f32 to vector<256x4xf32>
    %11 = arith.maximumf %9, %10 : vector<256x4xf32>
    %12 = vector.shape_cast %11 : vector<256x4xf32> to vector<16x16x4xf32>
    %13 = arith.truncf %12 : vector<16x16x4xf32> to vector<16x16x4xbf16>
    %c1 = arith.constant 1 : index
    %c1_12 = arith.constant 1 : index
    %c0_13 = arith.constant 0 : index
    %14 = vector.load %arg11[%c1, %c1_12, %c0_13] : memref<18x18x4xbf16, #tpu.memory_space<vmem>>, vector<16x16x4xbf16>
    tpu.vector_store %arg11[%c1, %c1_12, %c0_13], %13 {strides = array<i32>} : memref<18x18x4xbf16, #tpu.memory_space<vmem>>, vector<16x16x4xbf16>,
    %cst_14 = arith.constant 0.000000e+00 : f32
    %15 = vector.broadcast %cst_14 : f32 to vector<256x4xf32>
    %c0_15 = arith.constant 0 : index
    %c0_16 = arith.constant 0 : index
    %c0_17 = arith.constant 0 : index
    %16 = vector.load %arg11[%c0_15, %c0_16, %c0_17] : memref<18x18x4xbf16, #tpu.memory_space<vmem>>, vector<16x16x4xbf16>
    %17 = vector.shape_cast %16 : vector<16x16x4xbf16> to vector<256x4xbf16>
    %c0_18 = arith.constant 0 : index
    %c0_19 = arith.constant 0 : index
    %c0_20 = arith.constant 0 : index
    %c0_21 = arith.constant 0 : index
    %18 = vector.load %arg4[%c0_18, %c0_19, %c0_20, %c0_21] : memref<3x3x4x4xbf16, #tpu.memory_space<vmem>>, vector<1x1x4x4xbf16>
    %19 = vector.shape_cast %18 : vector<1x1x4x4xbf16> to vector<4x4xbf16>
    %cst_22 = arith.constant dense<0.000000e+00> : vector<256x4xf32>
    %20 = tpu.matmul %17, %19, %cst_22 {dimension_numbers = #tpu.dot_dimension_numbers<[1], [0], [0], [1], [0, 0, 1, 1], [], []>} : vector<256x4xbf16>, vector<4x4xbf16>, vector<256x4xf32> -> vector<256x4xf32>
    %21 = arith.addf %15, %20 : vector<256x4xf32>
    %c0_23 = arith.constant 0 : index
    %c1_24 = arith.constant 1 : index
    %c0_25 = arith.constant 0 : index
    %22 = vector.load %arg11[%c0_23, %c1_24, %c0_25] : memref<18x18x4xbf16, #tpu.memory_space<vmem>>, vector<16x16x4xbf16>
    %23 = vector.shape_cast %22 : vector<16x16x4xbf16> to vector<256x4xbf16>
    %c0_26 = arith.constant 0 : index
    %c1_27 = arith.constant 1 : index
    %c0_28 = arith.constant 0 : index
    %c0_29 = arith.constant 0 : index
    %24 = vector.load %arg4[%c0_26, %c1_27, %c0_28, %c0_29] : memref<3x3x4x4xbf16, #tpu.memory_space<vmem>>, vector<1x1x4x4xbf16>
    %25 = vector.shape_cast %24 : vector<1x1x4x4xbf16> to vector<4x4xbf16>
    %cst_30 = arith.constant dense<0.000000e+00> : vector<256x4xf32>
    %26 = tpu.matmul %23, %25, %cst_30 {dimension_numbers = #tpu.dot_dimension_numbers<[1], [0], [0], [1], [0, 0, 1, 1], [], []>} : vector<256x4xbf16>, vector<4x4xbf16>, vector<256x4xf32> -> vector<256x4xf32>
    %27 = arith.addf %21, %26 : vector<256x4xf32>
    %c0_31 = arith.constant 0 : index
    %c2 = arith.constant 2 : index
    %c0_32 = arith.constant 0 : index
    %28 = vector.load %arg11[%c0_31, %c2, %c0_32] : memref<18x18x4xbf16, #tpu.memory_space<vmem>>, vector<16x16x4xbf16>
    %29 = vector.shape_cast %28 : vector<16x16x4xbf16> to vector<256x4xbf16>
    %c0_33 = arith.constant 0 : index
    %c2_34 = arith.constant 2 : index
    %c0_35 = arith.constant 0 : index
    %c0_36 = arith.constant 0 : index
    %30 = vector.load %arg4[%c0_33, %c2_34, %c0_35, %c0_36] : memref<3x3x4x4xbf16, #tpu.memory_space<vmem>>, vector<1x1x4x4xbf16>
    %31 = vector.shape_cast %30 : vector<1x1x4x4xbf16> to vector<4x4xbf16>
    %cst_37 = arith.constant dense<0.000000e+00> : vector<256x4xf32>
    %32 = tpu.matmul %29, %31, %cst_37 {dimension_numbers = #tpu.dot_dimension_numbers<[1], [0], [0], [1], [0, 0, 1, 1], [], []>} : vector<256x4xbf16>, vector<4x4xbf16>, vector<256x4xf32> -> vector<256x4xf32>
    %33 = arith.addf %27, %32 : vector<256x4xf32>
    %c1_38 = arith.constant 1 : index
    %c0_39 = arith.constant 0 : index
    %c0_40 = arith.constant 0 : index
    %34 = vector.load %arg11[%c1_38, %c0_39, %c0_40] : memref<18x18x4xbf16, #tpu.memory_space<vmem>>, vector<16x16x4xbf16>
    %35 = vector.shape_cast %34 : vector<16x16x4xbf16> to vector<256x4xbf16>
    %c1_41 = arith.constant 1 : index
    %c0_42 = arith.constant 0 : index
    %c0_43 = arith.constant 0 : index
    %c0_44 = arith.constant 0 : index
    %36 = vector.load %arg4[%c1_41, %c0_42, %c0_43, %c0_44] : memref<3x3x4x4xbf16, #tpu.memory_space<vmem>>, vector<1x1x4x4xbf16>
    %37 = vector.shape_cast %36 : vector<1x1x4x4xbf16> to vector<4x4xbf16>
    %cst_45 = arith.constant dense<0.000000e+00> : vector<256x4xf32>
    %38 = tpu.matmul %35, %37, %cst_45 {dimension_numbers = #tpu.dot_dimension_numbers<[1], [0], [0], [1], [0, 0, 1, 1], [], []>} : vector<256x4xbf16>, vector<4x4xbf16>, vector<256x4xf32> -> vector<256x4xf32>
    %39 = arith.addf %33, %38 : vector<256x4xf32>
    %c1_46 = arith.constant 1 : index
    %c1_47 = arith.constant 1 : index
    %c0_48 = arith.constant 0 : index
    %40 = vector.load %arg11[%c1_46, %c1_47, %c0_48] : memref<18x18x4xbf16, #tpu.memory_space<vmem>>, vector<16x16x4xbf16>
    %41 = vector.shape_cast %40 : vector<16x16x4xbf16> to vector<256x4xbf16>
    %c1_49 = arith.constant 1 : index
    %c1_50 = arith.constant 1 : index
    %c0_51 = arith.constant 0 : index
    %c0_52 = arith.constant 0 : index
    %42 = vector.load %arg4[%c1_49, %c1_50, %c0_51, %c0_52] : memref<3x3x4x4xbf16, #tpu.memory_space<vmem>>, vector<1x1x4x4xbf16>
    %43 = vector.shape_cast %42 : vector<1x1x4x4xbf16> to vector<4x4xbf16>
    %cst_53 = arith.constant dense<0.000000e+00> : vector<256x4xf32>
    %44 = tpu.matmul %41, %43, %cst_53 {dimension_numbers = #tpu.dot_dimension_numbers<[1], [0], [0], [1], [0, 0, 1, 1], [], []>} : vector<256x4xbf16>, vector<4x4xbf16>, vector<256x4xf32> -> vector<256x4xf32>
    %45 = arith.addf %39, %44 : vector<256x4xf32>
    %c1_54 = arith.constant 1 : index
    %c2_55 = arith.constant 2 : index
    %c0_56 = arith.constant 0 : index
    %46 = vector.load %arg11[%c1_54, %c2_55, %c0_56] : memref<18x18x4xbf16, #tpu.memory_space<vmem>>, vector<16x16x4xbf16>
    %47 = vector.shape_cast %46 : vector<16x16x4xbf16> to vector<256x4xbf16>
    %c1_57 = arith.constant 1 : index
    %c2_58 = arith.constant 2 : index
    %c0_59 = arith.constant 0 : index
    %c0_60 = arith.constant 0 : index
    %48 = vector.load %arg4[%c1_57, %c2_58, %c0_59, %c0_60] : memref<3x3x4x4xbf16, #tpu.memory_space<vmem>>, vector<1x1x4x4xbf16>
    %49 = vector.shape_cast %48 : vector<1x1x4x4xbf16> to vector<4x4xbf16>
    %cst_61 = arith.constant dense<0.000000e+00> : vector<256x4xf32>
    %50 = tpu.matmul %47, %49, %cst_61 {dimension_numbers = #tpu.dot_dimension_numbers<[1], [0], [0], [1], [0, 0, 1, 1], [], []>} : vector<256x4xbf16>, vector<4x4xbf16>, vector<256x4xf32> -> vector<256x4xf32>
    %51 = arith.addf %45, %50 : vector<256x4xf32>
    %c2_62 = arith.constant 2 : index
    %c0_63 = arith.constant 0 : index
    %c0_64 = arith.constant 0 : index
    %52 = vector.load %arg11[%c2_62, %c0_63, %c0_64] : memref<18x18x4xbf16, #tpu.memory_space<vmem>>, vector<16x16x4xbf16>
    %53 = vector.shape_cast %52 : vector<16x16x4xbf16> to vector<256x4xbf16>
    %c2_65 = arith.constant 2 : index
    %c0_66 = arith.constant 0 : index
    %c0_67 = arith.constant 0 : index
    %c0_68 = arith.constant 0 : index
    %54 = vector.load %arg4[%c2_65, %c0_66, %c0_67, %c0_68] : memref<3x3x4x4xbf16, #tpu.memory_space<vmem>>, vector<1x1x4x4xbf16>
    %55 = vector.shape_cast %54 : vector<1x1x4x4xbf16> to vector<4x4xbf16>
    %cst_69 = arith.constant dense<0.000000e+00> : vector<256x4xf32>
    %56 = tpu.matmul %53, %55, %cst_69 {dimension_numbers = #tpu.dot_dimension_numbers<[1], [0], [0], [1], [0, 0, 1, 1], [], []>} : vector<256x4xbf16>, vector<4x4xbf16>, vector<256x4xf32> -> vector<256x4xf32>
    %57 = arith.addf %51, %56 : vector<256x4xf32>
    %c2_70 = arith.constant 2 : index
    %c1_71 = arith.constant 1 : index
    %c0_72 = arith.constant 0 : index
    %58 = vector.load %arg11[%c2_70, %c1_71, %c0_72] : memref<18x18x4xbf16, #tpu.memory_space<vmem>>, vector<16x16x4xbf16>
    %59 = vector.shape_cast %58 : vector<16x16x4xbf16> to vector<256x4xbf16>
    %c2_73 = arith.constant 2 : index
    %c1_74 = arith.constant 1 : index
    %c0_75 = arith.constant 0 : index
    %c0_76 = arith.constant 0 : index
    %60 = vector.load %arg4[%c2_73, %c1_74, %c0_75, %c0_76] : memref<3x3x4x4xbf16, #tpu.memory_space<vmem>>, vector<1x1x4x4xbf16>
    %61 = vector.shape_cast %60 : vector<1x1x4x4xbf16> to vector<4x4xbf16>
    %cst_77 = arith.constant dense<0.000000e+00> : vector<256x4xf32>
    %62 = tpu.matmul %59, %61, %cst_77 {dimension_numbers = #tpu.dot_dimension_numbers<[1], [0], [0], [1], [0, 0, 1, 1], [], []>} : vector<256x4xbf16>, vector<4x4xbf16>, vector<256x4xf32> -> vector<256x4xf32>
    %63 = arith.addf %57, %62 : vector<256x4xf32>
    %c2_78 = arith.constant 2 : index
    %c2_79 = arith.constant 2 : index
    %c0_80 = arith.constant 0 : index
    %64 = vector.load %arg11[%c2_78, %c2_79, %c0_80] : memref<18x18x4xbf16, #tpu.memory_space<vmem>>, vector<16x16x4xbf16>
    %65 = vector.shape_cast %64 : vector<16x16x4xbf16> to vector<256x4xbf16>
    %c2_81 = arith.constant 2 : index
    %c2_82 = arith.constant 2 : index
    %c0_83 = arith.constant 0 : index
    %c0_84 = arith.constant 0 : index
    %66 = vector.load %arg4[%c2_81, %c2_82, %c0_83, %c0_84] : memref<3x3x4x4xbf16, #tpu.memory_space<vmem>>, vector<1x1x4x4xbf16>
    %67 = vector.shape_cast %66 : vector<1x1x4x4xbf16> to vector<4x4xbf16>
    %cst_85 = arith.constant dense<0.000000e+00> : vector<256x4xf32>
    %68 = tpu.matmul %65, %67, %cst_85 {dimension_numbers = #tpu.dot_dimension_numbers<[1], [0], [0], [1], [0, 0, 1, 1], [], []>} : vector<256x4xbf16>, vector<4x4xbf16>, vector<256x4xf32> -> vector<256x4xf32>
    %69 = arith.addf %63, %68 : vector<256x4xf32>
    %c0_86 = arith.constant 0 : index
    %c0_87 = arith.constant 0 : index
    %70 = vector.load %arg5[%c0_86, %c0_87] : memref<1x4xf32, #tpu.memory_space<vmem>>, vector<1x4xf32>
    %71 = vector.broadcast %70 : vector<1x4xf32> to vector<256x4xf32>
    %72 = arith.addf %69, %71 : vector<256x4xf32>
    %cst_88 = arith.constant 0.000000e+00 : f32
    %73 = vector.broadcast %cst_88 : f32 to vector<256x4xf32>
    %74 = arith.maximumf %72, %73 : vector<256x4xf32>
    %75 = arith.truncf %74 : vector<256x4xf32> to vector<256x4xbf16>
    %c0_89 = arith.constant 0 : index
    %c0_90 = arith.constant 0 : index
    %76 = vector.load %arg6[%c0_89, %c0_90] : memref<4x16xbf16, #tpu.memory_space<vmem>>, vector<4x16xbf16>
    %cst_91 = arith.constant dense<0.000000e+00> : vector<256x16xf32>
    %77 = tpu.matmul %75, %76, %cst_91 {dimension_numbers = #tpu.dot_dimension_numbers<[1], [0], [0], [1], [0, 0, 1, 1], [], []>} : vector<256x4xbf16>, vector<4x16xbf16>, vector<256x16xf32> -> vector<256x16xf32>
    %c0_92 = arith.constant 0 : index
    %c0_93 = arith.constant 0 : index
    %78 = vector.load %arg7[%c0_92, %c0_93] : memref<1x16xf32, #tpu.memory_space<vmem>>, vector<1x16xf32>
    %79 = vector.broadcast %78 : vector<1x16xf32> to vector<256x16xf32>
    %80 = arith.addf %77, %79 : vector<256x16xf32>
    %c0_94 = arith.constant 0 : index
    %c0_95 = arith.constant 0 : index
    %81 = vector.load %arg8[%c0_94, %c0_95] : memref<4x16xbf16, #tpu.memory_space<vmem>>, vector<4x16xbf16>
    %cst_96 = arith.constant dense<0.000000e+00> : vector<256x16xf32>
    %82 = tpu.matmul %4, %81, %cst_96 {dimension_numbers = #tpu.dot_dimension_numbers<[1], [0], [0], [1], [0, 0, 1, 1], [], []>} : vector<256x4xbf16>, vector<4x16xbf16>, vector<256x16xf32> -> vector<256x16xf32>
    %c0_97 = arith.constant 0 : index
    %c0_98 = arith.constant 0 : index
    %83 = vector.load %arg9[%c0_97, %c0_98] : memref<1x16xf32, #tpu.memory_space<vmem>>, vector<1x16xf32>
    %84 = vector.broadcast %83 : vector<1x16xf32> to vector<256x16xf32>
    %85 = arith.addf %82, %84 : vector<256x16xf32>
    %86 = arith.addf %80, %85 : vector<256x16xf32>
    %cst_99 = arith.constant 0.000000e+00 : f32
    %87 = vector.broadcast %cst_99 : f32 to vector<256x16xf32>
    %88 = arith.maximumf %86, %87 : vector<256x16xf32>
    %89 = vector.shape_cast %88 : vector<256x16xf32> to vector<16x16x16xf32>
    %90 = arith.truncf %89 : vector<16x16x16xf32> to vector<16x16x16xbf16>
    %c0_100 = arith.constant 0 : index
    %c0_101 = arith.constant 0 : index
    %c0_102 = arith.constant 0 : index
    %c0_103 = arith.constant 0 : index
    %91 = vector.load %arg10[%c0_100, %c0_101, %c0_102, %c0_103] : memref<1x16x16x16xbf16, #tpu.memory_space<vmem>>, vector<1x16x16x16xbf16>
    %92 = vector.shape_cast %91 : vector<1x16x16x16xbf16> to vector<16x16x16xbf16>
    %93 = vector.shape_cast %90 : vector<16x16x16xbf16> to vector<1x16x16x16xbf16>
    tpu.vector_store %arg10[%c0_100, %c0_101, %c0_102, %c0_103], %93 {strides = array<i32>} : memref<1x16x16x16xbf16, #tpu.memory_space<vmem>>, vector<1x16x16x16xbf16>,
    return
  }
  func.func @transform_0(%arg0: i32) -> (i32, i32, i32, i32) {
    %c0_i32 = arith.constant 0 : i32
    %c0_i32_0 = arith.constant 0 : i32
    %c0_i32_1 = arith.constant 0 : i32
    %c0_i32_2 = arith.constant 0 : i32
    return %arg0, %c0_i32, %c0_i32_0, %c0_i32_1 : i32, i32, i32, i32
  }
  func.func @transform_1(%arg0: i32) -> (i32, i32) {
    %c0_i32 = arith.constant 0 : i32
    %c0_i32_0 = arith.constant 0 : i32
    %c0_i32_1 = arith.constant 0 : i32
    return %c0_i32, %c0_i32_0 : i32, i32
  }
  func.func @transform_2(%arg0: i32) -> (i32, i32) {
    %c0_i32 = arith.constant 0 : i32
    %c0_i32_0 = arith.constant 0 : i32
    %c0_i32_1 = arith.constant 0 : i32
    return %c0_i32, %c0_i32_0 : i32, i32
  }
  func.func @transform_3(%arg0: i32) -> (i32, i32, i32, i32) {
    %c0_i32 = arith.constant 0 : i32
    %c0_i32_0 = arith.constant 0 : i32
    %c0_i32_1 = arith.constant 0 : i32
    %c0_i32_2 = arith.constant 0 : i32
    %c0_i32_3 = arith.constant 0 : i32
    return %c0_i32, %c0_i32_0, %c0_i32_1, %c0_i32_2 : i32, i32, i32, i32
  }
  func.func @transform_4(%arg0: i32) -> (i32, i32) {
    %c0_i32 = arith.constant 0 : i32
    %c0_i32_0 = arith.constant 0 : i32
    %c0_i32_1 = arith.constant 0 : i32
    return %c0_i32, %c0_i32_0 : i32, i32
  }
  func.func @transform_5(%arg0: i32) -> (i32, i32) {
    %c0_i32 = arith.constant 0 : i32
    %c0_i32_0 = arith.constant 0 : i32
    %c0_i32_1 = arith.constant 0 : i32
    return %c0_i32, %c0_i32_0 : i32, i32
  }
  func.func @transform_6(%arg0: i32) -> (i32, i32) {
    %c0_i32 = arith.constant 0 : i32
    %c0_i32_0 = arith.constant 0 : i32
    %c0_i32_1 = arith.constant 0 : i32
    return %c0_i32, %c0_i32_0 : i32, i32
  }
  func.func @transform_7(%arg0: i32) -> (i32, i32) {
    %c0_i32 = arith.constant 0 : i32
    %c0_i32_0 = arith.constant 0 : i32
    %c0_i32_1 = arith.constant 0 : i32
    return %c0_i32, %c0_i32_0 : i32, i32
  }
  func.func @transform_8(%arg0: i32) -> (i32, i32) {
    %c0_i32 = arith.constant 0 : i32
    %c0_i32_0 = arith.constant 0 : i32
    %c0_i32_1 = arith.constant 0 : i32
    return %c0_i32, %c0_i32_0 : i32, i32
  }
  func.func @transform_9(%arg0: i32) -> (i32, i32, i32, i32) {
    %c0_i32 = arith.constant 0 : i32
    %c0_i32_0 = arith.constant 0 : i32
    %c0_i32_1 = arith.constant 0 : i32
    %c0_i32_2 = arith.constant 0 : i32
    return %arg0, %c0_i32, %c0_i32_0, %c0_i32_1 : i32, i32, i32, i32
  }
}

</mosaic_0001>

<bundles_post_ra>
// kernel: tpu_custom_call.1
= control target key start
LH: loop header
LB: loop body
LE: loop exit
PB: predicated region body
PF: predicated region fallthrough
CT: control target
= control target key end

     0   :  { %14 = vsyncpa [#allocation4], 0  ;;  %s8360_s0 = inlined_call_operand.vmem [shape: bf16[2,16,16,4], index: 0, kind: input, shape index: {}]   ;;  %s8361_s1 = inlined_call_operand.vmem [shape: bf16[4,4], index: 1, kind: input, shape index: {}]   ;;  %s8362_s2 = inlined_call_operand.vmem [shape: f32[1,4], index: 2, kind: input, shape index: {}]   ;;  %s8363_s3 = inlined_call_operand.vmem [shape: bf16[3,3,4,4], index: 3, kind: input, shape index: {}]   ;;  %s8364_s4 = inlined_call_operand.vmem [shape: f32[1,4], index: 4, kind: input, shape index: {}]   ;;  %s8365_s5 = inlined_call_operand.vmem [shape: bf16[4,16], index: 5, kind: input, shape index: {}]   ;;  %s8366_s6 = inlined_call_operand.vmem [shape: f32[1,16], index: 6, kind: input, shape index: {}]   ;;  %s8367_s7 = inlined_call_operand.vmem [shape: bf16[4,16], index: 7, kind: input, shape index: {}]   ;;  %s8368_s8 = inlined_call_operand.vmem [shape: f32[1,16], index: 8, kind: input, shape index: {}]   ;;  %s8369_s9 = inlined_call_operand.hbm [shape: bf16[2,16,16,16], index: 9, kind: output, shape index: {}]  }
   0x1   :  { %16 = vsyncpa [#allocation4 + $0x1], 0  ;;  %s6362_s30 = smov 0   ;;  %s6364_s10 = smov 0  }
   0x2   :  { %s6366_s11 = smov 0   ;;  %s6368_s12 = smov 0  }
   0x3 LB: > { %s6383_s13 = sadd.s32 4294967295, %s6307_s12   ;;  %s5593_s14 = sadd.s32 4294967294, %s6307_s12   ;;  %s6307_s12 = sphi %s6368_s12, %s8457_s12   ;;  %s6303_s11 = sphi %s6366_s11, %s8456_s11   ;;  %s6299_s10 = sphi %s6364_s10, %s8455_s10   ;;  %s6295_s30 = sphi %s6362_s30, %s8454_s30  }
   0x4   : > { %s6387_s15 = sadd.s32 1, %s6307_s12   ;;  %s223_s16 = sadd.s32 1, %s6303_s11 }
   0x5   : > { %s220_s17 = ssub.s32 %s6307_s12, %s6387_s15  ;;  %p233_p0 = scmp.ne.s32.totalorder %s6303_s11, %s6299_s10 }
   0x6   : > { %p221_p1 = scmp.eq.s32.totalorder %s220_s17, 0  ;;  %p234_p2 = scmp.eq.s32.totalorder %s6383_s13, 1 }
   0x7   : > { %p239_p3 = scmp.ne.s32.totalorder %s6299_s10, %s6295_s30  ;;  %p240_p4 = scmp.eq.s32.totalorder %s5593_s14, 1 }
   0x8   : > { %s6398_s18 = scalar_select %p221_p1, %s6303_s11, %s223_s16  }
   0x9   : > { %p6400_p5 = por %p234_p2, %p233_p0  ;;  %p6404_p6 = por %p240_p4, %p239_p3 }
   0xa   : > { %p5596_p7 = scmp.ge.s32.totalorder %s6307_s12, 1  ;;  %p290_p8 = scmp.lt.s32.totalorder %s6307_s12, 3 }
   0xc   : > { %p291_p9 = pnand %p5596_p7, %p290_p8 }
   0xe   : > { %294 = sbr.rel (%p291_p9) target bundleno = 1226 (0x4ca), region = 56 }
  0x13   : > { %v420_v0 = vld [vmem:[%s8361_s1] sm:$0x3]  ;;  %vm554_vm0 = vcmask 1041408   ;;  %p326_p10 = scmp.lt.s32.totalorder %s6383_s13, 1  ;;  %vm505_vm1 = vcmask 31744   ;;  %vm332_vm2 = vcmask 27648  }
  0x14   : > { %v556_v1 = vsel %vm554_vm0, %v420_v0, 0  ;;  %v6309_v8 = vmov 0   ;;  %v1184_v10 = vld [vmem:[%s8363_s3] sm:$0x3]  ;;  %v5793_v12 = vld [vmem:[%s8363_s3 + $0x4] sm:$0x3] }
  0x15   : > { %565 = vmatpush.bf16.msra.mxu0 %v556_v1  ;;  %s327_s23 = scalar_select %p326_p10, %s6383_s13, 1  ;;  %337 = vst.msk [vmem:[#allocation2 + $0xc] sm:$0xf] %vm332_vm2, %v6309_v8  ;;  %v1907_v11 = vsel %vm554_vm0, %v1184_v10, 0  ;;  %v2260_v14 = vsel %vm554_vm0, %v5793_v12, 0  ;;  %vm335_vm3 = vcmask 24576  }
  0x16   : > { %333 = vst.msk [vmem:[#allocation2] sm:$0xf] %vm332_vm2, %v6309_v8  ;;  %1916 = vmatpush.bf16.msra.mxu2 %v1907_v11  ;;  %2269 = vmatpush.bf16.msra.mxu3 %v2260_v14  ;;  %v5680_v17 = vld [vmem:[%s8363_s3 + $0x2] sm:$0x3]  ;;  %vm2046_vm4 = vcmask 1042432   ;;  %vm2047_vm5 = vcmask 1046532  }
  0x17   : > { %s6109_s24 = sshll.u32 %s327_s23, 7  ;;  %334 = vst.msk [vmem:[#allocation2 + $0x4] sm:$0xf] %vm332_vm2, %v6309_v8  ;;  %v1687_v18 = vsel %vm554_vm0, %v5680_v17, 0  ;;  %vm1201_vm6 = vsmask.f32 3328  ;;  %vm6532_vm8 = vmor %vm2046_vm4, %vm2047_vm5 }
  0x18   : > { %s6419_s27 = scalar_lea.vmem %s8360_s0, %s6109_s24  ;;  %338 = vst.msk [vmem:[#allocation2 + $0x10] sm:$0xf] %vm332_vm2, %v6309_v8  ;;  %1696 = vmatpush.bf16.msra.mxu1 %v1687_v18  ;;  %vm1202_vm7 = vsmask.f32 7440  ;;  %v6539_v34 = vld [vmem:[%s8362_s2] ss:$0 sm:$0xff] }
  0x19   : > { %v6110_v2 = vld [vmem:[%s6419_s27] sm:$0xff]  ;;  %v6111_v3 = vld [vmem:[%s6419_s27 + $0x8] sm:$0xff]  ;;  %v6112_v4 = vld [vmem:[%s6419_s27 + $0x10] sm:$0xff]  ;;  %340 = vst.msk [vmem:[#allocation2 + $0x18] sm:$0xf] %vm332_vm2, %v6309_v8  ;;  %s323_s29 = sand.u32 1, %s6299_s10  }
  0x1a   : > { %5664 = vmatmul.msk.bf16.vlgmr.msra.gmra.mxu0 %vm505_vm1, %v6110_v2  ;;  %v6113_v5 = vld [vmem:[%s6419_s27 + $0x18] sm:$0xff]  ;;  %v6114_v6 = vld [vmem:[%s6419_s27 + $0x20] sm:$0xff]  ;;  %v6115_v7 = vld [vmem:[%s6419_s27 + $0x28] sm:$0xff]  ;;  %341 = vst.msk [vmem:[#allocation2 + $0x1c] sm:$0xf] %vm332_vm2, %v6309_v8  ;;  %s5597_s14 = sshll.u32 %s323_s29, 7 }
  0x1b   : > { %343 = vst.msk [vmem:[#allocation2 + $0x24] sm:$0xf] %vm332_vm2, %v6309_v8  ;;  %v6116_v9 = vld [vmem:[%s6419_s27 + $0x30] sm:$0xff]  ;;  %v6117_v16 = vld [vmem:[%s6419_s27 + $0x38] sm:$0xff]  ;;  %vm6543_vm9 = vmor %vm1201_vm6, %vm1202_vm7  ;;  %vm1036_vm10 = vsmask.f32 7938 }
  0x1c   : > { %344 = vst.msk [vmem:[#allocation2 + $0x28] sm:$0xf] %vm332_vm2, %v6309_v8  ;;  %v6118_v37 = vld [vmem:[%s6419_s27 + $0x40] sm:$0xff]  ;;  %v5891_v62 = vld [vmem:[%s8363_s3 + $0x8] sm:$0x3]  ;;  %vm6594_vm11 = vmand %vm332_vm2, %vm1036_vm10  ;;  %s8161_s16 = scalar_lea.vmem [#allocation3], %s5597_s14 }
  0x1d   : > { %346 = vst.msk [vmem:[#allocation2 + $0x30] sm:$0xf] %vm332_vm2, %v6309_v8  ;;  %v1152_v15 = vld [vmem:[#allocation2] sm:$0xf]  ;;  %v5810_v58 = vld [vmem:[%s8363_s3 + $0x6] sm:$0x3] }
  0x1e   : > { %347 = vst.msk [vmem:[#allocation2 + $0x34] sm:$0xf] %vm332_vm2, %v6309_v8  ;;  %v6126_v13 = vld [vmem:[#allocation2] sm:$0xff]  ;;  %v1205_v19 = vshrl.u32 %v1152_v15, 16  ;;  %v1208_v20 = vshll.u32 %v1152_v15, 16  ;;  %v2546_v61 = vsel %vm554_vm0, %v5810_v58, 0 }
  0x1f   : > { %349 = vst.msk [vmem:[#allocation2 + $0x3c] sm:$0xf] %vm332_vm2, %v6309_v8  ;;  %5761 = vmatmul.msk.bf16.vlgmr.msra.gmra.mxu2 %vm505_vm1, %v6126_v13  ;;  %v1153_v21 = vld [vmem:[#allocation2 + $0x4] sm:$0xf]  ;;  %v1998_v26 = vld [vmem:[#allocation2] sm:$0xe]  ;;  %2555 = vmatpush.bf16.msrb.mxu0 %v2546_v61 }
  0x20   : > { %350 = vst.msk [vmem:[#allocation2 + $0x40] sm:$0xf] %vm332_vm2, %v6309_v8  ;;  %v1207_v22 = vrot.slane %v1205_v19, 4  ;;  %v1210_v23 = vrot.slane %v1208_v20, 5  ;;  %v1214_v24 = vshll.u32 %v1153_v21, 16  ;;  %v1218_v25 = vshrl.u32 %v1153_v21, 16 }
  0x21   : > { %352 = vst.msk [vmem:[#allocation2 + $0x48] sm:$0xf] %vm332_vm2, %v6309_v8  ;;  %v5777_v30 = vrot.slane %v1998_v26, 9  ;;  %v2051_v31 = vrot.slane %v1153_v21, 5  ;;  %v3200_v2 = vsel %vm554_vm0, %v5891_v62, 0  ;;  %v6119_v10 = vld [vmem:[%s6419_s27 + $0x48] sm:$0xff] }
  0x22   : > { %353 = vst.msk [vmem:[#allocation2 + $0x4c] sm:$0xf] %vm332_vm2, %v6309_v8  ;;  %v1211_v27 = vor.u32 %v1210_v23, %v1207_v22  ;;  %v1216_v28 = vrot.slane %v1214_v24, 5  ;;  %v1220_v29 = vrot.slane %v1218_v25, 4  ;;  %3209 = vmatpush.bf16.msrb.mxu1 %v3200_v2  ;;  %vm711_vm12 = vsmask.f32 256 }
  0x23   : > { %355 = vst.msk [vmem:[#allocation2 + $0x54] sm:$0xf] %vm332_vm2, %v6309_v8  ;;  %v2052_v38 = vsel %vm6532_vm8, %v5777_v30, %v2051_v31  ;;  %v2053_v39 = vrot.slane %v2051_v31, 4  ;;  %vm712_vm13 = vsmask.f32 4368  ;;  %vm6608_vm15 = vmand %vm335_vm3, %vm711_vm12  ;;  %s5528_s23 = sshll.u32 %s8161_s16, 4  ;;  %s5529_s23 = int_to_ptr.vmem [resolvable:$true] %s5528_s23 }
  0x24   : > { %356 = vst.msk [vmem:[#allocation2 + $0x58] sm:$0xf] %vm332_vm2, %v6309_v8  ;;  %v1212_v33 = vrot.slane %v1211_v27, 4  ;;  %v1221_v36 = vor.u32 %v1220_v29, %v1216_v28  ;;  %v2163_v47 = vunpack.c.l.b16 %v2052_v38  ;;  %vm6602_vm14 = vmor %vm711_vm12, %vm712_vm13 }
  0x25   : > { %358 = vst.msk [vmem:[#allocation2 + $0x60] sm:$0xf] %vm332_vm2, %v6309_v8 }
  0x26   : > { %359 = vst.msk [vmem:[#allocation2 + $0x64] sm:$0xf] %vm332_vm2, %v6309_v8  ;;  %v1217_v42 = vsel %vm6543_vm9, %v1212_v33, %v1216_v28  ;;  %v1222_v45 = vrot.slane %v1221_v36, 4  ;;  %v1047_v36 = vld [vmem:[#allocation2 + $0x18] sm:$0xf] }
  0x27   : > { %361 = vst.msk [vmem:[#allocation2 + $0x6c] sm:$0xf] %vm332_vm2, %v6309_v8  ;;  %v1590_v52 = vunpack.c.l.b16 %v1217_v42 }
  0x28   : > { %362 = vst.msk [vmem:[#allocation2 + $0x70] sm:$0xf] %vm332_vm2, %v6309_v8 }
  0x29   : > { %364 = vst.msk [vmem:[#allocation2 + $0x78] sm:$0xf] %vm332_vm2, %v6309_v8 }
  0x2a   : > { %5665 = vmatmul.msk.bf16.gmra.mxu0 %vm505_vm1, %v6111_v3  ;;  %365 = vst.msk [vmem:[#allocation2 + $0x7c] sm:$0xf] %vm332_vm2, %v6309_v8 }
  0x2b   : > { %367 = vst.msk [vmem:[#allocation2 + $0x84] sm:$0xf] %vm332_vm2, %v6309_v8 }
  0x2c   : > { %368 = vst.msk [vmem:[#allocation2 + $0x88] sm:$0xf] %vm332_vm2, %v6309_v8 }
  0x2d   : > { %370 = vst.msk [vmem:[#allocation2 + $0x90] sm:$0xf] %vm332_vm2, %v6309_v8 }
  0x2e   : > { %371 = vst.msk [vmem:[#allocation2 + $0x94] sm:$0xf] %vm332_vm2, %v6309_v8 }
  0x2f   : > { %373 = vst.msk [vmem:[#allocation2 + $0x9c] sm:$0xf] %vm332_vm2, %v6309_v8 }
  0x30   : > { %374 = vst.msk [vmem:[#allocation2 + $0xa0] sm:$0xf] %vm332_vm2, %v6309_v8 }
  0x31   : > { %376 = vst.msk [vmem:[#allocation2 + $0xa8] sm:$0xf] %vm332_vm2, %v6309_v8 }
  0x32   : > { %377 = vst.msk [vmem:[#allocation2 + $0xac] sm:$0xf] %vm332_vm2, %v6309_v8 }
  0x33   : > { %379 = vst.msk [vmem:[#allocation2 + $0xb4] sm:$0xf] %vm332_vm2, %v6309_v8 }
  0x34   : > { %380 = vst.msk [vmem:[#allocation2 + $0xb8] sm:$0xf] %vm332_vm2, %v6309_v8 }
  0x35   : > { %382 = vst.msk [vmem:[#allocation2 + $0xc0] sm:$0xf] %vm332_vm2, %v6309_v8 }
  0x36   : > { %383 = vst.msk [vmem:[#allocation2 + $0xc4] sm:$0xf] %vm332_vm2, %v6309_v8 }
  0x37   : > { %385 = vst.msk [vmem:[#allocation2 + $0xcc] sm:$0xf] %vm332_vm2, %v6309_v8 }
  0x38   : > { %386 = vst.msk [vmem:[#allocation2 + $0xd0] sm:$0xf] %vm332_vm2, %v6309_v8 }
  0x39   : > { %339 = vst.msk [vmem:[#allocation2 + $0x14] sm:$0x1] %vm335_vm3, %v6309_v8 }
  0x3a   : > { %5666 = vmatmul.msk.bf16.gmra.mxu0 %vm505_vm1, %v6112_v4  ;;  %336 = vst.msk [vmem:[#allocation2 + $0x8] sm:$0x1] %vm335_vm3, %v6309_v8  ;;  %v1038_v4 = vld [vmem:[#allocation2 + $0xc] sm:$0xf] }
  0x3b   : > { %342 = vst.msk [vmem:[#allocation2 + $0x20] sm:$0x1] %vm335_vm3, %v6309_v8 }
  0x3c   : > { %345 = vst.msk [vmem:[#allocation2 + $0x2c] sm:$0x1] %vm335_vm3, %v6309_v8 }
  0x3d   : > { %348 = vst.msk [vmem:[#allocation2 + $0x38] sm:$0x1] %vm335_vm3, %v6309_v8 }
  0x3e   : > { %351 = vst.msk [vmem:[#allocation2 + $0x44] sm:$0x1] %vm335_vm3, %v6309_v8 }
  0x3f   : > { %354 = vst.msk [vmem:[#allocation2 + $0x50] sm:$0x1] %vm335_vm3, %v6309_v8 }
  0x40   : > { %357 = vst.msk [vmem:[#allocation2 + $0x5c] sm:$0x1] %vm335_vm3, %v6309_v8  ;;  %v1044_v17 = vld [vmem:[#allocation2 + $0x14] sm:$0x1] }
  0x41   : > { %360 = vst.msk [vmem:[#allocation2 + $0x68] sm:$0x1] %vm335_vm3, %v6309_v8  ;;  %v1185_v41 = vld [vmem:[#allocation2 + $0x8] sm:$0x1] }
  0x42   : > { %363 = vst.msk [vmem:[#allocation2 + $0x74] sm:$0x1] %vm335_vm3, %v6309_v8  ;;  %v2054_v44 = vrot.slane %v1185_v41, 5  ;;  %v1224_v46 = vshll.u32 %v1185_v41, 16 }
  0x43   : > { %366 = vst.msk [vmem:[#allocation2 + $0x80] sm:$0x1] %vm335_vm3, %v6309_v8 }
  0x44   : > { %369 = vst.msk [vmem:[#allocation2 + $0x8c] sm:$0x1] %vm335_vm3, %v6309_v8  ;;  %v2055_v49 = vsel %vm6532_vm8, %v2053_v39, %v2054_v44  ;;  %v1226_v50 = vrot.slane %v1224_v46, 5 }
  0x45   : > { %372 = vst.msk [vmem:[#allocation2 + $0x98] sm:$0x1] %vm335_vm3, %v6309_v8  ;;  %v2164_v51 = vunpack.c.l.b16 %v2055_v49 }
  0x46   : > { %375 = vst.msk [vmem:[#allocation2 + $0xa4] sm:$0x1] %vm335_vm3, %v6309_v8  ;;  %v1227_v54 = vsel %vm6543_vm9, %v1222_v45, %v1226_v50 }
  0x47   : > { %378 = vst.msk [vmem:[#allocation2 + $0xb0] sm:$0x1] %vm335_vm3, %v6309_v8  ;;  %v2195_v55 = vpack.c.b16 %v2164_v51, %v2163_v47  ;;  %v1591_v56 = vunpack.c.l.b16 %v1227_v54 }
  0x48   : > { %381 = vst.msk [vmem:[#allocation2 + $0xbc] sm:$0x1] %vm335_vm3, %v6309_v8 }
  0x49   : > { %384 = vst.msk [vmem:[#allocation2 + $0xc8] sm:$0x1] %vm335_vm3, %v6309_v8  ;;  %5794 = vmatmul.msk.bf16.vlgmr.msra.gmra.mxu3 %vm505_vm1, %v2195_v55  ;;  %v1622_v60 = vpack.c.b16 %v1591_v56, %v1590_v52 }
  0x4a   : > { %5667 = vmatmul.msk.bf16.gmra.mxu0 %vm505_vm1, %v6113_v5  ;;  %387 = vst.msk [vmem:[#allocation2 + $0xd4] sm:$0x1] %vm335_vm3, %v6309_v8 }
  0x4b   : > { %5681 = vmatmul.msk.bf16.vlgmr.msra.gmra.mxu1 %vm505_vm1, %v1622_v60 }
  0x5a   : > { %5668 = vmatmul.msk.bf16.gmra.mxu0 %vm505_vm1, %v6114_v6 }
  0x6a   : > { %5669 = vmatmul.msk.bf16.gmra.mxu0 %vm505_vm1, %v6115_v7 }
  0x7a   : > { %5670 = vmatmul.msk.bf16.gmra.mxu0 %vm505_vm1, %v6116_v9 }
  0x8a   : > { %5671 = vmatmul.msk.bf16.gmra.mxu0 %vm505_vm1, %v6117_v16 }
  0x97   : > { %v567_v40 = vpop.f32.mrf.mxu0 }
  0x98   : > { %v568_v43 = vadd.f32 %v6539_v34, %v567_v40 }
  0x9a   : > { %v647_v48 = vmax.f32 %v568_v43, 0.0  ;;  %5672 = vmatmul.msk.bf16.gmra.mxu0 %vm505_vm1, %v6118_v37 }
  0x9c   : > { %v679_v53 = vpack.c.bf16 %v647_v48, %v647_v48 }
  0x9e   : > { %v715_v57 = vshrl.u32 %v679_v53, 16  ;;  %v718_v0 = vshll.u32 %v679_v53, 16  ;;  %v6120_v53 = vld [vmem:[%s6419_s27 + $0x50] sm:$0xff] }
  0x9f   : > { %v569_v59 = vpop.f32.mrf.mxu0 }
  0xa0   : > { %v717_v63 = vrot.slane %v715_v57, 7  ;;  %v570_v1 = vadd.f32 %v6539_v34, %v569_v59 }
  0xa2   : > { %v720_v5 = vor.u32 %v718_v0, %v717_v63  ;;  %v648_v6 = vmax.f32 %v570_v1, 0.0  ;;  %v721_v18 = vrot.slane %v717_v63, 4  ;;  %v1051_v0 = vld [vmem:[#allocation2 + $0x20] sm:$0x1] }
  0xa4   : > { %v1039_v7 = vsel %vm6594_vm11, %v720_v5, %v1038_v4  ;;  %v680_v9 = vpack.c.bf16 %v648_v6, %v648_v6 }
  0xa5   : > { %1040 = vst [vmem:[#allocation2 + $0xc] sm:$0xf] %v1039_v7 }
  0xa6   : > { %v723_v8 = vshrl.u32 %v680_v9, 16  ;;  %v726_v14 = vshll.u32 %v680_v9, 16 }
  0xa7   : > { %v572_v11 = vpop.f32.mrf.mxu0 }
  0xa8   : > { %v725_v13 = vrot.slane %v723_v8, 7  ;;  %v573_v15 = vadd.f32 %v6539_v34, %v572_v11 }
  0xaa   : > { %v728_v19 = vor.u32 %v726_v14, %v725_v13  ;;  %v730_v20 = vrot.slane %v725_v13, 4  ;;  %v649_v21 = vmax.f32 %v573_v15, 0.0  ;;  %5673 = vmatmul.msk.bf16.gmra.mxu0 %vm505_vm1, %v6119_v10 }
  0xac   : > { %v729_v22 = vsel %vm6602_vm14, %v721_v18, %v728_v19  ;;  %v1045_v23 = vsel %vm6608_vm15, %v730_v20, %v1044_v17  ;;  %v681_v24 = vpack.c.bf16 %v649_v21, %v649_v21  ;;  %v1154_v25 = vld [vmem:[#allocation2 + $0xc] sm:$0xf] }
  0xad   : > { %1041 = vst.msk [vmem:[#allocation2 + $0x10] sm:$0xf] %vm332_vm2, %v729_v22  ;;  %v1229_v26 = vshrl.u32 %v1154_v25, 16  ;;  %v1232_v27 = vshll.u32 %v1154_v25, 16  ;;  %v1999_v37 = vld [vmem:[#allocation2 + $0xc] sm:$0xe] }
  0xae   : > { %1046 = vst [vmem:[#allocation2 + $0x14] sm:$0x1] %v1045_v23  ;;  %v732_v28 = vshrl.u32 %v681_v24, 16  ;;  %v735_v31 = vshll.u32 %v681_v24, 16  ;;  %v5778_v46 = vrot.slane %v1999_v37, 9 }
  0xaf   : > { %v574_v29 = vpop.f32.mrf.mxu0  ;;  %v1231_v38 = vrot.slane %v1229_v26, 4  ;;  %v1234_v39 = vrot.slane %v1232_v27, 5 }
  0xb0   : > { %v734_v30 = vrot.slane %v732_v28, 7  ;;  %v575_v33 = vadd.f32 %v6539_v34, %v574_v29 }
  0xb1   : > { %v1235_v49 = vor.u32 %v1234_v39, %v1231_v38 }
  0xb2   : > { %v737_v40 = vor.u32 %v735_v31, %v734_v30  ;;  %v650_v41 = vmax.f32 %v575_v33, 0.0  ;;  %v738_v51 = vrot.slane %v734_v30, 4  ;;  %v1054_v33 = vld [vmem:[#allocation2 + $0x24] sm:$0xf] }
  0xb3   : > { %v1236_v4 = vrot.slane %v1235_v49, 4 }
  0xb4   : > { %v1048_v42 = vsel %vm6594_vm11, %v737_v40, %v1047_v36  ;;  %v682_v43 = vpack.c.bf16 %v650_v41, %v650_v41  ;;  %v6127_v44 = vld [vmem:[#allocation2 + $0xc] sm:$0xff] }
  0xb5   : > { %v1155_v45 = vld [vmem:[#allocation2 + $0x10] sm:$0xf]  ;;  %1049 = vst [vmem:[#allocation2 + $0x18] sm:$0xf] %v1048_v42  ;;  %v1186_v47 = vld [vmem:[#allocation2 + $0x14] sm:$0x1]  ;;  %5762 = vmatmul.msk.bf16.gmra.mxu2 %vm505_vm1, %v6127_v44 }
  0xb6   : > { %v2058_v48 = vrot.slane %v1155_v45, 5  ;;  %v1238_v50 = vshll.u32 %v1155_v45, 16  ;;  %v740_v52 = vshrl.u32 %v682_v43, 16  ;;  %v1242_v54 = vshrl.u32 %v1155_v45, 16 }
  0xb7   : > { %v577_v55 = vpop.f32.mrf.mxu0  ;;  %v2061_v58 = vrot.slane %v1186_v47, 5  ;;  %v743_v61 = vshll.u32 %v682_v43, 16  ;;  %v1248_v5 = vshll.u32 %v1186_v47, 16 }
  0xb8   : > { %v2059_v56 = vsel %vm6532_vm8, %v5778_v46, %v2058_v48  ;;  %v2060_v57 = vrot.slane %v2058_v48, 4  ;;  %v1240_v59 = vrot.slane %v1238_v50, 5  ;;  %v742_v60 = vrot.slane %v740_v52, 7 }
  0xb9   : > { %v578_v62 = vadd.f32 %v6539_v34, %v577_v55  ;;  %v1244_v63 = vrot.slane %v1242_v54, 4  ;;  %v2165_v2 = vunpack.c.l.b16 %v2059_v56  ;;  %v1250_v20 = vrot.slane %v1248_v5, 5 }
  0xba   : > { %v2062_v1 = vsel %vm6532_vm8, %v2060_v57, %v2061_v58  ;;  %v745_v6 = vor.u32 %v743_v61, %v742_v60  ;;  %v747_v7 = vrot.slane %v742_v60, 4  ;;  %5674 = vmatmul.msk.bf16.gmra.mxu0 %vm505_vm1, %v6120_v53  ;;  %v1241_v10 = vsel %vm6543_vm9, %v1236_v4, %v1240_v59 }
  0xbb   : > { %v651_v9 = vmax.f32 %v578_v62, 0.0  ;;  %v2166_v8 = vunpack.c.l.b16 %v2062_v1  ;;  %v1245_v11 = vor.u32 %v1244_v63, %v1240_v59  ;;  %v1592_v27 = vunpack.c.l.b16 %v1241_v10  ;;  %v1058_v63 = vld [vmem:[#allocation2 + $0x2c] sm:$0x1] }
  0xbc   : > { %v746_v13 = vsel %vm6602_vm14, %v738_v51, %v745_v6  ;;  %v1052_v14 = vsel %vm6608_vm15, %v747_v7, %v1051_v0  ;;  %v1156_v18 = vld [vmem:[#allocation2 + $0x18] sm:$0xf] }
  0xbd   : > { %v683_v15 = vpack.c.bf16 %v651_v9, %v651_v9  ;;  %v2196_v17 = vpack.c.b16 %v2166_v8, %v2165_v2  ;;  %1050 = vst.msk [vmem:[#allocation2 + $0x1c] sm:$0xf] %vm332_vm2, %v746_v13  ;;  %v1246_v19 = vrot.slane %v1245_v11, 4  ;;  %v1253_v22 = vshrl.u32 %v1156_v18, 16  ;;  %v2000_v40 = vld [vmem:[#allocation2 + $0x18] sm:$0xe] }
  0xbe   : > { %1053 = vst [vmem:[#allocation2 + $0x20] sm:$0x1] %v1052_v14  ;;  %v1256_v23 = vshll.u32 %v1156_v18, 16  ;;  %v5779_v47 = vrot.slane %v2000_v40, 9  ;;  %v6121_v51 = vld [vmem:[%s6419_s27 + $0x58] sm:$0xff] }
  0xbf   : > { %v749_v21 = vshrl.u32 %v683_v15, 16  ;;  %5795 = vmatmul.msk.bf16.gmra.mxu3 %vm505_vm1, %v2196_v17  ;;  %v752_v24 = vshll.u32 %v683_v15, 16  ;;  %v579_v25 = vpop.f32.mrf.mxu0  ;;  %v1251_v26 = vsel %vm6543_vm9, %v1246_v19, %v1250_v20  ;;  %v1255_v31 = vrot.slane %v1253_v22, 4 }
  0xc0   : > { %v580_v29 = vadd.f32 %v6539_v34, %v579_v25  ;;  %v1593_v30 = vunpack.c.l.b16 %v1251_v26  ;;  %v1258_v36 = vrot.slane %v1256_v23, 5 }
  0xc1   : > { %v751_v28 = vrot.slane %v749_v21, 7 }
  0xc2   : > { %v652_v38 = vmax.f32 %v580_v29, 0.0  ;;  %v1623_v39 = vpack.c.b16 %v1593_v30, %v1592_v27  ;;  %v1259_v41 = vor.u32 %v1258_v36, %v1255_v31  ;;  %v1061_v31 = vld [vmem:[#allocation2 + $0x30] sm:$0xf] }
  0xc3   : > { %v754_v37 = vor.u32 %v752_v24, %v751_v28  ;;  %v755_v49 = vrot.slane %v751_v28, 4 }
  0xc4   : > { %v684_v43 = vpack.c.bf16 %v652_v38, %v652_v38  ;;  %5682 = vmatmul.msk.bf16.gmra.mxu1 %vm505_vm1, %v1623_v39  ;;  %v6128_v44 = vld [vmem:[#allocation2 + $0x18] sm:$0xff]  ;;  %v1260_v52 = vrot.slane %v1259_v41, 4 }
  0xc5   : > { %v1055_v42 = vsel %vm6594_vm11, %v754_v37, %v1054_v33  ;;  %v1157_v45 = vld [vmem:[#allocation2 + $0x1c] sm:$0xf]  ;;  %v1187_v46 = vld [vmem:[#allocation2 + $0x20] sm:$0x1]  ;;  %5763 = vmatmul.msk.bf16.gmra.mxu2 %vm505_vm1, %v6128_v44 }
  0xc6   : > { %1056 = vst [vmem:[#allocation2 + $0x24] sm:$0xf] %v1055_v42  ;;  %v2065_v48 = vrot.slane %v1157_v45, 5  ;;  %v757_v50 = vshrl.u32 %v684_v43, 16  ;;  %v1262_v53 = vshll.u32 %v1157_v45, 16  ;;  %v2068_v57 = vrot.slane %v1187_v46, 5 }
  0xc7   : > { %v582_v54 = vpop.f32.mrf.mxu0  ;;  %v1266_v58 = vshrl.u32 %v1157_v45, 16  ;;  %v760_v60 = vshll.u32 %v684_v43, 16  ;;  %v1272_v4 = vshll.u32 %v1187_v46, 16 }
  0xc8   : > { %v2066_v55 = vsel %vm6532_vm8, %v5779_v47, %v2065_v48  ;;  %v2067_v56 = vrot.slane %v2065_v48, 4  ;;  %v759_v59 = vrot.slane %v757_v50, 7  ;;  %v583_v61 = vadd.f32 %v6539_v34, %v582_v54  ;;  %v6122_v50 = vld [vmem:[%s6419_s27 + $0x60] sm:$0xff] }
  0xc9   : > { %v1264_v62 = vrot.slane %v1262_v53, 5  ;;  %v2167_v1 = vunpack.c.l.b16 %v2066_v55  ;;  %v1268_v2 = vrot.slane %v1266_v58, 4  ;;  %v1274_v19 = vrot.slane %v1272_v4, 5 }
  0xca   : > { %v2069_v0 = vsel %vm6532_vm8, %v2067_v56, %v2068_v57  ;;  %v762_v5 = vor.u32 %v760_v60, %v759_v59  ;;  %v764_v6 = vrot.slane %v759_v59, 4  ;;  %v653_v7 = vmax.f32 %v583_v61, 0.0  ;;  %5675 = vmatmul.msk.bf16.gmra.mxu0 %vm505_vm1, %v6121_v51 }
  0xcb   : > { %v2168_v9 = vunpack.c.l.b16 %v2069_v0  ;;  %v1265_v8 = vsel %vm6543_vm9, %v1260_v52, %v1264_v62  ;;  %v1269_v10 = vor.u32 %v1268_v2, %v1264_v62  ;;  %v1065_v62 = vld [vmem:[#allocation2 + $0x38] sm:$0x1] }
  0xcc   : > { %v763_v11 = vsel %vm6602_vm14, %v755_v49, %v762_v5  ;;  %v1059_v13 = vsel %vm6608_vm15, %v764_v6, %v1058_v63  ;;  %v685_v14 = vpack.c.bf16 %v653_v7, %v653_v7  ;;  %v1594_v26 = vunpack.c.l.b16 %v1265_v8 }
  0xcd   : > { %v2197_v15 = vpack.c.b16 %v2168_v9, %v2167_v1  ;;  %v1158_v17 = vld [vmem:[#allocation2 + $0x24] sm:$0xf]  ;;  %1057 = vst.msk [vmem:[#allocation2 + $0x28] sm:$0xf] %vm332_vm2, %v763_v11  ;;  %v1270_v18 = vrot.slane %v1269_v10, 4 }
  0xce   : > { %1060 = vst [vmem:[#allocation2 + $0x2c] sm:$0x1] %v1059_v13  ;;  %v766_v20 = vshrl.u32 %v685_v14, 16  ;;  %v1277_v21 = vshrl.u32 %v1158_v17, 16  ;;  %v1280_v22 = vshll.u32 %v1158_v17, 16  ;;  %v769_v23 = vshll.u32 %v685_v14, 16 }
  0xcf   : > { %5796 = vmatmul.msk.bf16.gmra.mxu3 %vm505_vm1, %v2197_v15  ;;  %v584_v24 = vpop.f32.mrf.mxu0  ;;  %v1275_v25 = vsel %vm6543_vm9, %v1270_v18, %v1274_v19  ;;  %v2001_v39 = vld [vmem:[#allocation2 + $0x24] sm:$0xe] }
  0xd0   : > { %v768_v27 = vrot.slane %v766_v20, 7  ;;  %v585_v28 = vadd.f32 %v6539_v34, %v584_v24  ;;  %v1595_v29 = vunpack.c.l.b16 %v1275_v25  ;;  %v1279_v30 = vrot.slane %v1277_v21, 4 }
  0xd1   : > { %v1282_v33 = vrot.slane %v1280_v22, 5  ;;  %v5780_v46 = vrot.slane %v2001_v39, 9 }
  0xd2   : > { %v771_v36 = vor.u32 %v769_v23, %v768_v27  ;;  %v654_v37 = vmax.f32 %v585_v28, 0.0  ;;  %v1624_v38 = vpack.c.b16 %v1595_v29, %v1594_v26  ;;  %v772_v48 = vrot.slane %v768_v27, 4 }
  0xd3   : > { %v1283_v40 = vor.u32 %v1282_v33, %v1279_v30  ;;  %v1068_v30 = vld [vmem:[#allocation2 + $0x3c] sm:$0xf] }
  0xd4   : > { %v1062_v41 = vsel %vm6594_vm11, %v771_v36, %v1061_v31  ;;  %v686_v42 = vpack.c.bf16 %v654_v37, %v654_v37  ;;  %5683 = vmatmul.msk.bf16.gmra.mxu1 %vm505_vm1, %v1624_v38  ;;  %v6129_v43 = vld [vmem:[#allocation2 + $0x24] sm:$0xff] }
  0xd5   : > { %v1159_v44 = vld [vmem:[#allocation2 + $0x28] sm:$0xf]  ;;  %1063 = vst [vmem:[#allocation2 + $0x30] sm:$0xf] %v1062_v41  ;;  %v1188_v45 = vld [vmem:[#allocation2 + $0x2c] sm:$0x1]  ;;  %5764 = vmatmul.msk.bf16.gmra.mxu2 %vm505_vm1, %v6129_v43 }
  0xd6   : > { %v2072_v47 = vrot.slane %v1159_v44, 5  ;;  %v774_v49 = vshrl.u32 %v686_v42, 16  ;;  %v1284_v51 = vrot.slane %v1283_v40, 4  ;;  %v1286_v52 = vshll.u32 %v1159_v44, 16 }
  0xd7   : > { %v587_v53 = vpop.f32.mrf.mxu0  ;;  %v2075_v56 = vrot.slane %v1188_v45, 5  ;;  %v1290_v57 = vshrl.u32 %v1159_v44, 16  ;;  %v777_v59 = vshll.u32 %v686_v42, 16  ;;  %v1296_v2 = vshll.u32 %v1188_v45, 16 }
  0xd8   : > { %v2073_v54 = vsel %vm6532_vm8, %v5780_v46, %v2072_v47  ;;  %v2074_v55 = vrot.slane %v2072_v47, 4  ;;  %v776_v58 = vrot.slane %v774_v49, 7  ;;  %v588_v60 = vadd.f32 %v6539_v34, %v587_v53  ;;  %v6123_v49 = vld [vmem:[%s6419_s27 + $0x68] sm:$0xff] }
  0xd9   : > { %v1288_v61 = vrot.slane %v1286_v52, 5  ;;  %v2169_v0 = vunpack.c.l.b16 %v2073_v54  ;;  %v1292_v1 = vrot.slane %v1290_v57, 4  ;;  %v1298_v18 = vrot.slane %v1296_v2, 5 }
  0xda   : > { %v2076_v63 = vsel %vm6532_vm8, %v2074_v55, %v2075_v56  ;;  %v779_v4 = vor.u32 %v777_v59, %v776_v58  ;;  %v781_v5 = vrot.slane %v776_v58, 4  ;;  %v655_v6 = vmax.f32 %v588_v60, 0.0  ;;  %5676 = vmatmul.msk.bf16.gmra.mxu0 %vm505_vm1, %v6122_v50 }
  0xdb   : > { %v2170_v7 = vunpack.c.l.b16 %v2076_v63  ;;  %v1289_v9 = vsel %vm6543_vm9, %v1284_v51, %v1288_v61  ;;  %v1293_v8 = vor.u32 %v1292_v1, %v1288_v61  ;;  %v1072_v61 = vld [vmem:[#allocation2 + $0x44] sm:$0x1] }
  0xdc   : > { %v780_v10 = vsel %vm6602_vm14, %v772_v48, %v779_v4  ;;  %v1066_v11 = vsel %vm6608_vm15, %v781_v5, %v1065_v62  ;;  %v687_v13 = vpack.c.bf16 %v655_v6, %v655_v6  ;;  %v1160_v15 = vld [vmem:[#allocation2 + $0x30] sm:$0xf]  ;;  %v1596_v25 = vunpack.c.l.b16 %v1289_v9 }
  0xdd   : > { %v2198_v14 = vpack.c.b16 %v2170_v7, %v2169_v0  ;;  %1064 = vst.msk [vmem:[#allocation2 + $0x34] sm:$0xf] %vm332_vm2, %v780_v10  ;;  %v1294_v17 = vrot.slane %v1293_v8, 4  ;;  %v1301_v20 = vshrl.u32 %v1160_v15, 16  ;;  %v1304_v21 = vshll.u32 %v1160_v15, 16 }
  0xde   : > { %1067 = vst [vmem:[#allocation2 + $0x38] sm:$0x1] %v1066_v11  ;;  %v783_v19 = vshrl.u32 %v687_v13, 16  ;;  %v786_v22 = vshll.u32 %v687_v13, 16  ;;  %v2002_v38 = vld [vmem:[#allocation2 + $0x30] sm:$0xe] }
  0xdf   : > { %5797 = vmatmul.msk.bf16.gmra.mxu3 %vm505_vm1, %v2198_v14  ;;  %v589_v23 = vpop.f32.mrf.mxu0  ;;  %v1299_v24 = vsel %vm6543_vm9, %v1294_v17, %v1298_v18  ;;  %v1303_v29 = vrot.slane %v1301_v20, 4  ;;  %v1306_v31 = vrot.slane %v1304_v21, 5  ;;  %v5781_v45 = vrot.slane %v2002_v38, 9 }
  0xe0   : > { %v785_v26 = vrot.slane %v783_v19, 7  ;;  %v590_v27 = vadd.f32 %v6539_v34, %v589_v23  ;;  %v1597_v28 = vunpack.c.l.b16 %v1299_v24 }
  0xe1   : > { %v1307_v39 = vor.u32 %v1306_v31, %v1303_v29  ;;  %v1075_v29 = vld [vmem:[#allocation2 + $0x48] sm:$0xf] }
  0xe2   : > { %v788_v33 = vor.u32 %v786_v22, %v785_v26  ;;  %v656_v36 = vmax.f32 %v590_v27, 0.0  ;;  %v1625_v37 = vpack.c.b16 %v1597_v28, %v1596_v25  ;;  %v789_v47 = vrot.slane %v785_v26, 4 }
  0xe3   : > { %v1308_v50 = vrot.slane %v1307_v39, 4 }
  0xe4   : > { %v1069_v40 = vsel %vm6594_vm11, %v788_v33, %v1068_v30  ;;  %v688_v41 = vpack.c.bf16 %v656_v36, %v656_v36  ;;  %5684 = vmatmul.msk.bf16.gmra.mxu1 %vm505_vm1, %v1625_v37  ;;  %v6130_v42 = vld [vmem:[#allocation2 + $0x30] sm:$0xff] }
  0xe5   : > { %v1161_v43 = vld [vmem:[#allocation2 + $0x34] sm:$0xf]  ;;  %1070 = vst [vmem:[#allocation2 + $0x3c] sm:$0xf] %v1069_v40  ;;  %v1189_v44 = vld [vmem:[#allocation2 + $0x38] sm:$0x1]  ;;  %5765 = vmatmul.msk.bf16.gmra.mxu2 %vm505_vm1, %v6130_v42 }
  0xe6   : > { %v2079_v46 = vrot.slane %v1161_v43, 5  ;;  %v791_v48 = vshrl.u32 %v688_v41, 16  ;;  %v1310_v51 = vshll.u32 %v1161_v43, 16  ;;  %v2082_v55 = vrot.slane %v1189_v44, 5 }
  0xe7   : > { %v592_v52 = vpop.f32.mrf.mxu0  ;;  %v1314_v56 = vshrl.u32 %v1161_v43, 16  ;;  %v794_v58 = vshll.u32 %v688_v41, 16  ;;  %v1320_v1 = vshll.u32 %v1189_v44, 16 }
  0xe8   : > { %v2080_v53 = vsel %vm6532_vm8, %v5781_v45, %v2079_v46  ;;  %v2081_v54 = vrot.slane %v2079_v46, 4  ;;  %v793_v57 = vrot.slane %v791_v48, 7  ;;  %v593_v59 = vadd.f32 %v6539_v34, %v592_v52  ;;  %v6124_v48 = vld [vmem:[%s6419_s27 + $0x70] sm:$0xff] }
  0xe9   : > { %v1312_v60 = vrot.slane %v1310_v51, 5  ;;  %v2171_v63 = vunpack.c.l.b16 %v2080_v53  ;;  %v1316_v0 = vrot.slane %v1314_v56, 4  ;;  %v1322_v17 = vrot.slane %v1320_v1, 5 }
  0xea   : > { %v2083_v62 = vsel %vm6532_vm8, %v2081_v54, %v2082_v55  ;;  %v796_v2 = vor.u32 %v794_v58, %v793_v57  ;;  %v798_v4 = vrot.slane %v793_v57, 4  ;;  %v657_v5 = vmax.f32 %v593_v59, 0.0  ;;  %5677 = vmatmul.msk.bf16.gmra.mxu0 %vm505_vm1, %v6123_v49 }
  0xeb   : > { %v2172_v6 = vunpack.c.l.b16 %v2083_v62  ;;  %v1313_v7 = vsel %vm6543_vm9, %v1308_v50, %v1312_v60  ;;  %v1317_v9 = vor.u32 %v1316_v0, %v1312_v60  ;;  %v1079_v60 = vld [vmem:[#allocation2 + $0x50] sm:$0x1] }
  0xec   : > { %v797_v8 = vsel %vm6602_vm14, %v789_v47, %v796_v2  ;;  %v1073_v10 = vsel %vm6608_vm15, %v798_v4, %v1072_v61  ;;  %v689_v11 = vpack.c.bf16 %v657_v5, %v657_v5  ;;  %v1162_v14 = vld [vmem:[#allocation2 + $0x3c] sm:$0xf]  ;;  %v1598_v24 = vunpack.c.l.b16 %v1313_v7 }
  0xed   : > { %v2199_v13 = vpack.c.b16 %v2172_v6, %v2171_v63  ;;  %1071 = vst.msk [vmem:[#allocation2 + $0x40] sm:$0xf] %vm332_vm2, %v797_v8  ;;  %v1318_v15 = vrot.slane %v1317_v9, 4  ;;  %v1325_v19 = vshrl.u32 %v1162_v14, 16  ;;  %v1328_v20 = vshll.u32 %v1162_v14, 16 }
  0xee   : > { %1074 = vst [vmem:[#allocation2 + $0x44] sm:$0x1] %v1073_v10  ;;  %v800_v18 = vshrl.u32 %v689_v11, 16  ;;  %v803_v21 = vshll.u32 %v689_v11, 16  ;;  %v2003_v37 = vld [vmem:[#allocation2 + $0x3c] sm:$0xe] }
  0xef   : > { %5798 = vmatmul.msk.bf16.gmra.mxu3 %vm505_vm1, %v2199_v13  ;;  %v594_v22 = vpop.f32.mrf.mxu0  ;;  %v1323_v23 = vsel %vm6543_vm9, %v1318_v15, %v1322_v17  ;;  %v1327_v28 = vrot.slane %v1325_v19, 4  ;;  %v1330_v30 = vrot.slane %v1328_v20, 5  ;;  %v5782_v44 = vrot.slane %v2003_v37, 9 }
  0xf0   : > { %v802_v25 = vrot.slane %v800_v18, 7  ;;  %v595_v26 = vadd.f32 %v6539_v34, %v594_v22  ;;  %v1599_v27 = vunpack.c.l.b16 %v1323_v23 }
  0xf1   : > { %v1331_v38 = vor.u32 %v1330_v30, %v1327_v28  ;;  %v1082_v28 = vld [vmem:[#allocation2 + $0x54] sm:$0xf] }
  0xf2   : > { %v805_v31 = vor.u32 %v803_v21, %v802_v25  ;;  %v658_v33 = vmax.f32 %v595_v26, 0.0  ;;  %v1626_v36 = vpack.c.b16 %v1599_v27, %v1598_v24  ;;  %v806_v46 = vrot.slane %v802_v25, 4 }
  0xf3   : > { %v1332_v49 = vrot.slane %v1331_v38, 4 }
  0xf4   : > { %v1076_v39 = vsel %vm6594_vm11, %v805_v31, %v1075_v29  ;;  %v690_v40 = vpack.c.bf16 %v658_v33, %v658_v33  ;;  %5685 = vmatmul.msk.bf16.gmra.mxu1 %vm505_vm1, %v1626_v36  ;;  %v6131_v41 = vld [vmem:[#allocation2 + $0x3c] sm:$0xff] }
  0xf5   : > { %v1163_v42 = vld [vmem:[#allocation2 + $0x40] sm:$0xf]  ;;  %1077 = vst [vmem:[#allocation2 + $0x48] sm:$0xf] %v1076_v39  ;;  %v1190_v43 = vld [vmem:[#allocation2 + $0x44] sm:$0x1]  ;;  %5766 = vmatmul.msk.bf16.gmra.mxu2 %vm505_vm1, %v6131_v41 }
  0xf6   : > { %v2086_v45 = vrot.slane %v1163_v42, 5  ;;  %v808_v47 = vshrl.u32 %v690_v40, 16  ;;  %v1334_v50 = vshll.u32 %v1163_v42, 16  ;;  %v2089_v54 = vrot.slane %v1190_v43, 5 }
  0xf7   : > { %v597_v51 = vpop.f32.mrf.mxu0  ;;  %v1338_v55 = vshrl.u32 %v1163_v42, 16  ;;  %v811_v57 = vshll.u32 %v690_v40, 16  ;;  %v1344_v0 = vshll.u32 %v1190_v43, 16 }
  0xf8   : > { %v2087_v52 = vsel %vm6532_vm8, %v5782_v44, %v2086_v45  ;;  %v2088_v53 = vrot.slane %v2086_v45, 4  ;;  %v810_v56 = vrot.slane %v808_v47, 7  ;;  %v598_v58 = vadd.f32 %v6539_v34, %v597_v51  ;;  %v6125_v47 = vld [vmem:[%s6419_s27 + $0x78] sm:$0xff] }
  0xf9   : > { %v1336_v59 = vrot.slane %v1334_v50, 5  ;;  %v2173_v62 = vunpack.c.l.b16 %v2087_v52  ;;  %v1340_v63 = vrot.slane %v1338_v55, 4  ;;  %v1346_v15 = vrot.slane %v1344_v0, 5 }
  0xfa   : > { %v2090_v61 = vsel %vm6532_vm8, %v2088_v53, %v2089_v54  ;;  %v813_v1 = vor.u32 %v811_v57, %v810_v56  ;;  %v815_v2 = vrot.slane %v810_v56, 4  ;;  %v659_v4 = vmax.f32 %v598_v58, 0.0  ;;  %5678 = vmatmul.msk.bf16.gmra.mxu0 %vm505_vm1, %v6124_v48 }
  0xfb   : > { %v2174_v5 = vunpack.c.l.b16 %v2090_v61  ;;  %v1337_v6 = vsel %vm6543_vm9, %v1332_v49, %v1336_v59  ;;  %v1341_v7 = vor.u32 %v1340_v63, %v1336_v59  ;;  %v1086_v59 = vld [vmem:[#allocation2 + $0x5c] sm:$0x1] }
  0xfc   : > { %v814_v9 = vsel %vm6602_vm14, %v806_v46, %v813_v1  ;;  %v1080_v8 = vsel %vm6608_vm15, %v815_v2, %v1079_v60  ;;  %v691_v10 = vpack.c.bf16 %v659_v4, %v659_v4  ;;  %v1164_v13 = vld [vmem:[#allocation2 + $0x48] sm:$0xf]  ;;  %v1600_v23 = vunpack.c.l.b16 %v1337_v6 }
  0xfd   : > { %v2200_v11 = vpack.c.b16 %v2174_v5, %v2173_v62  ;;  %1078 = vst.msk [vmem:[#allocation2 + $0x4c] sm:$0xf] %vm332_vm2, %v814_v9  ;;  %v1342_v14 = vrot.slane %v1341_v7, 4  ;;  %v1349_v18 = vshrl.u32 %v1164_v13, 16  ;;  %v1352_v19 = vshll.u32 %v1164_v13, 16 }
  0xfe   : > { %1081 = vst [vmem:[#allocation2 + $0x50] sm:$0x1] %v1080_v8  ;;  %v817_v17 = vshrl.u32 %v691_v10, 16  ;;  %v820_v20 = vshll.u32 %v691_v10, 16  ;;  %v2004_v36 = vld [vmem:[#allocation2 + $0x48] sm:$0xe] }
  0xff   : > { %5799 = vmatmul.msk.bf16.gmra.mxu3 %vm505_vm1, %v2200_v11  ;;  %v599_v21 = vpop.f32.mrf.mxu0  ;;  %v1347_v22 = vsel %vm6543_vm9, %v1342_v14, %v1346_v15  ;;  %v1351_v27 = vrot.slane %v1349_v18, 4  ;;  %v1354_v29 = vrot.slane %v1352_v19, 5  ;;  %v5783_v43 = vrot.slane %v2004_v36, 9 }
 0x100   : > { %v819_v24 = vrot.slane %v817_v17, 7  ;;  %v600_v25 = vadd.f32 %v6539_v34, %v599_v21  ;;  %v1601_v26 = vunpack.c.l.b16 %v1347_v22 }
 0x101   : > { %v1355_v37 = vor.u32 %v1354_v29, %v1351_v27  ;;  %v1089_v27 = vld [vmem:[#allocation2 + $0x60] sm:$0xf] }
 0x102   : > { %v822_v30 = vor.u32 %v820_v20, %v819_v24  ;;  %v660_v31 = vmax.f32 %v600_v25, 0.0  ;;  %v1627_v33 = vpack.c.b16 %v1601_v26, %v1600_v23  ;;  %v823_v45 = vrot.slane %v819_v24, 4 }
 0x103   : > { %v1356_v48 = vrot.slane %v1355_v37, 4 }
 0x104   : > { %v1083_v38 = vsel %vm6594_vm11, %v822_v30, %v1082_v28  ;;  %v692_v39 = vpack.c.bf16 %v660_v31, %v660_v31  ;;  %5686 = vmatmul.msk.bf16.gmra.mxu1 %vm505_vm1, %v1627_v33  ;;  %v6132_v40 = vld [vmem:[#allocation2 + $0x48] sm:$0xff] }
 0x105   : > { %v1165_v41 = vld [vmem:[#allocation2 + $0x4c] sm:$0xf]  ;;  %1084 = vst [vmem:[#allocation2 + $0x54] sm:$0xf] %v1083_v38  ;;  %v1191_v42 = vld [vmem:[#allocation2 + $0x50] sm:$0x1]  ;;  %5767 = vmatmul.msk.bf16.gmra.mxu2 %vm505_vm1, %v6132_v40 }
 0x106   : > { %v2093_v44 = vrot.slane %v1165_v41, 5  ;;  %v825_v46 = vshrl.u32 %v692_v39, 16  ;;  %v1358_v49 = vshll.u32 %v1165_v41, 16  ;;  %v2096_v53 = vrot.slane %v1191_v42, 5 }
 0x107   : > { %v602_v50 = vpop.f32.mrf.mxu0  ;;  %v1362_v54 = vshrl.u32 %v1165_v41, 16  ;;  %v828_v56 = vshll.u32 %v692_v39, 16  ;;  %v1368_v63 = vshll.u32 %v1191_v42, 16 }
 0x108   : > { %v2094_v51 = vsel %vm6532_vm8, %v5783_v43, %v2093_v44  ;;  %v2095_v52 = vrot.slane %v2093_v44, 4  ;;  %v827_v55 = vrot.slane %v825_v46, 7  ;;  %v603_v57 = vadd.f32 %v6539_v34, %v602_v50 }
 0x109   : > { %v1360_v58 = vrot.slane %v1358_v49, 5  ;;  %v2175_v61 = vunpack.c.l.b16 %v2094_v51  ;;  %v1364_v62 = vrot.slane %v1362_v54, 4  ;;  %v1370_v14 = vrot.slane %v1368_v63, 5 }
 0x10a   : > { %v2097_v60 = vsel %vm6532_vm8, %v2095_v52, %v2096_v53  ;;  %v830_v0 = vor.u32 %v828_v56, %v827_v55  ;;  %v832_v1 = vrot.slane %v827_v55, 4  ;;  %v661_v2 = vmax.f32 %v603_v57, 0.0  ;;  %5679 = vmatmul.msk.bf16.gmra.mxu0 %vm505_vm1, %v6125_v47  ;;  %v6142_v56 = vld [vmem:[#allocation2 + $0xc] sm:$0xff] }
 0x10b   : > { %v2176_v4 = vunpack.c.l.b16 %v2097_v60  ;;  %v1361_v5 = vsel %vm6543_vm9, %v1356_v48, %v1360_v58  ;;  %v1365_v6 = vor.u32 %v1364_v62, %v1360_v58  ;;  %v1093_v58 = vld [vmem:[#allocation2 + $0x68] sm:$0x1] }
 0x10c   : > { %v831_v7 = vsel %vm6602_vm14, %v823_v45, %v830_v0  ;;  %v1087_v9 = vsel %vm6608_vm15, %v832_v1, %v1086_v59  ;;  %v693_v8 = vpack.c.bf16 %v661_v2, %v661_v2  ;;  %v1166_v11 = vld [vmem:[#allocation2 + $0x54] sm:$0xf]  ;;  %v1602_v22 = vunpack.c.l.b16 %v1361_v5 }
 0x10d   : > { %v2201_v10 = vpack.c.b16 %v2176_v4, %v2175_v61  ;;  %1085 = vst.msk [vmem:[#allocation2 + $0x58] sm:$0xf] %vm332_vm2, %v831_v7  ;;  %v1366_v13 = vrot.slane %v1365_v6, 4  ;;  %v1373_v17 = vshrl.u32 %v1166_v11, 16  ;;  %v1376_v18 = vshll.u32 %v1166_v11, 16 }
 0x10e   : > { %1088 = vst [vmem:[#allocation2 + $0x5c] sm:$0x1] %v1087_v9  ;;  %v834_v15 = vshrl.u32 %v693_v8, 16  ;;  %v837_v19 = vshll.u32 %v693_v8, 16  ;;  %v2005_v33 = vld [vmem:[#allocation2 + $0x54] sm:$0xe] }
 0x10f   : > { %5800 = vmatmul.msk.bf16.gmra.mxu3 %vm505_vm1, %v2201_v10  ;;  %v604_v20 = vpop.f32.mrf.mxu0  ;;  %v1371_v21 = vsel %vm6543_vm9, %v1366_v13, %v1370_v14  ;;  %v1375_v26 = vrot.slane %v1373_v17, 4  ;;  %v1378_v28 = vrot.slane %v1376_v18, 5  ;;  %v5784_v42 = vrot.slane %v2005_v33, 9  ;;  %v1698_v14 = vpop.f32.mrf.mxu1 }
 0x110   : > { %v836_v23 = vrot.slane %v834_v15, 7  ;;  %v605_v24 = vadd.f32 %v6539_v34, %v604_v20  ;;  %v1603_v25 = vunpack.c.l.b16 %v1371_v21  ;;  %v1918_v15 = vpop.f32.mrf.mxu2 }
 0x111   : > { %v1379_v36 = vor.u32 %v1378_v28, %v1375_v26 }
 0x112   : > { %v839_v29 = vor.u32 %v837_v19, %v836_v23  ;;  %v662_v30 = vmax.f32 %v605_v24, 0.0  ;;  %v1628_v31 = vpack.c.b16 %v1603_v25, %v1602_v22  ;;  %v840_v44 = vrot.slane %v836_v23, 4  ;;  %v6773_v25 = vld [vmem:[%s8362_s2] ss:$0 sm:$0xff] }
 0x113   : > { %v1380_v46 = vrot.slane %v1379_v36, 4  ;;  %v1919_v23 = vadd.f32 %v1918_v15, %v1698_v14 }
 0x114   : > { %v1090_v37 = vsel %vm6594_vm11, %v839_v29, %v1089_v27  ;;  %v694_v38 = vpack.c.bf16 %v662_v30, %v662_v30  ;;  %5687 = vmatmul.msk.bf16.gmra.mxu1 %vm505_vm1, %v1628_v31  ;;  %v6133_v39 = vld [vmem:[#allocation2 + $0x54] sm:$0xff]  ;;  %v1096_v29 = vld [vmem:[#allocation2 + $0x6c] sm:$0xf] }
 0x115   : > { %v1167_v40 = vld [vmem:[#allocation2 + $0x58] sm:$0xf]  ;;  %1091 = vst [vmem:[#allocation2 + $0x60] sm:$0xf] %v1090_v37  ;;  %v1192_v41 = vld [vmem:[#allocation2 + $0x5c] sm:$0x1]  ;;  %5768 = vmatmul.msk.bf16.gmra.mxu2 %vm505_vm1, %v6133_v39  ;;  %v2271_v37 = vpop.f32.mrf.mxu3 }
 0x116   : > { %v2100_v43 = vrot.slane %v1167_v40, 5  ;;  %v842_v45 = vshrl.u32 %v694_v38, 16  ;;  %v1382_v47 = vshll.u32 %v1167_v40, 16  ;;  %v2103_v51 = vrot.slane %v1192_v41, 5 }
 0x117   : > { %v607_v48 = vpop.f32.mrf.mxu0  ;;  %v1386_v52 = vshrl.u32 %v1167_v40, 16  ;;  %v845_v54 = vshll.u32 %v694_v38, 16  ;;  %v1392_v62 = vshll.u32 %v1192_v41, 16  ;;  %v6776_v39 = vadd.f32 %v2271_v37, %v1919_v23 }
 0x118   : > { %v2101_v49 = vsel %vm6532_vm8, %v5784_v42, %v2100_v43  ;;  %v2102_v50 = vrot.slane %v2100_v43, 4  ;;  %v844_v53 = vrot.slane %v842_v45, 7  ;;  %v608_v55 = vadd.f32 %v6539_v34, %v607_v48  ;;  %v6807_v37 = vpop.f32.mrf.mxu2 }
 0x119   : > { %v1384_v57 = vrot.slane %v1382_v47, 5  ;;  %v2177_v60 = vunpack.c.l.b16 %v2101_v49  ;;  %v1388_v61 = vrot.slane %v1386_v52, 4  ;;  %v1394_v11 = vrot.slane %v1392_v62, 5  ;;  %v1100_v62 = vld [vmem:[#allocation2 + $0x74] sm:$0x1] }
 0x11a   : > { %v2104_v59 = vsel %vm6532_vm8, %v2102_v50, %v2103_v51  ;;  %v847_v63 = vor.u32 %v845_v54, %v844_v53  ;;  %v849_v0 = vrot.slane %v844_v53, 4  ;;  %v663_v1 = vmax.f32 %v608_v55, 0.0  ;;  %5875 = vmatmul.msk.bf16.vlgmr.msrb.gmra.mxu0 %vm505_vm1, %v6142_v56 }
 0x11b   : > { %v2178_v2 = vunpack.c.l.b16 %v2104_v59  ;;  %v1385_v4 = vsel %vm6543_vm9, %v1380_v46, %v1384_v57  ;;  %v1389_v5 = vor.u32 %v1388_v61, %v1384_v57 }
 0x11c   : > { %v848_v34 = vsel %vm6602_vm14, %v840_v44, %v847_v63  ;;  %v1094_v6 = vsel %vm6608_vm15, %v849_v0, %v1093_v58  ;;  %v695_v7 = vpack.c.bf16 %v663_v1, %v663_v1  ;;  %v1168_v8 = vld [vmem:[#allocation2 + $0x60] sm:$0xf]  ;;  %v1604_v22 = vunpack.c.l.b16 %v1385_v4 }
 0x11d   : > { %v2202_v9 = vpack.c.b16 %v2178_v2, %v2177_v60  ;;  %1092 = vst.msk [vmem:[#allocation2 + $0x64] sm:$0xf] %vm332_vm2, %v848_v34  ;;  %v1390_v10 = vrot.slane %v1389_v5, 4  ;;  %v1397_v17 = vshrl.u32 %v1168_v8, 16  ;;  %v1400_v18 = vshll.u32 %v1168_v8, 16  ;;  %v6143_v60 = vld [vmem:[#allocation2 + $0x18] sm:$0xff] }
 0x11e   : > { %1095 = vst [vmem:[#allocation2 + $0x68] sm:$0x1] %v1094_v6  ;;  %v851_v13 = vshrl.u32 %v695_v7, 16  ;;  %v854_v19 = vshll.u32 %v695_v7, 16  ;;  %v2006_v38 = vld [vmem:[#allocation2 + $0x60] sm:$0xe] }
 0x11f   : > { %5801 = vmatmul.msk.bf16.gmra.mxu3 %vm505_vm1, %v2202_v9  ;;  %v609_v20 = vpop.f32.mrf.mxu0  ;;  %v1395_v21 = vsel %vm6543_vm9, %v1390_v10, %v1394_v11  ;;  %v1399_v28 = vrot.slane %v1397_v17, 4  ;;  %v1402_v30 = vrot.slane %v1400_v18, 5  ;;  %v5785_v46 = vrot.slane %v2006_v38, 9 }
 0x120   : > { %v853_v24 = vrot.slane %v851_v13, 7  ;;  %v610_v26 = vadd.f32 %v6773_v25, %v609_v20  ;;  %v1605_v27 = vunpack.c.l.b16 %v1395_v21  ;;  %v5924_v21 = vld [vmem:[%s8363_s3 + $0xa] sm:$0x3] }
 0x121   : > { %v1403_v40 = vor.u32 %v1402_v30, %v1399_v28 }
 0x122   : > { %v856_v31 = vor.u32 %v854_v19, %v853_v24  ;;  %v664_v33 = vmax.f32 %v610_v26, 0.0  ;;  %v1629_v36 = vpack.c.b16 %v1605_v27, %v1604_v22  ;;  %v857_v48 = vrot.slane %v853_v24, 4  ;;  %v5941_v26 = vld [vmem:[%s8363_s3 + $0xc] sm:$0x3] }
 0x123   : > { %v1404_v50 = vrot.slane %v1403_v40, 4  ;;  %v3598_v24 = vsel %vm554_vm0, %v5924_v21, 0 }
 0x124   : > { %v1097_v41 = vsel %vm6594_vm11, %v856_v31, %v1096_v29  ;;  %v696_v42 = vpack.c.bf16 %v664_v33, %v664_v33  ;;  %5688 = vmatmul.msk.bf16.gmra.mxu1 %vm505_vm1, %v1629_v36  ;;  %v6134_v43 = vld [vmem:[#allocation2 + $0x60] sm:$0xff]  ;;  %3607 = vmatpush.bf16.msrb.mxu2 %v3598_v24  ;;  %v3885_v33 = vsel %vm554_vm0, %v5941_v26, 0  ;;  %v1103_v36 = vld [vmem:[#allocation2 + $0x78] sm:$0xf] }
 0x125   : > { %v1169_v44 = vld [vmem:[#allocation2 + $0x64] sm:$0xf]  ;;  %1098 = vst [vmem:[#allocation2 + $0x6c] sm:$0xf] %v1097_v41  ;;  %v1193_v45 = vld [vmem:[#allocation2 + $0x68] sm:$0x1]  ;;  %5769 = vmatmul.msk.bf16.gmra.mxu2 %vm505_vm1, %v6134_v43  ;;  %3894 = vmatpush.bf16.msrb.mxu3 %v3885_v33 }
 0x126   : > { %v2107_v47 = vrot.slane %v1169_v44, 5  ;;  %v859_v49 = vshrl.u32 %v696_v42, 16  ;;  %v1406_v51 = vshll.u32 %v1169_v44, 16  ;;  %v2110_v55 = vrot.slane %v1193_v45, 5 }
 0x127   : > { %v612_v52 = vpop.f32.mrf.mxu0  ;;  %v1410_v56 = vshrl.u32 %v1169_v44, 16  ;;  %v862_v58 = vshll.u32 %v696_v42, 16  ;;  %v1416_v2 = vshll.u32 %v1193_v45, 16 }
 0x128   : > { %v2108_v53 = vsel %vm6532_vm8, %v5785_v46, %v2107_v47  ;;  %v2109_v54 = vrot.slane %v2107_v47, 4  ;;  %v861_v57 = vrot.slane %v859_v49, 7  ;;  %v613_v59 = vadd.f32 %v6773_v25, %v612_v52 }
 0x129   : > { %v1408_v61 = vrot.slane %v1406_v51, 5  ;;  %v2179_v0 = vunpack.c.l.b16 %v2108_v53  ;;  %v1412_v1 = vrot.slane %v1410_v56, 4  ;;  %v1418_v17 = vrot.slane %v1416_v2, 5 }
 0x12a   : > { %v2111_v63 = vsel %vm6532_vm8, %v2109_v54, %v2110_v55  ;;  %v864_v4 = vor.u32 %v862_v58, %v861_v57  ;;  %v866_v5 = vrot.slane %v861_v57, 4  ;;  %v665_v34 = vmax.f32 %v613_v59, 0.0  ;;  %5876 = vmatmul.msk.bf16.gmra.mxu0 %vm505_vm1, %v6143_v60 }
 0x12b   : > { %v2180_v6 = vunpack.c.l.b16 %v2111_v63  ;;  %v1409_v7 = vsel %vm6543_vm9, %v1404_v50, %v1408_v61  ;;  %v1413_v9 = vor.u32 %v1412_v1, %v1408_v61  ;;  %v6815_v63 = vpop.f32.mrf.mxu1  ;;  %v6144_v1 = vld [vmem:[#allocation2 + $0x24] sm:$0xff] }
 0x12c   : > { %v865_v8 = vsel %vm6602_vm14, %v857_v48, %v864_v4  ;;  %v1101_v10 = vsel %vm6608_vm15, %v866_v5, %v1100_v62  ;;  %v697_v11 = vpack.c.bf16 %v665_v34, %v665_v34  ;;  %v1170_v14 = vld [vmem:[#allocation2 + $0x6c] sm:$0xf]  ;;  %v1606_v20 = vunpack.c.l.b16 %v1409_v7  ;;  %v1107_v4 = vld [vmem:[#allocation2 + $0x80] sm:$0x1]  ;;  %v6818_v5 = vpop.f32.mrf.mxu3 }
 0x12d   : > { %v2203_v13 = vpack.c.b16 %v2180_v6, %v2179_v0  ;;  %1099 = vst.msk [vmem:[#allocation2 + $0x70] sm:$0xf] %vm332_vm2, %v865_v8  ;;  %v1414_v15 = vrot.slane %v1413_v9, 4  ;;  %v1421_v27 = vshrl.u32 %v1170_v14, 16  ;;  %v1424_v28 = vshll.u32 %v1170_v14, 16 }
 0x12e   : > { %1102 = vst [vmem:[#allocation2 + $0x74] sm:$0x1] %v1101_v10  ;;  %v868_v18 = vshrl.u32 %v697_v11, 16  ;;  %v871_v19 = vshll.u32 %v697_v11, 16  ;;  %v2007_v43 = vld [vmem:[#allocation2 + $0x6c] sm:$0xe] }
 0x12f   : > { %5802 = vmatmul.msk.bf16.gmra.mxu3 %vm505_vm1, %v2203_v13  ;;  %v614_v22 = vpop.f32.mrf.mxu0  ;;  %v1419_v23 = vsel %vm6543_vm9, %v1414_v15, %v1418_v17  ;;  %v1423_v38 = vrot.slane %v1421_v27, 4  ;;  %v1426_v44 = vrot.slane %v1424_v28, 5  ;;  %v5786_v50 = vrot.slane %v2007_v43, 9 }
 0x130   : > { %v870_v29 = vrot.slane %v868_v18, 7  ;;  %v615_v30 = vadd.f32 %v6773_v25, %v614_v22  ;;  %v1607_v31 = vunpack.c.l.b16 %v1419_v23 }
 0x131   : > { %v1427_v54 = vor.u32 %v1426_v44, %v1423_v38 }
 0x132   : > { %v873_v40 = vor.u32 %v871_v19, %v870_v29  ;;  %v666_v41 = vmax.f32 %v615_v30, 0.0  ;;  %v1630_v42 = vpack.c.b16 %v1607_v31, %v1606_v20  ;;  %v874_v52 = vrot.slane %v870_v29, 4 }
 0x133   : > { %v1428_v15 = vrot.slane %v1427_v54, 4 }
 0x134   : > { %v1104_v45 = vsel %vm6594_vm11, %v873_v40, %v1103_v36  ;;  %v698_v46 = vpack.c.bf16 %v666_v41, %v666_v41  ;;  %5689 = vmatmul.msk.bf16.gmra.mxu1 %vm505_vm1, %v1630_v42  ;;  %v6135_v47 = vld [vmem:[#allocation2 + $0x6c] sm:$0xff]  ;;  %v1110_v41 = vld [vmem:[#allocation2 + $0x84] sm:$0xf] }
 0x135   : > { %v1171_v48 = vld [vmem:[#allocation2 + $0x70] sm:$0xf]  ;;  %1105 = vst [vmem:[#allocation2 + $0x78] sm:$0xf] %v1104_v45  ;;  %v1194_v49 = vld [vmem:[#allocation2 + $0x74] sm:$0x1]  ;;  %5770 = vmatmul.msk.bf16.gmra.mxu2 %vm505_vm1, %v6135_v47 }
 0x136   : > { %v2114_v51 = vrot.slane %v1171_v48, 5  ;;  %v876_v53 = vshrl.u32 %v698_v46, 16  ;;  %v1430_v55 = vshll.u32 %v1171_v48, 16  ;;  %v2117_v59 = vrot.slane %v1194_v49, 5 }
 0x137   : > { %v617_v56 = vpop.f32.mrf.mxu0  ;;  %v1434_v60 = vshrl.u32 %v1171_v48, 16  ;;  %v879_v62 = vshll.u32 %v698_v46, 16  ;;  %v1440_v8 = vshll.u32 %v1194_v49, 16 }
 0x138   : > { %v2115_v57 = vsel %vm6532_vm8, %v5786_v50, %v2114_v51  ;;  %v2116_v58 = vrot.slane %v2114_v51, 4  ;;  %v878_v61 = vrot.slane %v876_v53, 7  ;;  %v618_v0 = vadd.f32 %v6773_v25, %v617_v56  ;;  %v1923_v34 = vpop.f32.mrf.mxu2 }
 0x139   : > { %v1432_v2 = vrot.slane %v1430_v55, 5  ;;  %v2181_v7 = vunpack.c.l.b16 %v2115_v57  ;;  %v1436_v9 = vrot.slane %v1434_v60, 4  ;;  %v1442_v24 = vrot.slane %v1440_v8, 5  ;;  %v6145_v8 = vld [vmem:[#allocation2 + $0x30] sm:$0xff] }
 0x13a   : > { %v2118_v6 = vsel %vm6532_vm8, %v2116_v58, %v2117_v59  ;;  %v881_v10 = vor.u32 %v879_v62, %v878_v61  ;;  %v883_v11 = vrot.slane %v878_v61, 4  ;;  %v667_v13 = vmax.f32 %v618_v0, 0.0  ;;  %5877 = vmatmul.msk.bf16.gmra.mxu0 %vm505_vm1, %v6144_v1 }
 0x13b   : > { %v2182_v14 = vunpack.c.l.b16 %v2118_v6  ;;  %v1437_v17 = vor.u32 %v1436_v9, %v1432_v2  ;;  %v1433_v27 = vsel %vm6543_vm9, %v1428_v15, %v1432_v2 }
 0x13c   : > { %v882_v18 = vsel %vm6602_vm14, %v874_v52, %v881_v10  ;;  %v1108_v19 = vsel %vm6608_vm15, %v883_v11, %v1107_v4  ;;  %v699_v20 = vpack.c.bf16 %v667_v13, %v667_v13  ;;  %v1172_v22 = vld [vmem:[#allocation2 + $0x78] sm:$0xf]  ;;  %v1608_v44 = vunpack.c.l.b16 %v1433_v27 }
 0x13d   : > { %v2204_v21 = vpack.c.b16 %v2182_v14, %v2181_v7  ;;  %1106 = vst.msk [vmem:[#allocation2 + $0x7c] sm:$0xf] %vm332_vm2, %v882_v18  ;;  %v1438_v23 = vrot.slane %v1437_v17, 4  ;;  %v1445_v28 = vshrl.u32 %v1172_v22, 16  ;;  %v1448_v29 = vshll.u32 %v1172_v22, 16 }
 0x13e   : > { %1109 = vst [vmem:[#allocation2 + $0x80] sm:$0x1] %v1108_v19  ;;  %v885_v26 = vshrl.u32 %v699_v20, 16  ;;  %v888_v36 = vshll.u32 %v699_v20, 16  ;;  %v2008_v52 = vld [vmem:[#allocation2 + $0x78] sm:$0xe] }
 0x13f   : > { %5803 = vmatmul.msk.bf16.gmra.mxu3 %vm505_vm1, %v2204_v21  ;;  %v619_v30 = vpop.f32.mrf.mxu0  ;;  %v1443_v31 = vsel %vm6543_vm9, %v1438_v23, %v1442_v24  ;;  %v1447_v45 = vrot.slane %v1445_v28, 4  ;;  %v1450_v50 = vrot.slane %v1448_v29, 5  ;;  %v5787_v61 = vrot.slane %v2008_v52, 9  ;;  %v1114_v14 = vld [vmem:[#allocation2 + $0x8c] sm:$0x1] }
 0x140   : > { %v887_v33 = vrot.slane %v885_v26, 7  ;;  %v620_v38 = vadd.f32 %v6773_v25, %v619_v30  ;;  %v1609_v40 = vunpack.c.l.b16 %v1443_v31  ;;  %v1925_v49 = vpop.f32.mrf.mxu2 }
 0x141   : > { %v1703_v42 = vpop.f32.mrf.mxu1  ;;  %v1451_v62 = vor.u32 %v1450_v50, %v1447_v45 }
 0x142   : > { %v2276_v43 = vpop.f32.mrf.mxu3  ;;  %v890_v46 = vor.u32 %v888_v36, %v887_v33  ;;  %v668_v47 = vmax.f32 %v620_v38, 0.0  ;;  %v1924_v48 = vadd.f32 %v1923_v34, %v1703_v42  ;;  %v1631_v51 = vpack.c.b16 %v1609_v40, %v1608_v44 }
 0x143   : > { %v891_v13 = vrot.slane %v887_v33, 4  ;;  %v1452_v29 = vrot.slane %v1451_v62, 4 }
 0x144   : > { %v1111_v53 = vsel %vm6594_vm11, %v890_v46, %v1110_v41  ;;  %v700_v54 = vpack.c.bf16 %v668_v47, %v668_v47  ;;  %v6836_v55 = vadd.f32 %v2276_v43, %v1924_v48  ;;  %v6136_v56 = vld [vmem:[#allocation2 + $0x78] sm:$0xff]  ;;  %5690 = vmatmul.msk.bf16.gmra.mxu1 %vm505_vm1, %v1631_v51 }
 0x145   : > { %v1173_v57 = vld [vmem:[#allocation2 + $0x7c] sm:$0xf]  ;;  %1112 = vst [vmem:[#allocation2 + $0x84] sm:$0xf] %v1111_v53  ;;  %v1195_v58 = vld [vmem:[#allocation2 + $0x80] sm:$0x1]  ;;  %5771 = vmatmul.msk.bf16.gmra.mxu2 %vm505_vm1, %v6136_v56 }
 0x146   : > { %v2121_v59 = vrot.slane %v1173_v57, 5  ;;  %v893_v60 = vshrl.u32 %v700_v54, 16  ;;  %v1454_v0 = vshll.u32 %v1173_v57, 16  ;;  %v896_v1 = vshll.u32 %v700_v54, 16  ;;  %v1117_v54 = vld [vmem:[#allocation2 + $0x90] sm:$0xf] }
 0x147   : > { %v622_v2 = vpop.f32.mrf.mxu0  ;;  %v2124_v34 = vrot.slane %v1195_v58, 5  ;;  %v1458_v6 = vshrl.u32 %v1173_v57, 16  ;;  %v1464_v20 = vshll.u32 %v1195_v58, 16 }
 0x148   : > { %v2123_v4 = vrot.slane %v2121_v59, 4  ;;  %v895_v7 = vrot.slane %v893_v60, 7  ;;  %v623_v9 = vadd.f32 %v6773_v25, %v622_v2  ;;  %v2122_v10 = vsel %vm6532_vm8, %v5787_v61, %v2121_v59  ;;  %v1928_v26 = vpop.f32.mrf.mxu2 }
 0x149   : > { %v1456_v11 = vrot.slane %v1454_v0, 5  ;;  %v1705_v15 = vpop.f32.mrf.mxu1  ;;  %v1460_v19 = vrot.slane %v1458_v6, 4  ;;  %v2183_v27 = vunpack.c.l.b16 %v2122_v10  ;;  %v1466_v43 = vrot.slane %v1464_v20, 5 }
 0x14a   : > { %v2278_v17 = vpop.f32.mrf.mxu3  ;;  %v2125_v18 = vsel %vm6532_vm8, %v2123_v4, %v2124_v34  ;;  %v898_v21 = vor.u32 %v896_v1, %v895_v7  ;;  %v900_v22 = vrot.slane %v895_v7, 4  ;;  %v669_v23 = vmax.f32 %v623_v9, 0.0  ;;  %5878 = vmatmul.msk.bf16.gmra.mxu0 %vm505_vm1, %v6145_v8 }
 0x14b   : > { %v1926_v24 = vadd.f32 %v1925_v49, %v1705_v15  ;;  %v2184_v28 = vunpack.c.l.b16 %v2125_v18  ;;  %v1461_v30 = vor.u32 %v1460_v19, %v1456_v11  ;;  %v1457_v45 = vsel %vm6543_vm9, %v1452_v29, %v1456_v11 }
 0x14c   : > { %v899_v31 = vsel %vm6602_vm14, %v891_v13, %v898_v21  ;;  %v1115_v33 = vsel %vm6608_vm15, %v900_v22, %v1114_v14  ;;  %v701_v36 = vpack.c.bf16 %v669_v23, %v669_v23  ;;  %v1174_v40 = vld [vmem:[#allocation2 + $0x84] sm:$0xf]  ;;  %v1610_v58 = vunpack.c.l.b16 %v1457_v45 }
 0x14d   : > { %v6850_v38 = vadd.f32 %v2278_v17, %v1926_v24  ;;  %1113 = vst.msk [vmem:[#allocation2 + $0x88] sm:$0xf] %vm332_vm2, %v899_v31  ;;  %v2205_v41 = vpack.c.b16 %v2184_v28, %v2183_v27  ;;  %v1462_v42 = vrot.slane %v1461_v30, 4  ;;  %v1469_v46 = vshrl.u32 %v1174_v40, 16  ;;  %v2009_v4 = vld [vmem:[#allocation2 + $0x84] sm:$0xe] }
 0x14e   : > { %1116 = vst [vmem:[#allocation2 + $0x8c] sm:$0x1] %v1115_v33  ;;  %v902_v44 = vshrl.u32 %v701_v36, 16  ;;  %v1472_v47 = vshll.u32 %v1174_v40, 16  ;;  %v905_v51 = vshll.u32 %v701_v36, 16  ;;  %v5788_v14 = vrot.slane %v2009_v4, 9 }
 0x14f   : > { %5804 = vmatmul.msk.bf16.gmra.mxu3 %vm505_vm1, %v2205_v41  ;;  %v624_v48 = vpop.f32.mrf.mxu0  ;;  %v1467_v49 = vsel %vm6543_vm9, %v1462_v42, %v1466_v43  ;;  %v1471_v59 = vrot.slane %v1469_v46, 4  ;;  %v1121_v30 = vld [vmem:[#allocation2 + $0x98] sm:$0x1] }
 0x150   : > { %v904_v50 = vrot.slane %v902_v44, 7  ;;  %v625_v52 = vadd.f32 %v6773_v25, %v624_v48  ;;  %v1611_v53 = vunpack.c.l.b16 %v1467_v49  ;;  %v1930_v0 = vpop.f32.mrf.mxu2  ;;  %v1474_v1 = vrot.slane %v1472_v47, 5 }
 0x151   : > { %v1708_v56 = vpop.f32.mrf.mxu1 }
 0x152   : > { %v2281_v57 = vpop.f32.mrf.mxu3  ;;  %v907_v60 = vor.u32 %v905_v51, %v904_v50  ;;  %v670_v61 = vmax.f32 %v625_v52, 0.0  ;;  %v1929_v62 = vadd.f32 %v1928_v26, %v1708_v56  ;;  %v1632_v2 = vpack.c.b16 %v1611_v53, %v1610_v58  ;;  %v6146_v26 = vld [vmem:[#allocation2 + $0x3c] sm:$0xff] }
 0x153   : > { %v1475_v15 = vor.u32 %v1474_v1, %v1471_v59  ;;  %v908_v29 = vrot.slane %v904_v50, 4 }
 0x154   : > { %v1118_v34 = vsel %vm6594_vm11, %v907_v60, %v1117_v54  ;;  %v702_v6 = vpack.c.bf16 %v670_v61, %v670_v61  ;;  %v6861_v7 = vadd.f32 %v2281_v57, %v1929_v62  ;;  %v6137_v9 = vld [vmem:[#allocation2 + $0x84] sm:$0xff]  ;;  %5691 = vmatmul.msk.bf16.gmra.mxu1 %vm505_vm1, %v1632_v2 }
 0x155   : > { %v1175_v8 = vld [vmem:[#allocation2 + $0x88] sm:$0xf]  ;;  %1119 = vst [vmem:[#allocation2 + $0x90] sm:$0xf] %v1118_v34  ;;  %v1196_v10 = vld [vmem:[#allocation2 + $0x8c] sm:$0x1]  ;;  %5772 = vmatmul.msk.bf16.gmra.mxu2 %vm505_vm1, %v6137_v9 }
 0x156   : > { %v2128_v11 = vrot.slane %v1175_v8, 5  ;;  %v910_v13 = vshrl.u32 %v702_v6, 16  ;;  %v1478_v17 = vshll.u32 %v1175_v8, 16  ;;  %v913_v18 = vshll.u32 %v702_v6, 16 }
 0x157   : > { %v627_v19 = vpop.f32.mrf.mxu0  ;;  %v2131_v21 = vrot.slane %v1196_v10, 5  ;;  %v1482_v22 = vshrl.u32 %v1175_v8, 16  ;;  %v1488_v41 = vshll.u32 %v1196_v10, 16  ;;  %v1476_v49 = vrot.slane %v1475_v15, 4  ;;  %v1124_v8 = vld [vmem:[#allocation2 + $0x9c] sm:$0xf] }
 0x158   : > { %v2130_v20 = vrot.slane %v2128_v11, 4  ;;  %v912_v23 = vrot.slane %v910_v13, 7  ;;  %v628_v24 = vadd.f32 %v6773_v25, %v627_v19  ;;  %v2129_v27 = vsel %vm6532_vm8, %v5788_v14, %v2128_v11  ;;  %v1933_v46 = vpop.f32.mrf.mxu2 }
 0x159   : > { %v1480_v28 = vrot.slane %v1478_v17, 5  ;;  %v1710_v31 = vpop.f32.mrf.mxu1  ;;  %v1484_v40 = vrot.slane %v1482_v22, 4  ;;  %v2185_v47 = vunpack.c.l.b16 %v2129_v27  ;;  %v1490_v59 = vrot.slane %v1488_v41, 5 }
 0x15a   : > { %v2283_v33 = vpop.f32.mrf.mxu3  ;;  %v2132_v36 = vsel %vm6532_vm8, %v2130_v20, %v2131_v21  ;;  %v915_v42 = vor.u32 %v913_v18, %v912_v23  ;;  %v917_v43 = vrot.slane %v912_v23, 4  ;;  %v671_v44 = vmax.f32 %v628_v24, 0.0  ;;  %5879 = vmatmul.msk.bf16.gmra.mxu0 %vm505_vm1, %v6146_v26 }
 0x15b   : > { %v1931_v45 = vadd.f32 %v1930_v0, %v1710_v31  ;;  %v2186_v48 = vunpack.c.l.b16 %v2132_v36  ;;  %v1485_v51 = vor.u32 %v1484_v40, %v1480_v28  ;;  %v1481_v61 = vsel %vm6543_vm9, %v1476_v49, %v1480_v28 }
 0x15c   : > { %v916_v50 = vsel %vm6602_vm14, %v908_v29, %v915_v42  ;;  %v1122_v52 = vsel %vm6608_vm15, %v917_v43, %v1121_v30  ;;  %v703_v53 = vpack.c.bf16 %v671_v44, %v671_v44  ;;  %v1176_v56 = vld [vmem:[#allocation2 + $0x90] sm:$0xf]  ;;  %v1612_v13 = vunpack.c.l.b16 %v1481_v61 }
 0x15d   : > { %v6875_v54 = vadd.f32 %v2283_v33, %v1931_v45  ;;  %1120 = vst.msk [vmem:[#allocation2 + $0x94] sm:$0xf] %vm332_vm2, %v916_v50  ;;  %v2206_v57 = vpack.c.b16 %v2186_v48, %v2185_v47  ;;  %v1486_v58 = vrot.slane %v1485_v51, 4  ;;  %v1493_v62 = vshrl.u32 %v1176_v56, 16  ;;  %v2010_v22 = vld [vmem:[#allocation2 + $0x90] sm:$0xe] }
 0x15e   : > { %1123 = vst [vmem:[#allocation2 + $0x98] sm:$0x1] %v1122_v52  ;;  %v919_v60 = vshrl.u32 %v703_v53, 16  ;;  %v1496_v0 = vshll.u32 %v1176_v56, 16  ;;  %v922_v34 = vshll.u32 %v703_v53, 16  ;;  %v5789_v33 = vrot.slane %v2010_v22, 9 }
 0x15f   : > { %5805 = vmatmul.msk.bf16.gmra.mxu3 %vm505_vm1, %v2206_v57  ;;  %v629_v1 = vpop.f32.mrf.mxu0  ;;  %v1491_v2 = vsel %vm6543_vm9, %v1486_v58, %v1490_v59  ;;  %v1495_v14 = vrot.slane %v1493_v62, 4  ;;  %v6147_v48 = vld [vmem:[#allocation2 + $0x48] sm:$0xff]  ;;  %v1128_v52 = vld [vmem:[#allocation2 + $0xa4] sm:$0x1] }
 0x160   : > { %v921_v4 = vrot.slane %v919_v60, 7  ;;  %v630_v6 = vadd.f32 %v6773_v25, %v629_v1  ;;  %v1613_v9 = vunpack.c.l.b16 %v1491_v2  ;;  %v1935_v19 = vpop.f32.mrf.mxu2  ;;  %v1498_v20 = vrot.slane %v1496_v0, 5 }
 0x161   : > { %v1713_v10 = vpop.f32.mrf.mxu1 }
 0x162   : > { %v2286_v11 = vpop.f32.mrf.mxu3  ;;  %v924_v15 = vor.u32 %v922_v34, %v921_v4  ;;  %v672_v17 = vmax.f32 %v630_v6, 0.0  ;;  %v1934_v18 = vadd.f32 %v1933_v46, %v1713_v10  ;;  %v1633_v21 = vpack.c.b16 %v1613_v9, %v1612_v13 }
 0x163   : > { %v1499_v36 = vor.u32 %v1498_v20, %v1495_v14  ;;  %v925_v50 = vrot.slane %v921_v4, 4 }
 0x164   : > { %v1125_v23 = vsel %vm6594_vm11, %v924_v15, %v1124_v8  ;;  %v704_v24 = vpack.c.bf16 %v672_v17, %v672_v17  ;;  %v6886_v26 = vadd.f32 %v2286_v11, %v1934_v18  ;;  %v6138_v27 = vld [vmem:[#allocation2 + $0x90] sm:$0xff]  ;;  %5692 = vmatmul.msk.bf16.gmra.mxu1 %vm505_vm1, %v1633_v21 }
 0x165   : > { %v1177_v28 = vld [vmem:[#allocation2 + $0x94] sm:$0xf]  ;;  %1126 = vst [vmem:[#allocation2 + $0x9c] sm:$0xf] %v1125_v23  ;;  %v1197_v29 = vld [vmem:[#allocation2 + $0x98] sm:$0x1]  ;;  %5773 = vmatmul.msk.bf16.gmra.mxu2 %vm505_vm1, %v6138_v27 }
 0x166   : > { %v2135_v30 = vrot.slane %v1177_v28, 5  ;;  %v927_v31 = vshrl.u32 %v704_v24, 16  ;;  %v1502_v40 = vshll.u32 %v1177_v28, 16  ;;  %v930_v41 = vshll.u32 %v704_v24, 16 }
 0x167   : > { %v632_v42 = vpop.f32.mrf.mxu0  ;;  %v2138_v44 = vrot.slane %v1197_v29, 5  ;;  %v1506_v45 = vshrl.u32 %v1177_v28, 16  ;;  %v1512_v59 = vshll.u32 %v1197_v29, 16  ;;  %v1500_v6 = vrot.slane %v1499_v36, 4 }
 0x168   : > { %v2137_v43 = vrot.slane %v2135_v30, 4  ;;  %v929_v46 = vrot.slane %v927_v31, 7  ;;  %v633_v47 = vadd.f32 %v6773_v25, %v632_v42  ;;  %v2136_v49 = vsel %vm6532_vm8, %v5789_v33, %v2135_v30  ;;  %v1938_v1 = vpop.f32.mrf.mxu2  ;;  %v1131_v30 = vld [vmem:[#allocation2 + $0xa8] sm:$0xf] }
 0x169   : > { %v1504_v51 = vrot.slane %v1502_v40, 5  ;;  %v1715_v53 = vpop.f32.mrf.mxu1  ;;  %v1508_v58 = vrot.slane %v1506_v45, 4  ;;  %v2187_v2 = vunpack.c.l.b16 %v2136_v49  ;;  %v1514_v17 = vrot.slane %v1512_v59, 5 }
 0x16a   : > { %v2288_v56 = vpop.f32.mrf.mxu3  ;;  %v2139_v57 = vsel %vm6532_vm8, %v2137_v43, %v2138_v44  ;;  %v932_v60 = vor.u32 %v930_v41, %v929_v46  ;;  %v934_v61 = vrot.slane %v929_v46, 4  ;;  %v673_v62 = vmax.f32 %v633_v47, 0.0  ;;  %5880 = vmatmul.msk.bf16.gmra.mxu0 %vm505_vm1, %v6147_v48 }
 0x16b   : > { %v1936_v0 = vadd.f32 %v1935_v19, %v1715_v53  ;;  %v2188_v34 = vunpack.c.l.b16 %v2139_v57  ;;  %v1509_v9 = vor.u32 %v1508_v58, %v1504_v51  ;;  %v1505_v19 = vsel %vm6543_vm9, %v1500_v6, %v1504_v51 }
 0x16c   : > { %v933_v4 = vsel %vm6602_vm14, %v925_v50, %v932_v60  ;;  %v1129_v8 = vsel %vm6608_vm15, %v934_v61, %v1128_v52  ;;  %v705_v10 = vpack.c.bf16 %v673_v62, %v673_v62  ;;  %v1178_v13 = vld [vmem:[#allocation2 + $0x9c] sm:$0xf]  ;;  %v1614_v36 = vunpack.c.l.b16 %v1505_v19 }
 0x16d   : > { %v6900_v11 = vadd.f32 %v2288_v56, %v1936_v0  ;;  %1127 = vst.msk [vmem:[#allocation2 + $0xa0] sm:$0xf] %vm332_vm2, %v933_v4  ;;  %v2207_v14 = vpack.c.b16 %v2188_v34, %v2187_v2  ;;  %v1510_v15 = vrot.slane %v1509_v9, 4  ;;  %v1517_v20 = vshrl.u32 %v1178_v13, 16  ;;  %v2011_v47 = vld [vmem:[#allocation2 + $0x9c] sm:$0xe] }
 0x16e   : > { %1130 = vst [vmem:[#allocation2 + $0xa4] sm:$0x1] %v1129_v8  ;;  %v936_v18 = vshrl.u32 %v705_v10, 16  ;;  %v1520_v21 = vshll.u32 %v1178_v13, 16  ;;  %v939_v27 = vshll.u32 %v705_v10, 16  ;;  %v5790_v58 = vrot.slane %v2011_v47, 9 }
 0x16f   : > { %5806 = vmatmul.msk.bf16.gmra.mxu3 %vm505_vm1, %v2207_v14  ;;  %v634_v22 = vpop.f32.mrf.mxu0  ;;  %v1515_v23 = vsel %vm6543_vm9, %v1510_v15, %v1514_v17  ;;  %v1519_v40 = vrot.slane %v1517_v20, 4  ;;  %v6148_v9 = vld [vmem:[#allocation2 + $0x54] sm:$0xff]  ;;  %v1135_v13 = vld [vmem:[#allocation2 + $0xb0] sm:$0x1] }
 0x170   : > { %v938_v24 = vrot.slane %v936_v18, 7  ;;  %v635_v28 = vadd.f32 %v6773_v25, %v634_v22  ;;  %v1615_v29 = vunpack.c.l.b16 %v1515_v23  ;;  %v1940_v44 = vpop.f32.mrf.mxu2  ;;  %v1522_v45 = vrot.slane %v1520_v21, 5 }
 0x171   : > { %v1718_v31 = vpop.f32.mrf.mxu1 }
 0x172   : > { %v2291_v33 = vpop.f32.mrf.mxu3  ;;  %v941_v41 = vor.u32 %v939_v27, %v938_v24  ;;  %v674_v42 = vmax.f32 %v635_v28, 0.0  ;;  %v1939_v43 = vadd.f32 %v1938_v1, %v1718_v31  ;;  %v1634_v46 = vpack.c.b16 %v1615_v29, %v1614_v36 }
 0x173   : > { %v1523_v59 = vor.u32 %v1522_v45, %v1519_v40  ;;  %v942_v10 = vrot.slane %v938_v24, 4 }
 0x174   : > { %v1132_v48 = vsel %vm6594_vm11, %v941_v41, %v1131_v30  ;;  %v706_v49 = vpack.c.bf16 %v674_v42, %v674_v42  ;;  %v6911_v51 = vadd.f32 %v2291_v33, %v1939_v43  ;;  %v6139_v50 = vld [vmem:[#allocation2 + $0x9c] sm:$0xff]  ;;  %5693 = vmatmul.msk.bf16.gmra.mxu1 %vm505_vm1, %v1634_v46 }
 0x175   : > { %v1179_v52 = vld [vmem:[#allocation2 + $0xa0] sm:$0xf]  ;;  %1133 = vst [vmem:[#allocation2 + $0xa8] sm:$0xf] %v1132_v48  ;;  %v1198_v53 = vld [vmem:[#allocation2 + $0xa4] sm:$0x1]  ;;  %5774 = vmatmul.msk.bf16.gmra.mxu2 %vm505_vm1, %v6139_v50 }
 0x176   : > { %v2142_v56 = vrot.slane %v1179_v52, 5  ;;  %v944_v57 = vshrl.u32 %v706_v49, 16  ;;  %v1526_v60 = vshll.u32 %v1179_v52, 16  ;;  %v947_v61 = vshll.u32 %v706_v49, 16 }
 0x177   : > { %v637_v62 = vpop.f32.mrf.mxu0  ;;  %v2145_v1 = vrot.slane %v1198_v53, 5  ;;  %v1530_v2 = vshrl.u32 %v1179_v52, 16  ;;  %v1536_v19 = vshll.u32 %v1198_v53, 16  ;;  %v1524_v30 = vrot.slane %v1523_v59, 4 }
 0x178   : > { %v2144_v0 = vrot.slane %v2142_v56, 4  ;;  %v946_v34 = vrot.slane %v944_v57, 7  ;;  %v638_v6 = vadd.f32 %v6773_v25, %v637_v62  ;;  %v2143_v4 = vsel %vm6532_vm8, %v5790_v58, %v2142_v56  ;;  %v1943_v27 = vpop.f32.mrf.mxu2  ;;  %v1138_v58 = vld [vmem:[#allocation2 + $0xb4] sm:$0xf] }
 0x179   : > { %v1528_v8 = vrot.slane %v1526_v60, 5  ;;  %v1720_v14 = vpop.f32.mrf.mxu1  ;;  %v1532_v18 = vrot.slane %v1530_v2, 4  ;;  %v2189_v28 = vunpack.c.l.b16 %v2143_v4 }
 0x17a   : > { %v2293_v15 = vpop.f32.mrf.mxu3  ;;  %v2146_v17 = vsel %vm6532_vm8, %v2144_v0, %v2145_v1  ;;  %v949_v20 = vor.u32 %v947_v61, %v946_v34  ;;  %v951_v21 = vrot.slane %v946_v34, 4  ;;  %v675_v22 = vmax.f32 %v638_v6, 0.0  ;;  %5881 = vmatmul.msk.bf16.gmra.mxu0 %vm505_vm1, %v6148_v9  ;;  %v6934_v9 = vld [vmem:[#allocation2 + $0x10] sm:$0xf] }
 0x17b   : > { %v1941_v23 = vadd.f32 %v1940_v44, %v1720_v14  ;;  %v2190_v29 = vunpack.c.l.b16 %v2146_v17  ;;  %v1533_v31 = vor.u32 %v1532_v18, %v1528_v8  ;;  %v1538_v44 = vrot.slane %v1536_v19, 5 }
 0x17c   : > { %v950_v24 = vsel %vm6602_vm14, %v942_v10, %v949_v20  ;;  %v1136_v33 = vsel %vm6608_vm15, %v951_v21, %v1135_v13  ;;  %v707_v36 = vpack.c.bf16 %v675_v22, %v675_v22  ;;  %v1180_v41 = vld [vmem:[#allocation2 + $0xa8] sm:$0xf]  ;;  %v1529_v46 = vsel %vm6543_vm9, %v1524_v30, %v1528_v8 }
 0x17d   : > { %v6925_v40 = vadd.f32 %v2293_v15, %v1941_v23  ;;  %1134 = vst.msk [vmem:[#allocation2 + $0xac] sm:$0xf] %vm332_vm2, %v950_v24  ;;  %v2208_v42 = vpack.c.b16 %v2190_v29, %v2189_v28  ;;  %v1534_v43 = vrot.slane %v1533_v31, 4  ;;  %v1541_v47 = vshrl.u32 %v1180_v41, 16  ;;  %v2012_v8 = vld [vmem:[#allocation2 + $0xa8] sm:$0xe] }
 0x17e   : > { %1137 = vst [vmem:[#allocation2 + $0xb0] sm:$0x1] %v1136_v33  ;;  %v953_v45 = vshrl.u32 %v707_v36, 16  ;;  %v1544_v48 = vshll.u32 %v1180_v41, 16  ;;  %v956_v53 = vshll.u32 %v707_v36, 16  ;;  %v1616_v61 = vunpack.c.l.b16 %v1529_v46  ;;  %v6149_v41 = vld [vmem:[#allocation2 + $0x60] sm:$0xff] }
 0x17f   : > { %5807 = vmatmul.msk.bf16.gmra.mxu3 %vm505_vm1, %v2208_v42  ;;  %v639_v49 = vpop.f32.mrf.mxu0  ;;  %v1539_v50 = vsel %vm6543_vm9, %v1534_v43, %v1538_v44  ;;  %v1543_v62 = vrot.slane %v1541_v47, 4  ;;  %v3389_v20 = vrot.slane %v6934_v9, 5  ;;  %v5791_v22 = vrot.slane %v2012_v8, 9 }
 0x180   : > { %v955_v52 = vrot.slane %v953_v45, 7  ;;  %v640_v56 = vadd.f32 %v6773_v25, %v639_v49  ;;  %v1617_v57 = vunpack.c.l.b16 %v1539_v50  ;;  %v1945_v34 = vpop.f32.mrf.mxu2  ;;  %v1546_v6 = vrot.slane %v1544_v48, 5  ;;  %v1142_v45 = vld [vmem:[#allocation2 + $0xbc] sm:$0x1] }
 0x181   : > { %v1723_v59 = vpop.f32.mrf.mxu1 }
 0x182   : > { %v2296_v60 = vpop.f32.mrf.mxu3  ;;  %v958_v0 = vor.u32 %v956_v53, %v955_v52  ;;  %v676_v1 = vmax.f32 %v640_v56, 0.0  ;;  %v1944_v2 = vadd.f32 %v1943_v27, %v1723_v59  ;;  %v1635_v4 = vpack.c.b16 %v1617_v57, %v1616_v61 }
 0x183   : > { %v1547_v23 = vor.u32 %v1546_v6, %v1543_v62  ;;  %v959_v44 = vrot.slane %v955_v52, 4 }
 0x184   : > { %v1139_v10 = vsel %vm6594_vm11, %v958_v0, %v1138_v58  ;;  %v708_v13 = vpack.c.bf16 %v676_v1, %v676_v1  ;;  %v6938_v14 = vadd.f32 %v2296_v60, %v1944_v2  ;;  %v6140_v15 = vld [vmem:[#allocation2 + $0xa8] sm:$0xff]  ;;  %5694 = vmatmul.msk.bf16.gmra.mxu1 %vm505_vm1, %v1635_v4 }
 0x185   : > { %v1181_v17 = vld [vmem:[#allocation2 + $0xac] sm:$0xf]  ;;  %1140 = vst [vmem:[#allocation2 + $0xb4] sm:$0xf] %v1139_v10  ;;  %v1199_v18 = vld [vmem:[#allocation2 + $0xb0] sm:$0x1]  ;;  %5775 = vmatmul.msk.bf16.gmra.mxu2 %vm505_vm1, %v6140_v15 }
 0x186   : > { %v2149_v19 = vrot.slane %v1181_v17, 5  ;;  %v961_v21 = vshrl.u32 %v708_v13, 16  ;;  %v1550_v27 = vshll.u32 %v1181_v17, 16  ;;  %v964_v28 = vshll.u32 %v708_v13, 16  ;;  %v6955_v4 = vld [vmem:[#allocation2 + $0xc] sm:$0xe] }
 0x187   : > { %v642_v29 = vpop.f32.mrf.mxu0  ;;  %v2152_v31 = vrot.slane %v1199_v18, 5  ;;  %v1554_v24 = vshrl.u32 %v1181_v17, 16  ;;  %v1560_v50 = vshll.u32 %v1199_v18, 16  ;;  %v1548_v61 = vrot.slane %v1547_v23, 4  ;;  %v6960_v15 = vld [vmem:[#allocation2 + $0xc] sm:$0xf] }
 0x188   : > { %v2151_v30 = vrot.slane %v2149_v19, 4  ;;  %v963_v33 = vrot.slane %v961_v21, 7  ;;  %v643_v36 = vadd.f32 %v6773_v25, %v642_v29  ;;  %v2150_v42 = vsel %vm6532_vm8, %v5791_v22, %v2149_v19  ;;  %v1948_v59 = vpop.f32.mrf.mxu2  ;;  %v6222_v29 = vld [vmem:[%s8362_s2] ss:$0 sm:$0xff] }
 0x189   : > { %v1552_v43 = vrot.slane %v1550_v27, 5  ;;  %v1725_v46 = vpop.f32.mrf.mxu1  ;;  %v1556_v49 = vrot.slane %v1554_v24, 4  ;;  %v2191_v25 = vunpack.c.l.b16 %v2150_v42  ;;  %v1562_v13 = vrot.slane %v1560_v50, 5 }
 0x18a   : > { %v2298_v47 = vpop.f32.mrf.mxu3  ;;  %v2153_v48 = vsel %vm6532_vm8, %v2151_v30, %v2152_v31  ;;  %v966_v53 = vor.u32 %v964_v28, %v963_v33  ;;  %v968_v56 = vrot.slane %v963_v33, 4  ;;  %v677_v57 = vmax.f32 %v643_v36, 0.0  ;;  %5882 = vmatmul.msk.bf16.gmra.mxu0 %vm505_vm1, %v6149_v41  ;;  %v1145_v33 = vld [vmem:[#allocation2 + $0xc0] sm:$0xf] }
 0x18b   : > { %v1946_v58 = vadd.f32 %v1945_v34, %v1725_v46  ;;  %v2192_v60 = vunpack.c.l.b16 %v2153_v48  ;;  %v1557_v62 = vor.u32 %v1556_v49, %v1552_v43  ;;  %v1553_v8 = vsel %vm6543_vm9, %v1548_v61, %v1552_v43 }
 0x18c   : > { %v967_v52 = vsel %vm6602_vm14, %v959_v44, %v966_v53  ;;  %v1143_v0 = vsel %vm6608_vm15, %v968_v56, %v1142_v45  ;;  %v709_v1 = vpack.c.bf16 %v677_v57, %v677_v57  ;;  %v1182_v6 = vld [vmem:[#allocation2 + $0xb4] sm:$0xf]  ;;  %v5908_v27 = vrot.slane %v6955_v4, 9  ;;  %v6022_v53 = vld [vmem:[%s8363_s3 + $0xe] sm:$0x3] }
 0x18d   : > { %v6953_v2 = vadd.f32 %v2298_v47, %v1946_v58  ;;  %1141 = vst.msk [vmem:[#allocation2 + $0xb8] sm:$0xf] %vm332_vm2, %v967_v52  ;;  %v2209_v34 = vpack.c.b16 %v2192_v60, %v2191_v25  ;;  %v1558_v10 = vrot.slane %v1557_v62, 4  ;;  %v1565_v19 = vshrl.u32 %v1182_v6, 16  ;;  %v2013_v43 = vld [vmem:[#allocation2 + $0xb4] sm:$0xe] }
 0x18e   : > { %1144 = vst [vmem:[#allocation2 + $0xbc] sm:$0x1] %v1143_v0  ;;  %v970_v17 = vshrl.u32 %v709_v1, 16  ;;  %v973_v18 = vshll.u32 %v709_v1, 16  ;;  %v1568_v21 = vshll.u32 %v1182_v6, 16  ;;  %v2718_v24 = vshrl.u32 %v6960_v15, 16 }
 0x18f   : > { %5808 = vmatmul.msk.bf16.gmra.mxu3 %vm505_vm1, %v2209_v34  ;;  %v644_v22 = vpop.f32.mrf.mxu0  ;;  %v1563_v23 = vsel %vm6543_vm9, %v1558_v10, %v1562_v13  ;;  %v1618_v42 = vunpack.c.l.b16 %v1553_v8  ;;  %v1567_v44 = vrot.slane %v1565_v19, 4  ;;  %v6974_v45 = vrot.slane %v3389_v20, 4 }
 0x190   : > { %v6966_v28 = vrot.slane %v970_v17, 7  ;;  %v645_v30 = vadd.f32 %v6222_v29, %v644_v22  ;;  %v1619_v31 = vunpack.c.l.b16 %v1563_v23  ;;  %v1950_v49 = vpop.f32.mrf.mxu2  ;;  %v1570_v50 = vrot.slane %v1568_v21, 5  ;;  %v6150_v29 = vld [vmem:[#allocation2 + $0x6c] sm:$0xff] }
 0x191   : > { %v1728_v36 = vpop.f32.mrf.mxu1  ;;  %v4539_v57 = vsel %vm554_vm0, %v6022_v53, 0  ;;  %v2727_v58 = vshll.u32 %v6934_v9, 16  ;;  %v2731_v25 = vshrl.u32 %v6934_v9, 16  ;;  %v5792_v0 = vrot.slane %v2013_v43, 9 }
 0x192   : > { %v2301_v41 = vpop.f32.mrf.mxu3  ;;  %v975_v46 = vor.u32 %v973_v18, %v6966_v28  ;;  %v678_v47 = vmax.f32 %v645_v30, 0.0  ;;  %v1949_v48 = vadd.f32 %v1948_v59, %v1728_v36  ;;  %v1636_v56 = vpack.c.b16 %v1619_v31, %v1618_v42  ;;  %4548 = vmatpush.bf16.msra.mxu0 %v4539_v57  ;;  %v6055_v18 = vld [vmem:[%s8363_s3 + $0x10] sm:$0x3]  ;;  %v1149_v36 = vld [vmem:[#allocation2 + $0xc8] sm:$0x1] }
 0x193   : > { %v1921_v1 = vadd.f32 %v6807_v37, %v6815_v63  ;;  %v976_v6 = vrot.slane %v6966_v28, 4  ;;  %v1571_v13 = vor.u32 %v1570_v50, %v1567_v44  ;;  %v2733_v16 = vrot.slane %v2731_v25, 4 }
 0x194   : > { %v1146_v60 = vsel %vm6594_vm11, %v975_v46, %v1145_v33  ;;  %v710_v61 = vpack.c.bf16 %v678_v47, %v678_v47  ;;  %v6985_v62 = vadd.f32 %v2301_v41, %v1949_v48  ;;  %v6141_v59 = vld [vmem:[#allocation2 + $0xb4] sm:$0xff]  ;;  %5695 = vmatmul.msk.bf16.gmra.mxu1 %vm505_vm1, %v1636_v56  ;;  %v4937_v47 = vsel %vm554_vm0, %v6055_v18, 0 }
 0x195   : > { %v1183_v52 = vld [vmem:[#allocation2 + $0xb8] sm:$0xf]  ;;  %1147 = vst [vmem:[#allocation2 + $0xc0] sm:$0xf] %v1146_v60  ;;  %v1200_v34 = vld [vmem:[#allocation2 + $0xbc] sm:$0x1]  ;;  %5776 = vmatmul.msk.bf16.gmra.mxu2 %vm505_vm1, %v6141_v59  ;;  %4946 = vmatpush.bf16.msra.mxu1 %v4937_v47  ;;  %v2352_v12 = vadd.f32 %v6818_v5, %v1921_v1 }
 0x196   : > { %v2156_v8 = vrot.slane %v1183_v52, 5  ;;  %v978_v10 = vshrl.u32 %v710_v61, 16  ;;  %v981_v3 = vshll.u32 %v710_v61, 16  ;;  %v1574_v17 = vshll.u32 %v1183_v52, 16  ;;  %v7000_v33 = vld [vmem:[#allocation2 + $0x14] sm:$0x1] }
 0x197   : > { %v2557_v19 = vpop.f32.mrf.mxu0  ;;  %v2159_v21 = vrot.slane %v1200_v34, 5  ;;  %v1578_v22 = vshrl.u32 %v1183_v52, 16  ;;  %v1584_v31 = vshll.u32 %v1200_v34, 16  ;;  %v1572_v57 = vrot.slane %v1571_v13, 4  ;;  %v6151_v47 = vld [vmem:[#allocation2 + $0x78] sm:$0xff] }
 0x198   : > { %v2157_v37 = vsel %vm6532_vm8, %v5792_v0, %v2156_v8  ;;  %v2158_v63 = vrot.slane %v2156_v8, 4  ;;  %v980_v23 = vrot.slane %v978_v10, 7  ;;  %v6998_v28 = vadd.f32 %v2557_v19, %v6776_v39  ;;  %v1953_v39 = vpop.f32.mrf.mxu2 }
 0x199   : > { %v1576_v30 = vrot.slane %v1574_v17, 5  ;;  %v1730_v41 = vpop.f32.mrf.mxu1  ;;  %v2193_v44 = vunpack.c.l.b16 %v2157_v37  ;;  %v1580_v46 = vrot.slane %v1578_v22, 4  ;;  %v3392_v61 = vrot.slane %v7000_v33, 5  ;;  %v2673_v37 = vld [vmem:[#allocation2 + $0x1c] sm:$0xf] }
 0x19a   : > { %v2303_v42 = vpop.f32.mrf.mxu3  ;;  %v2160_v43 = vsel %vm6532_vm8, %v2158_v63, %v2159_v21  ;;  %v983_v48 = vor.u32 %v981_v3, %v980_v23  ;;  %v985_v50 = vrot.slane %v980_v23, 4  ;;  %v1951_v53 = vadd.f32 %v1950_v49, %v1730_v41  ;;  %5883 = vmatmul.msk.bf16.gmra.mxu0 %vm505_vm1, %v6150_v29 }
 0x19b   : > { %v2194_v56 = vunpack.c.l.b16 %v2160_v43  ;;  %v1581_v60 = vor.u32 %v1580_v46, %v1576_v30  ;;  %v2721_v59 = vshll.u32 %v6960_v15, 16  ;;  %v1577_v8 = vsel %vm6543_vm9, %v1572_v57, %v1576_v30  ;;  %v3324_v43 = vld [vmem:[#allocation2 + $0x18] sm:$0xe] }
 0x19c   : > { %v984_v52 = vsel %vm6602_vm14, %v976_v6, %v983_v48  ;;  %v1150_v0 = vsel %vm6608_vm15, %v985_v50, %v1149_v36  ;;  %v7012_v34 = vadd.f32 %v2303_v42, %v1951_v53  ;;  %v1586_v3 = vrot.slane %v1584_v31, 5 }
 0x19d   : > { %v2210_v49 = vpack.c.b16 %v2194_v56, %v2193_v44  ;;  %1148 = vst.msk [vmem:[#allocation2 + $0xc4] sm:$0xf] %vm332_vm2, %v984_v52  ;;  %v1582_v10 = vrot.slane %v1581_v60, 4  ;;  %v3393_v13 = vsel %vm6532_vm8, %v6974_v45, %v3392_v61  ;;  %v7021_v6 = vrot.slane %v2727_v58, 5 }
 0x19e   : > { %1151 = vst [vmem:[#allocation2 + $0xc8] sm:$0x1] %v1150_v0  ;;  %v3390_v19 = vsel %vm6532_vm8, %v5908_v27, %v3389_v20  ;;  %v1620_v5 = vunpack.c.l.b16 %v1577_v8  ;;  %v3502_v58 = vunpack.c.l.b16 %v3393_v13  ;;  %v2720_v21 = vrot.slane %v2718_v24, 4  ;;  %v7042_v24 = vld [vmem:[#allocation2 + $0x20] sm:$0x1] }
 0x19f   : > { %5809 = vmatmul.msk.bf16.gmra.mxu3 %vm505_vm1, %v2210_v49  ;;  %v2559_v17 = vpop.f32.mrf.mxu0  ;;  %v1587_v18 = vsel %vm6543_vm9, %v1582_v10, %v1586_v3  ;;  %v2723_v22 = vrot.slane %v2721_v59, 5  ;;  %v3501_v30 = vunpack.c.l.b16 %v3390_v19  ;;  %v2734_v4 = vor.u32 %v2733_v16, %v7021_v6  ;;  %v2672_v59 = vld [vmem:[#allocation2 + $0x18] sm:$0xf]  ;;  %v7053_v49 = vld [vmem:[#allocation2 + $0x1c] sm:$0xf] }
 0x1a0   : > { %v7032_v45 = vadd.f32 %v2559_v17, %v2352_v12  ;;  %v1621_v1 = vunpack.c.l.b16 %v1587_v18  ;;  %v1955_v9 = vpop.f32.mrf.mxu2  ;;  %v3396_v31 = vrot.slane %v2673_v37, 5  ;;  %v2737_v36 = vshll.u32 %v7000_v33, 16  ;;  %v4662_v8 = vld [vmem:[#allocation2 + $0x18] sm:$0xe]  ;;  %v7062_v19 = vld [vmem:[#allocation2 + $0x20] sm:$0x1] }
 0x1a1   : > { %v1733_v25 = vpop.f32.mrf.mxu1  ;;  %v3533_v27 = vpack.c.b16 %v3502_v58, %v3501_v30  ;;  %v2724_v41 = vor.u32 %v2723_v22, %v2720_v21  ;;  %v2735_v15 = vrot.slane %v2734_v4, 4  ;;  %v3399_v33 = vrot.slane %v7042_v24, 5  ;;  %v6158_v3 = vld [vmem:[#allocation2 + $0x18] sm:$0xff]  ;;  %v7075_v4 = vld [vmem:[#allocation2 + $0x28] sm:$0xf] }
 0x1a2   : > { %v2306_v63 = vpop.f32.mrf.mxu3  ;;  %v1954_v23 = vadd.f32 %v1953_v39, %v1733_v25  ;;  %v1637_v29 = vpack.c.b16 %v1621_v1, %v1620_v5  ;;  %v3398_v44 = vrot.slane %v3396_v31, 4  ;;  %v2739_v48 = vrot.slane %v2737_v36, 5  ;;  %v4663_v36 = vld [vmem:[#allocation2 + $0x24] sm:$0xe] }
 0x1a3   : > { %v2725_v57 = vrot.slane %v2724_v41, 4  ;;  %v5909_v61 = vrot.slane %v3324_v43, 9  ;;  %v2751_v52 = vshll.u32 %v2673_v37, 16  ;;  %v2755_v0 = vshrl.u32 %v2673_v37, 16 }
 0x1a4   : > { %v7037_v20 = vadd.f32 %v2306_v63, %v1954_v23  ;;  %5696 = vmatmul.msk.bf16.gmra.mxu1 %vm505_vm1, %v1637_v29  ;;  %v2740_v60 = vsel %vm6543_vm9, %v2735_v15, %v2739_v48  ;;  %v2742_v18 = vshrl.u32 %v2672_v59, 16  ;;  %v6039_v5 = vrot.slane %v4662_v8, 9  ;;  %v7071_v23 = vld [vmem:[#allocation2 + $0x28] sm:$0xf] }
 0x1a5   : > { %5925 = vmatmul.msk.bf16.vlgmr.msrb.gmra.mxu2 %vm505_vm1, %v3533_v27  ;;  %v2730_v13 = vsel %vm6543_vm9, %v2725_v57, %v7021_v6  ;;  %v3104_v12 = vunpack.c.l.b16 %v2740_v60  ;;  %v3397_v16 = vsel %vm6532_vm8, %v5909_v61, %v3396_v31  ;;  %v4728_v1 = vrot.slane %v7053_v49, 5  ;;  %v7087_v60 = vld [vmem:[#allocation2 + $0x38] sm:$0x1] }
 0x1a6   : > { %v2745_v37 = vshll.u32 %v2672_v59, 16  ;;  %v7066_v25 = vrot.slane %v2751_v52, 5  ;;  %v2757_v63 = vrot.slane %v2755_v0, 4  ;;  %v3103_v21 = vunpack.c.l.b16 %v2730_v13 }
 0x1a7   : > { %v2562_v42 = vpop.f32.mrf.mxu0  ;;  %v3503_v22 = vunpack.c.l.b16 %v3397_v16  ;;  %v4729_v29 = vsel %vm6532_vm8, %v6039_v5, %v4728_v1  ;;  %v4730_v31 = vrot.slane %v4728_v1, 4  ;;  %v4731_v27 = vrot.slane %v7062_v19, 5 }
 0x1a8   : > { %v7045_v46 = vadd.f32 %v2562_v42, %v6836_v55  ;;  %v1958_v56 = vpop.f32.mrf.mxu2  ;;  %v3400_v55 = vsel %vm6532_vm8, %v3398_v44, %v3399_v33  ;;  %v3135_v42 = vpack.c.b16 %v3104_v12, %v3103_v21  ;;  %v2744_v43 = vrot.slane %v2742_v18, 4  ;;  %v7078_v44 = vld [vmem:[#allocation2 + $0x2c] sm:$0x1] }
 0x1a9   : > { %v1735_v50 = vpop.f32.mrf.mxu1  ;;  %v3504_v17 = vunpack.c.l.b16 %v3400_v55  ;;  %v2747_v48 = vrot.slane %v2745_v37, 5  ;;  %v4840_v33 = vunpack.c.l.b16 %v4729_v29  ;;  %v6040_v61 = vrot.slane %v4663_v36, 9  ;;  %v7104_v37 = vld [vmem:[#allocation2 + $0x2c] sm:$0x1] }
 0x1aa   : > { %v2308_v53 = vpop.f32.mrf.mxu3  ;;  %v1956_v39 = vadd.f32 %v1955_v9, %v1735_v50  ;;  %5884 = vmatmul.msk.bf16.gmra.mxu0 %vm505_vm1, %v6151_v47  ;;  %v7080_v47 = vld [vmem:[#allocation2 + $0x34] sm:$0xf]  ;;  %v2758_v50 = vor.u32 %v2757_v63, %v7066_v25  ;;  %v4735_v59 = vrot.slane %v7075_v4, 5  ;;  %v2761_v55 = vshll.u32 %v7042_v24, 16 }
 0x1ab   : > { %v3403_v52 = vrot.slane %v7071_v23, 5  ;;  %v4738_v0 = vrot.slane %v7078_v44, 5  ;;  %v4742_v8 = vrot.slane %v7080_v47, 5  ;;  %v2748_v18 = vor.u32 %v2747_v48, %v2744_v43 }
 0x1ac   : > { %v7055_v10 = vadd.f32 %v2308_v53, %v1956_v39  ;;  %v4732_v53 = vsel %vm6532_vm8, %v4730_v31, %v4731_v27  ;;  %v4664_v39 = vld [vmem:[#allocation2 + $0x30] sm:$0xe]  ;;  %v4736_v13 = vsel %vm6532_vm8, %v6040_v61, %v4735_v59  ;;  %v4737_v12 = vrot.slane %v4735_v59, 4  ;;  %v3325_v31 = vld [vmem:[#allocation2 + $0x24] sm:$0xe] }
 0x1ad   : > { %v6041_v16 = vrot.slane %v4664_v39, 9  ;;  %v2759_v5 = vrot.slane %v2758_v50, 4  ;;  %v4745_v24 = vrot.slane %v7087_v60, 5  ;;  %v3405_v27 = vrot.slane %v3403_v52, 4 }
 0x1ae   : > { %v4739_v63 = vsel %vm6532_vm8, %v4737_v12, %v4738_v0  ;;  %v4842_v36 = vunpack.c.l.b16 %v4736_v13  ;;  %v2775_v43 = vshll.u32 %v7071_v23, 16  ;;  %v2779_v48 = vshrl.u32 %v7071_v23, 16  ;;  %v6159_v0 = vld [vmem:[#allocation2 + $0x24] sm:$0xff] }
 0x1af   : > { %6006 = vmatmul.msk.bf16.vlgmr.msrb.gmra.mxu3 %vm505_vm1, %v6158_v3  ;;  %v2564_v58 = vpop.f32.mrf.mxu0  ;;  %v4743_v21 = vsel %vm6532_vm8, %v6041_v16, %v4742_v8 }
 0x1b0   : > { %v7069_v6 = vadd.f32 %v2564_v58, %v6850_v38  ;;  %v1960_v15 = vpop.f32.mrf.mxu2  ;;  %v3534_v38 = vpack.c.b16 %v3504_v17, %v3503_v22  ;;  %v6152_v58 = vld [vmem:[#allocation2 + $0x84] sm:$0xff]  ;;  %v4744_v22 = vrot.slane %v4742_v8, 4  ;;  %v4844_v39 = vunpack.c.l.b16 %v4743_v21 }
 0x1b1   : > { %v1738_v9 = vpop.f32.mrf.mxu1 }
 0x1b2   : > { %v2311_v30 = vpop.f32.mrf.mxu3  ;;  %v1959_v41 = vadd.f32 %v1958_v56, %v1738_v9  ;;  %v4841_v56 = vunpack.c.l.b16 %v4732_v53  ;;  %v4746_v50 = vsel %vm6532_vm8, %v4744_v22, %v4745_v24  ;;  %v3406_v53 = vrot.slane %v7104_v37, 5 }
 0x1b3   : > { %v2781_v24 = vrot.slane %v2779_v48, 4  ;;  %v4665_v48 = vld [vmem:[#allocation2 + $0x3c] sm:$0xe] }
 0x1b4   : > { %v7085_v57 = vadd.f32 %v2311_v30, %v1959_v41  ;;  %5892 = vmatmul.msk.bf16.vlgmr.msrb.gmra.mxu1 %vm505_vm1, %v3135_v42  ;;  %v7096_v3 = vpack.c.b16 %v4841_v56, %v4840_v33  ;;  %v2763_v30 = vrot.slane %v2761_v55, 5  ;;  %v4843_v41 = vunpack.c.l.b16 %v4739_v63 }
 0x1b5   : > { %5926 = vmatmul.msk.bf16.gmra.mxu2 %vm505_vm1, %v3534_v38  ;;  %v2675_v38 = vld [vmem:[#allocation2 + $0x24] sm:$0xf]  ;;  %v4845_v56 = vunpack.c.l.b16 %v4746_v50  ;;  %v5910_v55 = vrot.slane %v3325_v31, 9  ;;  %v3407_v23 = vsel %vm6532_vm8, %v3405_v27, %v3406_v53 }
 0x1b6   : > { %8383 = vst [vmem:[#allocation6_spill] sm:$0xff] %v7096_v3  ;;  %v7116_v33 = vpack.c.b16 %v4843_v41, %v4842_v36  ;;  %v2764_v59 = vsel %vm6543_vm9, %v2759_v5, %v2763_v30  ;;  %v2766_v8 = vshrl.u32 %v2675_v38, 16  ;;  %v2769_v13 = vshll.u32 %v2675_v38, 16  ;;  %v2679_v41 = vld [vmem:[#allocation2 + $0x34] sm:$0xf] }
 0x1b7   : > { %v2567_v17 = vpop.f32.mrf.mxu0  ;;  %v7124_v12 = vpack.c.b16 %v4845_v56, %v4844_v39  ;;  %v3106_v5 = vunpack.c.l.b16 %v2764_v59  ;;  %v3506_v21 = vunpack.c.l.b16 %v3407_v23  ;;  %v3410_v39 = vrot.slane %v2679_v41, 5  ;;  %v7144_v56 = vld [vmem:[#allocation2 + $0x44] sm:$0x1]  ;;  %v7148_v23 = vld [vmem:[#allocation2 + $0x38] sm:$0x1] }
 0x1b8   : > { %v7102_v1 = vadd.f32 %v2567_v17, %v6861_v7  ;;  %v1963_v7 = vpop.f32.mrf.mxu2  ;;  %8384 = vst [vmem:[#allocation7_spill] sm:$0xff] %v7116_v33  ;;  %v7129_v17 = vrot.slane %v2775_v43, 5  ;;  %v2771_v30 = vrot.slane %v2769_v13, 5 }
 0x1b9   : > { %v1740_v29 = vpop.f32.mrf.mxu1  ;;  %8385 = vst [vmem:[#allocation8_spill] sm:$0xff] %v7124_v12 }
 0x1ba   : > { %v2313_v9 = vpop.f32.mrf.mxu3  ;;  %v1961_v42 = vadd.f32 %v1960_v15, %v1740_v29  ;;  %5885 = vmatmul.msk.bf16.gmra.mxu0 %vm505_vm1, %v6152_v58  ;;  %v2749_v15 = vrot.slane %v2748_v18, 4  ;;  %v3404_v58 = vsel %vm6532_vm8, %v5910_v55, %v3403_v52  ;;  %v2782_v36 = vor.u32 %v2781_v24, %v7129_v17 }
 0x1bb   : > { %v3505_v27 = vunpack.c.l.b16 %v3404_v58  ;;  %v2785_v52 = vshll.u32 %v7104_v37, 16  ;;  %v6042_v55 = vrot.slane %v4665_v48, 9  ;;  %v4752_v24 = vrot.slane %v7144_v56, 5  ;;  %v3326_v58 = vld [vmem:[#allocation2 + $0x30] sm:$0xe] }
 0x1bc   : > { %v7118_v61 = vadd.f32 %v2313_v9, %v1961_v42  ;;  %v2754_v16 = vsel %vm6543_vm9, %v2749_v15, %v7066_v25  ;;  %v2768_v9 = vrot.slane %v2766_v8, 4  ;;  %v7138_v42 = vld [vmem:[#allocation2 + $0x40] sm:$0xf]  ;;  %v2783_v59 = vrot.slane %v2782_v36, 4  ;;  %v6153_v8 = vld [vmem:[#allocation2 + $0x90] sm:$0xff] }
 0x1bd   : > { %v3105_v29 = vunpack.c.l.b16 %v2754_v16  ;;  %v4749_v15 = vrot.slane %v7138_v42, 5  ;;  %v2803_v36 = vshrl.u32 %v2679_v41, 16  ;;  %v2678_v48 = vld [vmem:[#allocation2 + $0x30] sm:$0xf] }
 0x1be   : > { %v2772_v53 = vor.u32 %v2771_v30, %v2768_v9  ;;  %v2799_v30 = vshll.u32 %v2679_v41, 16 }
 0x1bf   : > { %6007 = vmatmul.msk.bf16.gmra.mxu3 %vm505_vm1, %v6159_v0  ;;  %v2569_v18 = vpop.f32.mrf.mxu0  ;;  %v3136_v43 = vpack.c.b16 %v3106_v5, %v3105_v29  ;;  %v2787_v0 = vrot.slane %v2785_v52, 5  ;;  %v4750_v13 = vsel %vm6532_vm8, %v6042_v55, %v4749_v15  ;;  %v4751_v16 = vrot.slane %v4749_v15, 4 }
 0x1c0   : > { %v7135_v63 = vadd.f32 %v2569_v18, %v6875_v54  ;;  %v1965_v25 = vpop.f32.mrf.mxu2  ;;  %v3535_v54 = vpack.c.b16 %v3506_v21, %v3505_v27  ;;  %v2773_v5 = vrot.slane %v2772_v53, 4  ;;  %v3412_v21 = vrot.slane %v3410_v39, 4  ;;  %v6160_v53 = vld [vmem:[#allocation2 + $0x30] sm:$0xff] }
 0x1c1   : > { %v1743_v31 = vpop.f32.mrf.mxu1  ;;  %v2788_v9 = vsel %vm6543_vm9, %v2783_v59, %v2787_v0  ;;  %v5911_v52 = vrot.slane %v3326_v58, 9  ;;  %v2790_v0 = vshrl.u32 %v2678_v48, 16 }
 0x1c2   : > { %v2316_v22 = vpop.f32.mrf.mxu3  ;;  %v1964_v38 = vadd.f32 %v1963_v7, %v1743_v31  ;;  %v4753_v31 = vsel %vm6532_vm8, %v4751_v16, %v4752_v24  ;;  %v2778_v15 = vsel %vm6543_vm9, %v2773_v5, %v7129_v17  ;;  %v2805_v16 = vrot.slane %v2803_v36, 4 }
 0x1c3   : > { %v3107_v17 = vunpack.c.l.b16 %v2778_v15  ;;  %v2809_v15 = vshll.u32 %v7148_v23, 16 }
 0x1c4   : > { %v7141_v50 = vadd.f32 %v2316_v22, %v1964_v38  ;;  %5893 = vmatmul.msk.bf16.gmra.mxu1 %vm505_vm1, %v3136_v43  ;;  %v4846_v38 = vunpack.c.l.b16 %v4750_v13  ;;  %v4847_v43 = vunpack.c.l.b16 %v4753_v31  ;;  %v7174_v13 = vrot.slane %v2799_v30, 5 }
 0x1c5   : > { %5927 = vmatmul.msk.bf16.gmra.mxu2 %vm505_vm1, %v3535_v54 }
 0x1c6   : > { %v7169_v55 = vpack.c.b16 %v4847_v43, %v4846_v38  ;;  %v2806_v30 = vor.u32 %v2805_v16, %v7174_v13  ;;  %v4666_v43 = vld [vmem:[#allocation2 + $0x48] sm:$0xe]  ;;  %v6154_v16 = vld [vmem:[#allocation2 + $0x9c] sm:$0xff] }
 0x1c7   : > { %v2572_v7 = vpop.f32.mrf.mxu0 }
 0x1c8   : > { %v7151_v37 = vadd.f32 %v2572_v7, %v6886_v26  ;;  %v1968_v29 = vpop.f32.mrf.mxu2  ;;  %v3413_v26 = vrot.slane %v7148_v23, 5  ;;  %8387 = vst [vmem:[#allocation10_spill] sm:$0xff] %v7169_v55  ;;  %v3108_v7 = vunpack.c.l.b16 %v2788_v9  ;;  %v2682_v9 = vld [vmem:[#allocation2 + $0x40] sm:$0xf]  ;;  %v2811_v23 = vrot.slane %v2809_v15, 5 }
 0x1c9   : > { %v1745_v22 = vpop.f32.mrf.mxu1  ;;  %v2823_v55 = vshll.u32 %v2682_v9, 16  ;;  %v2827_v12 = vshrl.u32 %v2682_v9, 16  ;;  %v6161_v15 = vld [vmem:[#allocation2 + $0x3c] sm:$0xff] }
 0x1ca   : > { %8386 = vst [vmem:[#allocation9_spill] sm:$0xff] %v7151_v37  ;;  %v2318_v18 = vpop.f32.mrf.mxu3  ;;  %5886 = vmatmul.msk.bf16.gmra.mxu0 %vm505_vm1, %v6153_v8  ;;  %v1966_v27 = vadd.f32 %v1965_v25, %v1745_v22  ;;  %v3414_v59 = vsel %vm6532_vm8, %v3412_v21, %v3413_v26  ;;  %v3411_v25 = vsel %vm6532_vm8, %v5911_v52, %v3410_v39  ;;  %v2793_v8 = vshll.u32 %v2678_v48, 16  ;;  %v7179_v26 = vld [vmem:[#allocation2 + $0x4c] sm:$0xf]  ;;  %v4022_v48 = vld [vmem:[#allocation2 + $0x50] sm:$0x1] }
 0x1cb   : > { %v3137_v21 = vpack.c.b16 %v3108_v7, %v3107_v17  ;;  %v3507_v22 = vunpack.c.l.b16 %v3411_v25  ;;  %v2807_v25 = vrot.slane %v2806_v30, 4 }
 0x1cc   : > { %v7162_v54 = vadd.f32 %v2318_v18, %v1966_v27  ;;  %v3508_v18 = vunpack.c.l.b16 %v3414_v59  ;;  %v2792_v27 = vrot.slane %v2790_v0, 4  ;;  %v2795_v38 = vrot.slane %v2793_v8, 5  ;;  %v2681_v0 = vld [vmem:[#allocation2 + $0x3c] sm:$0xf] }
 0x1ce   : > { %v3536_v36 = vpack.c.b16 %v3508_v18, %v3507_v22  ;;  %v2796_v7 = vor.u32 %v2795_v38, %v2792_v27  ;;  %v2814_v38 = vshrl.u32 %v2681_v0, 16 }
 0x1cf   : > { %6008 = vmatmul.msk.bf16.gmra.mxu3 %vm505_vm1, %v6160_v53  ;;  %v2574_v41 = vpop.f32.mrf.mxu0  ;;  %v4756_v53 = vrot.slane %v7179_v26, 5 }
 0x1d0   : > { %v7177_v24 = vadd.f32 %v2574_v41, %v6900_v11  ;;  %v1970_v31 = vpop.f32.mrf.mxu2  ;;  %v3417_v11 = vrot.slane %v2682_v9, 5  ;;  %v7188_v41 = vld [vmem:[#allocation2 + $0x44] sm:$0x1] }
 0x1d1   : > { %v1748_v5 = vpop.f32.mrf.mxu1  ;;  %v4758_v18 = vrot.slane %v4756_v53, 4  ;;  %v3420_v27 = vrot.slane %v7188_v41, 5 }
 0x1d2   : > { %8388 = vst [vmem:[#allocation11_spill] sm:$0xff] %v7177_v24  ;;  %v2321_v58 = vpop.f32.mrf.mxu3  ;;  %v1969_v39 = vadd.f32 %v1968_v29, %v1748_v5  ;;  %v6043_v29 = vrot.slane %v4666_v43, 9  ;;  %v4759_v5 = vrot.slane %v4022_v48, 5  ;;  %v2812_v48 = vsel %vm6543_vm9, %v2807_v25, %v2811_v23  ;;  %v2685_v23 = vld [vmem:[#allocation2 + $0x4c] sm:$0xf] }
 0x1d3   : > { %v2816_v25 = vrot.slane %v2814_v38, 4  ;;  %v3424_v38 = vrot.slane %v2685_v23, 5 }
 0x1d4   : > { %v7182_v52 = vadd.f32 %v2321_v58, %v1969_v39  ;;  %5894 = vmatmul.msk.bf16.gmra.mxu1 %vm505_vm1, %v3137_v21  ;;  %v4757_v17 = vsel %vm6532_vm8, %v6043_v29, %v4756_v53  ;;  %v3419_v58 = vrot.slane %v3417_v11, 4  ;;  %v3327_v39 = vld [vmem:[#allocation2 + $0x3c] sm:$0xe]  ;;  %v2797_v53 = vrot.slane %v2796_v7, 4 }
 0x1d5   : > { %5928 = vmatmul.msk.bf16.gmra.mxu2 %vm505_vm1, %v3536_v36  ;;  %v2817_v36 = vshll.u32 %v2681_v0, 16  ;;  %v5912_v33 = vrot.slane %v3327_v39, 9  ;;  %v3110_v0 = vunpack.c.l.b16 %v2812_v48  ;;  %v7224_v48 = vld [vmem:[#allocation2 + $0x50] sm:$0x1] }
 0x1d6   : > { %v3421_v3 = vsel %vm6532_vm8, %v3419_v58, %v3420_v27  ;;  %v2825_v58 = vrot.slane %v2823_v55, 5 }
 0x1d7   : > { %v2577_v59 = vpop.f32.mrf.mxu0  ;;  %v3418_v9 = vsel %vm6532_vm8, %v5912_v33, %v3417_v11 }
 0x1d8   : > { %v7191_v8 = vadd.f32 %v2577_v59, %v6911_v51  ;;  %v4760_v51 = vsel %vm6532_vm8, %v4758_v18, %v4759_v5  ;;  %v1973_v43 = vpop.f32.mrf.mxu2  ;;  %v4848_v59 = vunpack.c.l.b16 %v4757_v17  ;;  %v2819_v17 = vrot.slane %v2817_v36, 5 }
 0x1d9   : > { %v1750_v21 = vpop.f32.mrf.mxu1  ;;  %v4849_v29 = vunpack.c.l.b16 %v4760_v51  ;;  %v3510_v5 = vunpack.c.l.b16 %v3421_v3  ;;  %v2684_v3 = vld [vmem:[#allocation2 + $0x48] sm:$0xf] }
 0x1da   : > { %8389 = vst [vmem:[#allocation12_spill] sm:$0xff] %v7191_v8  ;;  %v2323_v22 = vpop.f32.mrf.mxu3  ;;  %5887 = vmatmul.msk.bf16.gmra.mxu0 %vm505_vm1, %v6154_v16  ;;  %v1971_v30 = vadd.f32 %v1970_v31, %v1750_v21  ;;  %v2802_v31 = vsel %vm6543_vm9, %v2797_v53, %v7174_v13  ;;  %v2829_v21 = vrot.slane %v2827_v12, 4  ;;  %v3509_v13 = vunpack.c.l.b16 %v3418_v9  ;;  %v7216_v53 = vld [vmem:[#allocation2 + $0x58] sm:$0xf] }
 0x1db   : > { %v7205_v8 = vpack.c.b16 %v4849_v29, %v4848_v59  ;;  %v2820_v29 = vor.u32 %v2819_v17, %v2816_v25  ;;  %v4763_v12 = vrot.slane %v7216_v53, 5  ;;  %v3426_v9 = vrot.slane %v3424_v38, 4  ;;  %v4667_v25 = vld [vmem:[#allocation2 + $0x54] sm:$0xe] }
 0x1dc   : > { %v7201_v16 = vadd.f32 %v2323_v22, %v1971_v30  ;;  %v3109_v22 = vunpack.c.l.b16 %v2802_v31  ;;  %v3537_v33 = vpack.c.b16 %v3510_v5, %v3509_v13  ;;  %v2830_v11 = vor.u32 %v2829_v21, %v2825_v58 }
 0x1dd   : > { %8390 = vst [vmem:[#allocation13_spill] sm:$0xff] %v7205_v8  ;;  %v2847_v5 = vshll.u32 %v2685_v23, 16  ;;  %v2851_v21 = vshrl.u32 %v2685_v23, 16  ;;  %v3427_v13 = vrot.slane %v7224_v48, 5  ;;  %v6162_v8 = vld [vmem:[#allocation2 + $0x48] sm:$0xff] }
 0x1de   : > { %v3138_v59 = vpack.c.b16 %v3110_v0, %v3109_v22  ;;  %v2831_v0 = vrot.slane %v2830_v11, 4  ;;  %v2841_v11 = vshll.u32 %v2684_v3, 16 }
 0x1df   : > { %6009 = vmatmul.msk.bf16.gmra.mxu3 %vm505_vm1, %v6161_v15  ;;  %v2579_v7 = vpop.f32.mrf.mxu0  ;;  %v7226_v15 = vld [vmem:[#allocation2 + $0x5c] sm:$0x1]  ;;  %v3428_v23 = vsel %vm6532_vm8, %v3426_v9, %v3427_v13 }
 0x1e0   : > { %v7214_v18 = vadd.f32 %v2579_v7, %v6925_v40  ;;  %v1975_v30 = vpop.f32.mrf.mxu2  ;;  %v2833_v40 = vshll.u32 %v7188_v41, 16  ;;  %v6155_v7 = vld [vmem:[#allocation2 + $0xa8] sm:$0xff]  ;;  %v3512_v13 = vunpack.c.l.b16 %v3428_v23 }
 0x1e1   : > { %v1753_v39 = vpop.f32.mrf.mxu1  ;;  %v3328_v41 = vld [vmem:[#allocation2 + $0x48] sm:$0xe] }
 0x1e2   : > { %8391 = vst [vmem:[#allocation14_spill] sm:$0xff] %v7214_v18  ;;  %v2326_v27 = vpop.f32.mrf.mxu3  ;;  %v1974_v51 = vadd.f32 %v1973_v43, %v1753_v39  ;;  %v2821_v43 = vrot.slane %v2820_v29, 4 }
 0x1e4   : > { %v7218_v36 = vadd.f32 %v2326_v27, %v1974_v51  ;;  %5895 = vmatmul.msk.bf16.gmra.mxu1 %vm505_vm1, %v3138_v59  ;;  %v2826_v17 = vsel %vm6543_vm9, %v2821_v43, %v2825_v58  ;;  %v2835_v27 = vrot.slane %v2833_v40, 5  ;;  %v4765_v51 = vrot.slane %v4763_v12, 4 }
 0x1e5   : > { %5929 = vmatmul.msk.bf16.gmra.mxu2 %vm505_vm1, %v3537_v33  ;;  %v2838_v33 = vshrl.u32 %v2684_v3, 16  ;;  %v5913_v43 = vrot.slane %v3328_v41, 9  ;;  %v2687_v41 = vld [vmem:[#allocation2 + $0x54] sm:$0xf] }
 0x1e6   : > { %v2836_v58 = vsel %vm6543_vm9, %v2831_v0, %v2835_v27 }
 0x1e7   : > { %v2582_v55 = vpop.f32.mrf.mxu0  ;;  %v3425_v0 = vsel %vm6532_vm8, %v5913_v43, %v3424_v38  ;;  %v2865_v43 = vshll.u32 %v2687_v41, 16 }
 0x1e8   : > { %v7229_v31 = vadd.f32 %v2582_v55, %v6938_v14  ;;  %v4766_v14 = vrot.slane %v7226_v15, 5  ;;  %v1978_v29 = vpop.f32.mrf.mxu2  ;;  %v6044_v55 = vrot.slane %v4667_v25, 9  ;;  %v3111_v25 = vunpack.c.l.b16 %v2826_v17 }
 0x1e9   : > { %v1755_v22 = vpop.f32.mrf.mxu1 }
 0x1ea   : > { %8392 = vst [vmem:[#allocation15_spill] sm:$0xff] %v7229_v31  ;;  %v2328_v39 = vpop.f32.mrf.mxu3  ;;  %5888 = vmatmul.msk.bf16.gmra.mxu0 %vm505_vm1, %v6155_v7  ;;  %v1976_v59 = vadd.f32 %v1975_v30, %v1755_v22  ;;  %v4767_v40 = vsel %vm6532_vm8, %v4765_v51, %v4766_v14  ;;  %v7244_v31 = vrot.slane %v2847_v5, 5  ;;  %v2853_v30 = vrot.slane %v2851_v21, 4  ;;  %v7246_v22 = vld [vmem:[#allocation2 + $0x58] sm:$0xf] }
 0x1eb   : > { %v4764_v3 = vsel %vm6532_vm8, %v6044_v55, %v4763_v12  ;;  %v4851_v9 = vunpack.c.l.b16 %v4767_v40  ;;  %v2840_v51 = vrot.slane %v2838_v33, 4  ;;  %v2843_v5 = vrot.slane %v2841_v11, 5 }
 0x1ec   : > { %v7242_v7 = vadd.f32 %v2328_v39, %v1976_v59  ;;  %v3112_v39 = vunpack.c.l.b16 %v2836_v58  ;;  %v2871_v14 = vshll.u32 %v7246_v22, 16  ;;  %v2875_v12 = vshrl.u32 %v7246_v22, 16 }
 0x1ed   : > { %v4850_v17 = vunpack.c.l.b16 %v4764_v3  ;;  %v3511_v59 = vunpack.c.l.b16 %v3425_v0  ;;  %v2854_v38 = vor.u32 %v2853_v30, %v7244_v31  ;;  %v2862_v55 = vshrl.u32 %v2687_v41, 16 }
 0x1ee   : > { %v3139_v11 = vpack.c.b16 %v3112_v39, %v3111_v25  ;;  %v7263_v24 = vrot.slane %v2871_v14, 5  ;;  %v2877_v3 = vrot.slane %v2875_v12, 4  ;;  %v2689_v39 = vld [vmem:[#allocation2 + $0x5c] sm:$0x1] }
 0x1ef   : > { %6010 = vmatmul.msk.bf16.gmra.mxu3 %vm505_vm1, %v6162_v8  ;;  %v2584_v27 = vpop.f32.mrf.mxu0  ;;  %v7259_v18 = vpack.c.b16 %v4851_v9, %v4850_v17  ;;  %v3538_v23 = vpack.c.b16 %v3512_v13, %v3511_v59  ;;  %v2855_v30 = vrot.slane %v2854_v38, 4  ;;  %v2864_v41 = vrot.slane %v2862_v55, 4  ;;  %v3329_v13 = vld [vmem:[#allocation2 + $0x54] sm:$0xe] }
 0x1f0   : > { %v7254_v21 = vadd.f32 %v2584_v27, %v6953_v2  ;;  %v1980_v33 = vpop.f32.mrf.mxu2  ;;  %v2857_v2 = vshll.u32 %v7224_v48, 16  ;;  %v2844_v27 = vor.u32 %v2843_v5, %v2840_v51  ;;  %v2867_v9 = vrot.slane %v2865_v43, 5 }
 0x1f1   : > { %v1758_v40 = vpop.f32.mrf.mxu1  ;;  %8394 = vst [vmem:[#allocation17_spill] sm:$0xff] %v7259_v18  ;;  %v2878_v5 = vor.u32 %v2877_v3, %v7263_v24  ;;  %v5914_v55 = vrot.slane %v3329_v13, 9  ;;  %v3434_v43 = vrot.slane %v2689_v39, 5 }
 0x1f2   : > { %8393 = vst [vmem:[#allocation16_spill] sm:$0xff] %v7254_v21  ;;  %v2331_v8 = vpop.f32.mrf.mxu3  ;;  %v1979_v58 = vadd.f32 %v1978_v29, %v1758_v40  ;;  %v3431_v21 = vrot.slane %v7246_v22, 5  ;;  %v2859_v25 = vrot.slane %v2857_v2, 5  ;;  %v6156_v22 = vld [vmem:[#allocation2 + $0xb4] sm:$0xff]  ;;  %v2845_v14 = vrot.slane %v2844_v27, 4 }
 0x1f3   : > { %v2868_v17 = vor.u32 %v2867_v9, %v2864_v41  ;;  %v2881_v40 = vshll.u32 %v2689_v39, 16  ;;  %v6163_v9 = vld [vmem:[#allocation2 + $0x54] sm:$0xff] }
 0x1f4   : > { %v7265_v0 = vadd.f32 %v2331_v8, %v1979_v58  ;;  %5896 = vmatmul.msk.bf16.gmra.mxu1 %vm505_vm1, %v3139_v11  ;;  %v3433_v51 = vrot.slane %v3431_v21, 4  ;;  %v2860_v12 = vsel %vm6543_vm9, %v2855_v30, %v2859_v25  ;;  %v4008_v11 = vld [vmem:[#allocation2 + $0x18] sm:$0xf]  ;;  %v3432_v27 = vsel %vm6532_vm8, %v5914_v55, %v3431_v21 }
 0x1f5   : > { %5930 = vmatmul.msk.bf16.gmra.mxu2 %vm505_vm1, %v3538_v23  ;;  %v7279_v23 = vld [vmem:[#allocation2 + $0x64] sm:$0xf]  ;;  %v3114_v2 = vunpack.c.l.b16 %v2860_v12  ;;  %v2879_v30 = vrot.slane %v2878_v5, 4  ;;  %v4066_v25 = vshll.u32 %v7053_v49, 16  ;;  %v2883_v39 = vrot.slane %v2881_v40, 5 }
 0x1f6   : > { %v3435_v3 = vsel %vm6532_vm8, %v3433_v51, %v3434_v43  ;;  %v4057_v13 = vshrl.u32 %v4008_v11, 16  ;;  %v7293_v12 = vld [vmem:[#allocation2 + $0x68] sm:$0x1]  ;;  %v3513_v43 = vunpack.c.l.b16 %v3432_v27  ;;  %v3330_v40 = vld [vmem:[#allocation2 + $0x60] sm:$0xe] }
 0x1f7   : > { %v2587_v29 = vpop.f32.mrf.mxu0  ;;  %v3514_v5 = vunpack.c.l.b16 %v3435_v3  ;;  %v5915_v27 = vrot.slane %v3330_v40, 9 }
 0x1f8   : > { %v7270_v48 = vadd.f32 %v2587_v29, %v6985_v62  ;;  %v1983_v58 = vpop.f32.mrf.mxu2  ;;  %v2850_v62 = vsel %vm6543_vm9, %v2845_v14, %v7244_v31  ;;  %v7287_v29 = vld [vmem:[#allocation2 + $0x64] sm:$0xf]  ;;  %v4070_v31 = vshrl.u32 %v7053_v49, 16  ;;  %v4770_v14 = vrot.slane %v7279_v23, 5 }
 0x1f9   : > { %v1760_v59 = vpop.f32.mrf.mxu1  ;;  %v3113_v51 = vunpack.c.l.b16 %v2850_v62  ;;  %v2884_v49 = vsel %vm6543_vm9, %v2879_v30, %v2883_v39 }
 0x1fa   : > { %8395 = vst [vmem:[#allocation18_spill] sm:$0xff] %v7270_v48  ;;  %v2333_v38 = vpop.f32.mrf.mxu3  ;;  %5889 = vmatmul.msk.bf16.gmra.mxu0 %vm505_vm1, %v6156_v22  ;;  %v1981_v8 = vadd.f32 %v1980_v33, %v1760_v59  ;;  %v2869_v33 = vrot.slane %v2868_v17, 4  ;;  %v4060_v22 = vshll.u32 %v4008_v11, 16  ;;  %v4072_v62 = vrot.slane %v4070_v31, 4 }
 0x1fb   : > { %v3140_v55 = vpack.c.b16 %v3114_v2, %v3113_v51  ;;  %v4772_v18 = vrot.slane %v4770_v14, 4  ;;  %v3539_v48 = vpack.c.b16 %v3514_v5, %v3513_v43  ;;  %v7309_v39 = vunpack.c.l.b16 %v2884_v49  ;;  %v7311_v2 = vld [vmem:[#allocation2 + $0x68] sm:$0x1]  ;;  %v4668_v51 = vld [vmem:[#allocation2 + $0x60] sm:$0xe] }
 0x1fc   : > { %v7285_v41 = vadd.f32 %v2333_v38, %v1981_v8  ;;  %v2874_v59 = vsel %vm6543_vm9, %v2869_v33, %v7263_v24  ;;  %v3438_v38 = vrot.slane %v7287_v29, 5  ;;  %v7304_v8 = vrot.slane %v4066_v25, 5  ;;  %v6157_v49 = vld [vmem:[#allocation2 + $0xc0] sm:$0xff] }
 0x1fd   : > { %v7307_v30 = vunpack.c.l.b16 %v2874_v59  ;;  %v4076_v31 = vshll.u32 %v7062_v19, 16  ;;  %v3441_v43 = vrot.slane %v7311_v2, 5  ;;  %v4090_v19 = vshll.u32 %v7075_v4, 16 }
 0x1fe   : > { %8396 = vst [vmem:[#allocation19_spill] sm:$0xff] %v7285_v41  ;;  %v3440_v25 = vrot.slane %v3438_v38, 4 }
 0x1ff   : > { %6011 = vmatmul.msk.bf16.gmra.mxu3 %vm505_vm1, %v6163_v9  ;;  %v2589_v21 = vpop.f32.mrf.mxu0  ;;  %v4059_v9 = vrot.slane %v4057_v13, 4 }
 0x200   : > { %v7296_v17 = vadd.f32 %v2589_v21, %v7012_v34  ;;  %v4062_v34 = vrot.slane %v4060_v22, 5  ;;  %v4011_v21 = vld [vmem:[#allocation2 + $0x24] sm:$0xf]  ;;  %v1985_v33 = vpop.f32.mrf.mxu2 }
 0x201   : > { %v1763_v11 = vpop.f32.mrf.mxu1  ;;  %v4081_v5 = vshrl.u32 %v4011_v21, 16  ;;  %v4084_v59 = vshll.u32 %v4011_v21, 16 }
 0x202   : > { %8397 = vst [vmem:[#allocation20_spill] sm:$0xff] %v7296_v17  ;;  %v2336_v3 = vpop.f32.mrf.mxu3  ;;  %v4773_v17 = vrot.slane %v7293_v12, 5  ;;  %v1984_v24 = vadd.f32 %v1983_v58, %v1763_v11  ;;  %v4073_v58 = vor.u32 %v4072_v62, %v7304_v8  ;;  %v4063_v40 = vor.u32 %v4062_v34, %v4059_v9 }
 0x203   : > { %v4094_v11 = vshrl.u32 %v7075_v4, 16  ;;  %v3439_v62 = vsel %vm6532_vm8, %v5915_v27, %v3438_v38  ;;  %v4083_v34 = vrot.slane %v4081_v5, 4  ;;  %v4086_v21 = vrot.slane %v4084_v59, 5  ;;  %v7340_v59 = vld [vmem:[#allocation2 + $0x70] sm:$0xf] }
 0x204   : > { %v4774_v13 = vsel %vm6532_vm8, %v4772_v18, %v4773_v17  ;;  %v7316_v22 = vadd.f32 %v2336_v3, %v1984_v24  ;;  %5897 = vmatmul.msk.bf16.gmra.mxu1 %vm505_vm1, %v3140_v55  ;;  %v6045_v17 = vrot.slane %v4668_v51, 9  ;;  %v4078_v3 = vrot.slane %v4076_v31, 5  ;;  %v4014_v24 = vld [vmem:[#allocation2 + $0x30] sm:$0xf]  ;;  %v2690_v31 = vld [vmem:[#allocation2 + $0x60] sm:$0xf] }
 0x205   : > { %5931 = vmatmul.msk.bf16.gmra.mxu2 %vm505_vm1, %v3539_v48  ;;  %v3442_v48 = vsel %vm6532_vm8, %v3440_v25, %v3441_v43  ;;  %v4074_v9 = vrot.slane %v4073_v58, 4  ;;  %v4096_v51 = vrot.slane %v4094_v11, 4  ;;  %v4853_v38 = vunpack.c.l.b16 %v4774_v13 }
 0x206   : > { %8398 = vst [vmem:[#allocation21_spill] sm:$0xff] %v7316_v22  ;;  %v4771_v4 = vsel %vm6532_vm8, %v6045_v17, %v4770_v14  ;;  %v3516_v25 = vunpack.c.l.b16 %v3442_v48  ;;  %v2895_v58 = vshll.u32 %v7287_v29, 16  ;;  %v2899_v5 = vshrl.u32 %v7287_v29, 16 }
 0x207   : > { %v2592_v37 = vpop.f32.mrf.mxu0  ;;  %v3515_v14 = vunpack.c.l.b16 %v3439_v62  ;;  %v4105_v43 = vshrl.u32 %v4014_v24, 16  ;;  %v4108_v17 = vshll.u32 %v4014_v24, 16  ;;  %v4852_v41 = vunpack.c.l.b16 %v4771_v4 }
 0x208   : > { %v7327_v55 = vadd.f32 %v2592_v37, %v7037_v20  ;;  %v4064_v20 = vrot.slane %v4063_v40, 4  ;;  %v7336_v37 = vrot.slane %v4090_v19, 5  ;;  %v6164_v40 = vld [vmem:[#allocation2 + $0x60] sm:$0xff]  ;;  %v4079_v13 = vsel %vm6543_vm9, %v4074_v9, %v4078_v3 }
 0x209   : > { %v1765_v22 = vpop.f32.mrf.mxu1  ;;  %v2886_v19 = vshrl.u32 %v2690_v31, 16  ;;  %v2889_v11 = vshll.u32 %v2690_v31, 16  ;;  %v7349_v29 = vpack.c.b16 %v4853_v38, %v4852_v41  ;;  %v4777_v62 = vrot.slane %v7340_v59, 5  ;;  %v7360_v38 = vld [vmem:[#allocation2 + $0x70] sm:$0xf] }
 0x20a   : > { %8399 = vst [vmem:[#allocation22_spill] sm:$0xff] %v7327_v55  ;;  %v2338_v18 = vpop.f32.mrf.mxu3  ;;  %5890 = vmatmul.msk.bf16.gmra.mxu0 %vm505_vm1, %v6157_v49  ;;  %v1986_v27 = vadd.f32 %v1985_v33, %v1765_v22  ;;  %v1988_v55 = vpop.f32.mrf.mxu2  ;;  %v4069_v33 = vsel %vm6543_vm9, %v4064_v20, %v7304_v8  ;;  %v4087_v22 = vor.u32 %v4086_v21, %v4083_v34  ;;  %v7353_v24 = vrot.slane %v2895_v58, 5  ;;  %v4031_v8 = vld [vmem:[#allocation2 + $0x74] sm:$0x1] }
 0x20b   : > { %8401 = vst [vmem:[#allocation24_spill] sm:$0xff] %v7349_v29  ;;  %v2901_v4 = vrot.slane %v2899_v5, 4  ;;  %v4100_v3 = vshll.u32 %v7078_v44, 16  ;;  %v4107_v9 = vrot.slane %v4105_v43, 4  ;;  %v4110_v41 = vrot.slane %v4108_v17, 5 }
 0x20c   : > { %v7342_v49 = vadd.f32 %v2338_v18, %v1986_v27  ;;  %v3540_v18 = vpack.c.b16 %v3516_v25, %v3515_v14  ;;  %v4097_v27 = vor.u32 %v4096_v51, %v7336_v37  ;;  %v4442_v34 = vunpack.c.l.b16 %v4069_v33 }
 0x20d   : > { %v4443_v21 = vunpack.c.l.b16 %v4079_v13  ;;  %v4088_v31 = vrot.slane %v4087_v22, 4  ;;  %v4114_v25 = vshll.u32 %v7080_v47, 16  ;;  %v2888_v5 = vrot.slane %v2886_v19, 4  ;;  %v4669_v22 = vld [vmem:[#allocation2 + $0x6c] sm:$0xe] }
 0x20e   : > { %8400 = vst [vmem:[#allocation23_spill] sm:$0xff] %v7342_v49  ;;  %v4779_v51 = vrot.slane %v4777_v62, 4  ;;  %v4780_v29 = vrot.slane %v4031_v8, 5  ;;  %v4098_v43 = vrot.slane %v4097_v27, 4  ;;  %v3445_v17 = vrot.slane %v7360_v38, 5 }
 0x20f   : > { %6012 = vmatmul.msk.bf16.gmra.mxu3 %vm505_vm1, %v6164_v40  ;;  %v2594_v48 = vpop.f32.mrf.mxu0  ;;  %v2891_v40 = vrot.slane %v2889_v11, 5  ;;  %v4093_v44 = vsel %vm6543_vm9, %v4088_v31, %v7336_v37  ;;  %v4111_v33 = vor.u32 %v4110_v41, %v4107_v9  ;;  %v4118_v13 = vshrl.u32 %v7080_v47, 16  ;;  %v4017_v41 = vld [vmem:[#allocation2 + $0x3c] sm:$0xf]  ;;  %v7382_v31 = vld [vmem:[#allocation2 + $0x74] sm:$0x1] }
 0x210   : > { %v7357_v20 = vadd.f32 %v2594_v48, %v7055_v10  ;;  %v2902_v48 = vor.u32 %v2901_v4, %v7353_v24  ;;  %v4781_v19 = vsel %vm6532_vm8, %v4779_v51, %v4780_v29  ;;  %v2905_v4 = vshll.u32 %v7311_v2, 16 }
 0x211   : > { %v1768_v58 = vpop.f32.mrf.mxu1  ;;  %v4102_v37 = vrot.slane %v4100_v3, 5  ;;  %v4124_v27 = vshll.u32 %v7087_v60, 16  ;;  %v4474_v8 = vpack.c.b16 %v4443_v21, %v4442_v34  ;;  %v2892_v47 = vor.u32 %v2891_v40, %v2888_v5 }
 0x212   : > { %8402 = vst [vmem:[#allocation25_spill] sm:$0xff] %v7357_v20  ;;  %v2341_v14 = vpop.f32.mrf.mxu3  ;;  %v1989_v49 = vadd.f32 %v1988_v55, %v1768_v58  ;;  %v1990_v10 = vpop.f32.mrf.mxu2  ;;  %v8403_v55 = vpack.c.b16 %v7309_v39, %v7307_v30  ;;  %v7380_v9 = vunpack.c.l.b16 %v4093_v44  ;;  %v7386_v39 = vrot.slane %v4114_v25, 5  ;;  %v3331_v58 = vld [vmem:[#allocation2 + $0x6c] sm:$0xe] }
 0x213   : > { %v4103_v30 = vsel %vm6543_vm9, %v4098_v43, %v4102_v37  ;;  %v6046_v2 = vrot.slane %v4669_v22, 9  ;;  %v3447_v60 = vrot.slane %v3445_v17, 4  ;;  %v7393_v34 = vrot.slane %v4118_v13, 4  ;;  %v2693_v43 = vld [vmem:[#allocation2 + $0x6c] sm:$0xf] }
 0x214   : > { %v7371_v11 = vadd.f32 %v2341_v14, %v1989_v49  ;;  %5898 = vmatmul.msk.bf16.gmra.mxu1 %vm505_vm1, %v8403_v55  ;;  %v2903_v49 = vrot.slane %v2902_v48, 4  ;;  %v2907_v21 = vrot.slane %v2905_v4, 5  ;;  %v7395_v14 = vrot.slane %v4124_v27, 5 }
 0x215   : > { %5932 = vmatmul.msk.bf16.gmra.mxu2 %vm505_vm1, %v3540_v18  ;;  %v7391_v18 = vrot.slane %v4111_v33, 4  ;;  %v4129_v5 = vshrl.u32 %v4017_v41, 16  ;;  %v4778_v40 = vsel %vm6532_vm8, %v6046_v2, %v4777_v62  ;;  %v2893_v48 = vrot.slane %v2892_v47, 4  ;;  %v7403_v33 = vld [vmem:[#allocation2 + $0x7c] sm:$0xf] }
 0x216   : > { %v7401_v44 = vunpack.c.l.b16 %v4103_v30  ;;  %v4855_v13 = vunpack.c.l.b16 %v4781_v19  ;;  %v2908_v4 = vsel %vm6543_vm9, %v2903_v49, %v2907_v21  ;;  %v2919_v62 = vshll.u32 %v7360_v38, 16  ;;  %v4670_v30 = vld [vmem:[#allocation2 + $0x78] sm:$0xe] }
 0x217   : > { %v2597_v29 = vpop.f32.mrf.mxu0  ;;  %v2923_v37 = vshrl.u32 %v7360_v38, 16  ;;  %v5916_v27 = vrot.slane %v3331_v58, 9  ;;  %v4132_v47 = vshll.u32 %v4017_v41, 16  ;;  %v2910_v19 = vshrl.u32 %v2693_v43, 16 }
 0x218   : > { %v7389_v3 = vadd.f32 %v2597_v29, %v7085_v57  ;;  %v3448_v57 = vrot.slane %v7382_v31, 5  ;;  %v4854_v29 = vunpack.c.l.b16 %v4778_v40  ;;  %v4784_v49 = vrot.slane %v7403_v33, 5 }
 0x219   : > { %v1770_v51 = vpop.f32.mrf.mxu1  ;;  %v3118_v21 = vunpack.c.l.b16 %v2908_v4  ;;  %v3446_v38 = vsel %vm6532_vm8, %v5916_v27, %v3445_v17  ;;  %v2913_v58 = vshll.u32 %v2693_v43, 16  ;;  %v7427_v4 = vrot.slane %v4129_v5, 4  ;;  %v4036_v5 = vld [vmem:[#allocation2 + $0x88] sm:$0xf] }
 0x21a   : > { %8404 = vst [vmem:[#allocation26_spill] sm:$0xff] %v7389_v3  ;;  %v2343_v25 = vpop.f32.mrf.mxu3  ;;  %6023 = vmatmul.msk.bf16.vlgmr.msra.gmra.mxu0 %vm505_vm1, %v4474_v8  ;;  %v1991_v22 = vadd.f32 %v1990_v10, %v1770_v51  ;;  %v1993_v55 = vpop.f32.mrf.mxu2  ;;  %v3449_v8 = vsel %vm6532_vm8, %v3447_v60, %v3448_v57  ;;  %v6165_v3 = vld [vmem:[#allocation2 + $0x6c] sm:$0xff]  ;;  %v2898_v10 = vsel %vm6543_vm9, %v2893_v48, %v7353_v24  ;;  %v4034_v51 = vld [vmem:[#allocation2 + $0x80] sm:$0x1]  ;;  %v2925_v57 = vrot.slane %v2923_v37, 4 }
 0x21b   : > { %v7419_v60 = vpack.c.b16 %v4855_v13, %v4854_v29  ;;  %v3518_v40 = vunpack.c.l.b16 %v3449_v8  ;;  %v3117_v48 = vunpack.c.l.b16 %v2898_v10  ;;  %v7429_v20 = vrot.slane %v4132_v47, 5 }
 0x21c   : > { %v7411_v2 = vadd.f32 %v2343_v25, %v1991_v22  ;;  %v7422_v25 = vrot.slane %v2919_v62, 5  ;;  %v6047_v22 = vrot.slane %v4670_v30, 9  ;;  %v3517_v17 = vunpack.c.l.b16 %v3446_v38  ;;  %v7433_v30 = vld [vmem:[#allocation2 + $0x7c] sm:$0xf] }
 0x21d   : > { %8405 = vst [vmem:[#allocation27_spill] sm:$0xff] %v7419_v60  ;;  %v4786_v13 = vrot.slane %v4784_v49, 4  ;;  %v3142_v62 = vpack.c.b16 %v3118_v21, %v3117_v48  ;;  %v2912_v29 = vrot.slane %v2910_v19, 4  ;;  %v2915_v37 = vrot.slane %v2913_v58, 5  ;;  %v5289_v19 = vld [vmem:[%s8367_s7] sm:$0x3] }
 0x21e   : > { %v4785_v43 = vsel %vm6532_vm8, %v6047_v22, %v4784_v49  ;;  %v2926_v38 = vor.u32 %v2925_v57, %v7422_v25  ;;  %v5144_v49 = vld [vmem:[%s8365_s5] sm:$0x3]  ;;  %v2929_v57 = vshll.u32 %v7382_v31, 16  ;;  %v3452_v48 = vrot.slane %v7433_v30, 5  ;;  %v7718_v60 = vld [vmem:[#allocation2 + $0xbc] sm:$0x1] }
 0x21f   : > { %6013 = vmatmul.msk.bf16.gmra.mxu3 %vm505_vm1, %v6165_v3  ;;  %v2599_v41 = vpop.f32.mrf.mxu0  ;;  %v4787_v3 = vrot.slane %v4034_v51, 5  ;;  %v5198_v58 = vsel %vm554_vm0, %v5144_v49, 0  ;;  %v2916_v31 = vor.u32 %v2915_v37, %v2912_v29  ;;  %v3332_v37 = vld [vmem:[#allocation2 + $0x78] sm:$0xe] }
 0x220   : > { %v7425_v24 = vadd.f32 %v2599_v41, %v7118_v61  ;;  %v4121_v61 = vor.u32 %v7393_v34, %v7386_v39  ;;  %v3541_v41 = vpack.c.b16 %v3518_v40, %v3517_v17  ;;  %v5295_v34 = vsel %vm554_vm0, %v5289_v19, 0  ;;  %v4671_v40 = vld [vmem:[#allocation2 + $0x84] sm:$0xe]  ;;  %5207 = vmatpush.bf16.msra.mxu2 %v5198_v58  ;;  %v4037_v17 = vld [vmem:[#allocation2 + $0x8c] sm:$0x1] }
 0x221   : > { %v1773_v27 = vpop.f32.mrf.mxu1  ;;  %v4788_v21 = vsel %vm6532_vm8, %v4786_v13, %v4787_v3  ;;  %5304 = vmatpush.bf16.msra.mxu3 %v5295_v34  ;;  %v4138_v3 = vshll.u32 %v7138_v42, 16  ;;  %v6048_v19 = vrot.slane %v4671_v40, 9  ;;  %v2931_v58 = vrot.slane %v2929_v57, 5 }
 0x222   : > { %v2346_v8 = vpop.f32.mrf.mxu3  ;;  %v1994_v10 = vadd.f32 %v1993_v55, %v1773_v27  ;;  %v1995_v47 = vpop.f32.mrf.mxu2  ;;  %v4856_v55 = vunpack.c.l.b16 %v4785_v43  ;;  %v4857_v51 = vunpack.c.l.b16 %v4788_v21  ;;  %v4791_v27 = vrot.slane %v4036_v5, 5  ;;  %v7463_v5 = vld [vmem:[#allocation2 + $0x80] sm:$0x1] }
 0x223   : > { %v4122_v13 = vrot.slane %v4121_v61, 4  ;;  %v4142_v43 = vshrl.u32 %v7138_v42, 16  ;;  %v4117_v61 = vsel %vm6543_vm9, %v7391_v18, %v7386_v39  ;;  %v3454_v34 = vrot.slane %v3452_v48, 4 }
 0x224   : > { %v7448_v22 = vadd.f32 %v2346_v8, %v1994_v10  ;;  %5899 = vmatmul.msk.bf16.gmra.mxu1 %vm505_vm1, %v3142_v62  ;;  %v7456_v49 = vpack.c.b16 %v4857_v51, %v4856_v55  ;;  %v4475_v62 = vpack.c.b16 %v7401_v44, %v7380_v9  ;;  %v2927_v10 = vrot.slane %v2926_v38, 4 }
 0x225   : > { %5933 = vmatmul.msk.bf16.gmra.mxu2 %vm505_vm1, %v3541_v41  ;;  %v4793_v42 = vrot.slane %v4791_v27, 4  ;;  %v4794_v41 = vrot.slane %v4037_v17, 5  ;;  %v4135_v9 = vor.u32 %v7429_v20, %v7427_v4  ;;  %v4792_v44 = vsel %vm6532_vm8, %v6048_v19, %v4791_v27  ;;  %v2696_v17 = vld [vmem:[#allocation2 + $0x78] sm:$0xf] }
 0x226   : > { %8406 = vst [vmem:[#allocation28_spill] sm:$0xff] %v7456_v49  ;;  %v4127_v38 = vsel %vm6543_vm9, %v4122_v13, %v7395_v14  ;;  %v7477_v39 = vrot.slane %v4138_v3, 5  ;;  %v4144_v18 = vrot.slane %v4142_v43, 4  ;;  %v2917_v4 = vrot.slane %v2916_v31, 4  ;;  %v6166_v43 = vld [vmem:[#allocation2 + $0x78] sm:$0xff] }
 0x227   : > { %v2602_v8 = vpop.f32.mrf.mxu0  ;;  %v4795_v55 = vsel %vm6532_vm8, %v4793_v42, %v4794_v41  ;;  %v2932_v40 = vsel %vm6543_vm9, %v2927_v10, %v2931_v58  ;;  %v3455_v57 = vrot.slane %v7463_v5, 5  ;;  %v2943_v27 = vshll.u32 %v7433_v30, 16 }
 0x228   : > { %v7461_v21 = vadd.f32 %v2602_v8, %v7141_v50  ;;  %v2947_v8 = vshrl.u32 %v7433_v30, 16  ;;  %v4858_v14 = vunpack.c.l.b16 %v4792_v44  ;;  %v4859_v13 = vunpack.c.l.b16 %v4795_v55 }
 0x229   : > { %v1775_v29 = vpop.f32.mrf.mxu1  ;;  %v4136_v31 = vrot.slane %v4135_v9, 4  ;;  %v2922_v10 = vsel %vm6543_vm9, %v2917_v4, %v7422_v25  ;;  %v4145_v19 = vor.u32 %v4144_v18, %v7477_v39  ;;  %v4148_v42 = vshll.u32 %v7144_v56, 16 }
 0x22a   : > { %v2348_v50 = vpop.f32.mrf.mxu3  ;;  %6024 = vmatmul.msk.bf16.gmra.mxu0 %vm505_vm1, %v4475_v62  ;;  %v1996_v51 = vadd.f32 %v1995_v47, %v1775_v29  ;;  %v3609_v20 = vpop.f32.mrf.mxu2  ;;  %v5917_v62 = vrot.slane %v3332_v37, 9  ;;  %v3456_v47 = vsel %vm6532_vm8, %v3454_v34, %v3455_v57  ;;  %v7495_v41 = vpack.c.b16 %v4859_v13, %v4858_v14  ;;  %v7505_v14 = vld [vmem:[#allocation2 + $0x88] sm:$0xf] }
 0x22b   : > { %v3120_v58 = vunpack.c.l.b16 %v2932_v40  ;;  %v2934_v29 = vshrl.u32 %v2696_v17, 16  ;;  %v2937_v34 = vshll.u32 %v2696_v17, 16  ;;  %v7503_v25 = vrot.slane %v2943_v27, 5 }
 0x22c   : > { %v7486_v3 = vadd.f32 %v2348_v50, %v1996_v51  ;;  %8407 = vst [vmem:[#allocation29_spill] sm:$0xff] %v7495_v41  ;;  %v3453_v44 = vsel %vm6532_vm8, %v5917_v62, %v3452_v48  ;;  %v3520_v50 = vunpack.c.l.b16 %v3456_v47  ;;  %v2949_v37 = vrot.slane %v2947_v8, 4 }
 0x22d   : > { %v3119_v18 = vunpack.c.l.b16 %v2922_v10  ;;  %v4446_v56 = vunpack.c.l.b16 %v4117_v61  ;;  %v4447_v55 = vunpack.c.l.b16 %v4127_v38  ;;  %v3519_v57 = vunpack.c.l.b16 %v3453_v44 }
 0x22e   : > { %v4141_v48 = vsel %vm6543_vm9, %v4136_v31, %v7477_v39  ;;  %v4146_v40 = vrot.slane %v4145_v19, 4  ;;  %v4150_v17 = vrot.slane %v4148_v42, 5  ;;  %v4162_v8 = vshll.u32 %v7179_v26, 16 }
 0x22f   : > { %6014 = vmatmul.msk.bf16.gmra.mxu3 %vm505_vm1, %v6166_v43  ;;  %v2604_v30 = vpop.f32.mrf.mxu0  ;;  %v3143_v27 = vpack.c.b16 %v3120_v58, %v3119_v18  ;;  %v4166_v61 = vshrl.u32 %v7179_v26, 16  ;;  %v3542_v38 = vpack.c.b16 %v3520_v50, %v3519_v57  ;;  %v2936_v62 = vrot.slane %v2934_v29, 4 }
 0x230   : > { %v7501_v9 = vadd.f32 %v2604_v30, %v7162_v54  ;;  %v4020_v54 = vld [vmem:[#allocation2 + $0x48] sm:$0xf]  ;;  %v2939_v47 = vrot.slane %v2937_v34, 5  ;;  %v2950_v10 = vor.u32 %v2949_v37, %v7503_v25  ;;  %v3459_v39 = vrot.slane %v7505_v14, 5 }
 0x231   : > { %v3211_v51 = vpop.f32.mrf.mxu1  ;;  %v4153_v31 = vshrl.u32 %v4020_v54, 16  ;;  %v2953_v19 = vshll.u32 %v7463_v5, 16  ;;  %v4151_v42 = vsel %vm6543_vm9, %v4146_v40, %v4150_v17  ;;  %v4156_v26 = vshll.u32 %v4020_v54, 16  ;;  %v4023_v5 = vld [vmem:[#allocation2 + $0x54] sm:$0xf] }
 0x232   : > { %v3896_v4 = vpop.f32.mrf.mxu3  ;;  %v3291_v13 = vadd.f32 %v3211_v51, %v6998_v28  ;;  %v3611_v43 = vpop.f32.mrf.mxu2  ;;  %v4476_v28 = vpack.c.b16 %v4447_v55, %v4446_v56  ;;  %v7522_v29 = vunpack.c.l.b16 %v4141_v48  ;;  %v4168_v34 = vrot.slane %v4166_v61, 4  ;;  %v7529_v56 = vld [vmem:[#allocation2 + $0x8c] sm:$0x1]  ;;  %v3333_v54 = vld [vmem:[#allocation2 + $0x84] sm:$0xe] }
 0x233   : > { %v2940_v37 = vor.u32 %v2939_v47, %v2936_v62  ;;  %v2951_v18 = vrot.slane %v2950_v10, 4  ;;  %v4186_v55 = vshll.u32 %v7216_v53, 16  ;;  %v3461_v51 = vrot.slane %v3459_v39, 4  ;;  %v2699_v47 = vld [vmem:[#allocation2 + $0x84] sm:$0xf] }
 0x234   : > { %v3689_v30 = vadd.f32 %v3609_v20, %v3291_v13  ;;  %5900 = vmatmul.msk.bf16.gmra.mxu1 %vm505_vm1, %v3143_v27  ;;  %v7524_v20 = vrot.slane %v4162_v8, 5  ;;  %v7532_v57 = vunpack.c.l.b16 %v4151_v42  ;;  %v4190_v48 = vshrl.u32 %v7216_v53, 16 }
 0x235   : > { %5934 = vmatmul.msk.bf16.gmra.mxu2 %vm505_vm1, %v3542_v38  ;;  %v2967_v13 = vshll.u32 %v7505_v14, 16  ;;  %v2971_v27 = vshrl.u32 %v7505_v14, 16  ;;  %v7540_v8 = vrot.slane %v4156_v26, 5  ;;  %v3462_v62 = vrot.slane %v7529_v56, 5  ;;  %v6167_v14 = vld [vmem:[#allocation2 + $0x84] sm:$0xff] }
 0x236   : > { %v7520_v58 = vadd.f32 %v3896_v4, %v3689_v30  ;;  %v7534_v4 = vrot.slane %v4153_v31, 4  ;;  %v4169_v53 = vor.u32 %v4168_v34, %v7524_v20  ;;  %v4177_v10 = vshrl.u32 %v4023_v5, 16 }
 0x237   : > { %v2607_v44 = vpop.f32.mrf.mxu0  ;;  %v2941_v30 = vrot.slane %v2940_v37, 4  ;;  %v5918_v26 = vrot.slane %v3333_v54, 9  ;;  %v2958_v34 = vshrl.u32 %v2699_v47, 16  ;;  %v7554_v41 = vrot.slane %v2967_v13, 5  ;;  %v6223_v54 = vld [vmem:[#allocation2 + $0x50] sm:$0x1] }
 0x238   : > { %v7527_v50 = vadd.f32 %v2607_v44, %v7182_v52  ;;  %v2955_v52 = vrot.slane %v2953_v19, 5  ;;  %v7547_v19 = vrot.slane %v4186_v55, 5  ;;  %v4192_v44 = vrot.slane %v4190_v48, 4 }
 0x239   : > { %v3213_v40 = vpop.f32.mrf.mxu1  ;;  %v2973_v37 = vrot.slane %v2971_v27, 4  ;;  %v2961_v55 = vshll.u32 %v2699_v47, 16  ;;  %v4170_v27 = vrot.slane %v4169_v53, 4  ;;  %v2960_v53 = vrot.slane %v2958_v34, 4 }
 0x23a   : > { %v3898_v17 = vpop.f32.mrf.mxu3  ;;  %6025 = vmatmul.msk.bf16.gmra.mxu0 %vm505_vm1, %v4476_v28  ;;  %v3292_v61 = vadd.f32 %v3213_v40, %v7032_v45  ;;  %v3614_v38 = vpop.f32.mrf.mxu2  ;;  %v2956_v31 = vsel %vm6543_vm9, %v2951_v18, %v2955_v52  ;;  %v4180_v28 = vshll.u32 %v4023_v5, 16  ;;  %v3463_v45 = vsel %vm6532_vm8, %v3461_v51, %v3462_v62  ;;  %v7561_v51 = vld [vmem:[#allocation2 + $0x94] sm:$0xf] }
 0x23b   : > { %v2946_v40 = vsel %vm6543_vm9, %v2941_v30, %v7503_v25  ;;  %v3460_v5 = vsel %vm6532_vm8, %v5918_v26, %v3459_v39  ;;  %v3522_v25 = vunpack.c.l.b16 %v3463_v45  ;;  %v4159_v52 = vor.u32 %v7540_v8, %v7534_v4  ;;  %v7568_v30 = vld [vmem:[#allocation2 + $0x98] sm:$0x1] }
 0x23c   : > { %v3690_v42 = vadd.f32 %v3611_v43, %v3292_v61  ;;  %v3122_v43 = vunpack.c.l.b16 %v2956_v31  ;;  %v3121_v13 = vunpack.c.l.b16 %v2946_v40  ;;  %v4179_v61 = vrot.slane %v4177_v10, 4 }
 0x23d   : > { %v4182_v62 = vrot.slane %v4180_v28, 5  ;;  %v3521_v47 = vunpack.c.l.b16 %v3460_v5  ;;  %v4798_v26 = vrot.slane %v7561_v51, 5  ;;  %v2963_v10 = vrot.slane %v2961_v55, 5 }
 0x23e   : > { %v7556_v49 = vadd.f32 %v3898_v17, %v3690_v42  ;;  %v4172_v17 = vshll.u32 %v6223_v54, 16  ;;  %v2974_v42 = vor.u32 %v2973_v37, %v7554_v41  ;;  %v3144_v8 = vpack.c.b16 %v3122_v43, %v3121_v13 }
 0x23f   : > { %6015 = vmatmul.msk.bf16.gmra.mxu3 %vm505_vm1, %v6167_v14  ;;  %v2609_v18 = vpop.f32.mrf.mxu0  ;;  %v7571_v14 = vld [vmem:[#allocation2 + $0x94] sm:$0xf]  ;;  %v3543_v28 = vpack.c.b16 %v3522_v25, %v3521_v47  ;;  %v2977_v40 = vshll.u32 %v7529_v56, 16  ;;  %v4801_v5 = vrot.slane %v7568_v30, 5  ;;  %v4196_v34 = vshll.u32 %v7226_v15, 16 }
 0x240   : > { %v7564_v48 = vadd.f32 %v2609_v18, %v7201_v16  ;;  %v4193_v16 = vor.u32 %v4192_v44, %v7547_v19  ;;  %v4800_v18 = vrot.slane %v4798_v26, 4  ;;  %v3466_v37 = vrot.slane %v7571_v14, 5  ;;  %v7590_v25 = vld [vmem:[#allocation2 + $0x98] sm:$0x1] }
 0x241   : > { %v3216_v31 = vpop.f32.mrf.mxu1  ;;  %v4174_v44 = vrot.slane %v4172_v17, 5  ;;  %v2975_v43 = vrot.slane %v2974_v42, 4  ;;  %v7592_v13 = vrot.slane %v4159_v52, 4  ;;  %v2979_v15 = vrot.slane %v2977_v40, 5  ;;  %v4672_v42 = vld [vmem:[#allocation2 + $0x90] sm:$0xe] }
 0x242   : > { %v3901_v39 = vpop.f32.mrf.mxu3  ;;  %v3293_v4 = vadd.f32 %v3216_v31, %v7045_v46  ;;  %v3616_v45 = vpop.f32.mrf.mxu2  ;;  %v4477_v46 = vpack.c.b16 %v7532_v57, %v7522_v29  ;;  %v7586_v56 = vsel %vm6532_vm8, %v4800_v18, %v4801_v5  ;;  %v4183_v31 = vor.u32 %v4182_v62, %v4179_v61  ;;  %v2702_v62 = vld [vmem:[#allocation2 + $0x90] sm:$0xf] }
 0x243   : > { %v4175_v17 = vsel %vm6543_vm9, %v4170_v27, %v4174_v44  ;;  %v2964_v57 = vor.u32 %v2963_v10, %v2960_v53  ;;  %v4194_v47 = vrot.slane %v4193_v16, 4  ;;  %v2980_v27 = vsel %vm6543_vm9, %v2975_v43, %v2979_v15  ;;  %v6168_v15 = vld [vmem:[#allocation2 + $0x90] sm:$0xff] }
 0x244   : > { %v3691_v54 = vadd.f32 %v3614_v38, %v3293_v4  ;;  %5901 = vmatmul.msk.bf16.gmra.mxu1 %vm505_vm1, %v3144_v8  ;;  %v3334_v4 = vld [vmem:[#allocation2 + $0x90] sm:$0xe]  ;;  %v3468_v8 = vrot.slane %v3466_v37, 4  ;;  %v7607_v61 = vunpack.c.l.b16 %v4175_v17  ;;  %v4198_v16 = vrot.slane %v4196_v34, 5 }
 0x245   : > { %5935 = vmatmul.msk.bf16.gmra.mxu2 %vm505_vm1, %v3543_v28  ;;  %v2991_v40 = vshll.u32 %v7571_v14, 16  ;;  %v2995_v18 = vshrl.u32 %v7571_v14, 16  ;;  %v6049_v5 = vrot.slane %v4672_v42, 9  ;;  %v5919_v44 = vrot.slane %v3334_v4, 9 }
 0x246   : > { %v7588_v55 = vadd.f32 %v3901_v39, %v3691_v54  ;;  %v2965_v54 = vrot.slane %v2964_v57, 4  ;;  %v4199_v43 = vsel %vm6543_vm9, %v4194_v47, %v4198_v16  ;;  %v2982_v34 = vshrl.u32 %v2702_v62, 16  ;;  %v4026_v39 = vld [vmem:[#allocation2 + $0x60] sm:$0xf] }
 0x247   : > { %v2612_v38 = vpop.f32.mrf.mxu0  ;;  %v3124_v57 = vunpack.c.l.b16 %v2980_v27  ;;  %v2985_v42 = vshll.u32 %v2702_v62, 16  ;;  %v3467_v47 = vsel %vm6532_vm8, %v5919_v44, %v3466_v37  ;;  %v4201_v27 = vshrl.u32 %v4026_v39, 16  ;;  %v7639_v44 = vld [vmem:[#allocation2 + $0xa0] sm:$0xf] }
 0x248   : > { %v7597_v29 = vadd.f32 %v2612_v38, %v7218_v36  ;;  %v3469_v36 = vrot.slane %v7590_v25, 5  ;;  %v2970_v14 = vsel %vm6543_vm9, %v2965_v54, %v7554_v41  ;;  %vm5482_vm0 = vcmask 125952  }
 0x249   : > { %v3218_v52 = vpop.f32.mrf.mxu1  ;;  %v2987_v54 = vrot.slane %v2985_v42, 5 }
 0x24a   : > { %8408 = vst [vmem:[#allocation30_spill] sm:$0xff] %v7597_v29  ;;  %v3903_v28 = vpop.f32.mrf.mxu3  ;;  %6026 = vmatmul.msk.bf16.gmra.mxu0 %vm505_vm1, %v4477_v46  ;;  %v3294_v53 = vadd.f32 %v3218_v52, %v7069_v6  ;;  %v3619_v10 = vpop.f32.mrf.mxu2  ;;  %v4184_v46 = vrot.slane %v4183_v31, 4  ;;  %v3470_v17 = vsel %vm6532_vm8, %v3468_v8, %v3469_v36  ;;  %v4799_v6 = vsel %vm6532_vm8, %v6049_v5, %v4798_v26  ;;  %v7629_v26 = vld [vmem:[#allocation2 + $0xa0] sm:$0xf]  ;;  %v7637_v5 = vld [vmem:[#allocation2 + $0xa4] sm:$0x1] }
 0x24b   : > { %v4861_v31 = vunpack.c.l.b16 %v7586_v56  ;;  %v7627_v8 = vrot.slane %v2991_v40, 5  ;;  %v2997_v52 = vrot.slane %v2995_v18, 4  ;;  %v3524_v41 = vunpack.c.l.b16 %v3470_v17 }
 0x24c   : > { %v3692_v38 = vadd.f32 %v3616_v45, %v3294_v53  ;;  %v4860_v62 = vunpack.c.l.b16 %v4799_v6  ;;  %v3123_v56 = vunpack.c.l.b16 %v2970_v14  ;;  %v4189_v16 = vsel %vm6543_vm9, %v4184_v46, %v7547_v19 }
 0x24d   : > { %v4204_v53 = vshll.u32 %v4026_v39, 16  ;;  %v3523_v18 = vunpack.c.l.b16 %v3467_v47  ;;  %v2998_v6 = vor.u32 %v2997_v52, %v7627_v8  ;;  %v7646_v19 = vunpack.c.l.b16 %v4199_v43 }
 0x24e   : > { %v7622_v4 = vadd.f32 %v3903_v28, %v3692_v38  ;;  %v2984_v28 = vrot.slane %v2982_v34, 4  ;;  %v4805_v38 = vrot.slane %v7629_v26, 5  ;;  %v3145_v17 = vpack.c.b16 %v3124_v57, %v3123_v56  ;;  %v4673_v56 = vld [vmem:[#allocation2 + $0x9c] sm:$0xe] }
 0x24f   : > { %6016 = vmatmul.msk.bf16.gmra.mxu3 %vm505_vm1, %v6168_v15  ;;  %v2614_v45 = vpop.f32.mrf.mxu0  ;;  %v3544_v39 = vpack.c.b16 %v3524_v41, %v3523_v18  ;;  %v4203_v46 = vrot.slane %v4201_v27, 4  ;;  %v3473_v47 = vrot.slane %v7639_v44, 5  ;;  %v2999_v27 = vrot.slane %v2998_v6, 4  ;;  %v7668_v18 = vld [vmem:[#allocation2 + $0xa4] sm:$0x1] }
 0x250   : > { %v7632_v36 = vadd.f32 %v2614_v45, %v7242_v7  ;;  %v7641_v7 = vpack.c.b16 %v4861_v31, %v4860_v62  ;;  %v4807_v14 = vrot.slane %v4805_v38, 4  ;;  %v4808_v45 = vrot.slane %v7637_v5, 5  ;;  %v2705_v6 = vld [vmem:[#allocation2 + $0x9c] sm:$0xf] }
 0x251   : > { %v3221_v37 = vpop.f32.mrf.mxu1  ;;  %v3001_v31 = vshll.u32 %v7590_v25, 16  ;;  %v4206_v62 = vrot.slane %v4204_v53, 5  ;;  %v2988_v57 = vor.u32 %v2987_v54, %v2984_v28  ;;  %v7662_v25 = vunpack.c.l.b16 %v4189_v16 }
 0x252   : > { %8409 = vst [vmem:[#allocation31_spill] sm:$0xff] %v7632_v36  ;;  %v3906_v40 = vpop.f32.mrf.mxu3  ;;  %v3295_v15 = vadd.f32 %v3221_v37, %v7102_v1  ;;  %v3621_v34 = vpop.f32.mrf.mxu2  ;;  %v8411_v1 = vsel %vm6543_vm9, %v7592_v13, %v7524_v20  ;;  %v4809_v52 = vsel %vm6532_vm8, %v4807_v14, %v4808_v45  ;;  %v3335_v13 = vld [vmem:[#allocation2 + $0x9c] sm:$0xe]  ;;  %v3475_v28 = vrot.slane %v3473_v47, 4 }
 0x253   : > { %8410 = vst [vmem:[#allocation32_spill] sm:$0xff] %v7641_v7  ;;  %v4450_v43 = vunpack.c.l.b16 %v8411_v1  ;;  %v3003_v20 = vrot.slane %v3001_v31, 5  ;;  %v2989_v16 = vrot.slane %v2988_v57, 4  ;;  %v3476_v31 = vrot.slane %v7668_v18, 5 }
 0x254   : > { %v3693_v42 = vadd.f32 %v3619_v10, %v3295_v15  ;;  %5902 = vmatmul.msk.bf16.gmra.mxu1 %vm505_vm1, %v3145_v17  ;;  %v4214_v1 = vshrl.u32 %v7279_v23, 16 }
 0x255   : > { %5936 = vmatmul.msk.bf16.gmra.mxu2 %vm505_vm1, %v3544_v39  ;;  %v4478_v37 = vpack.c.b16 %v7607_v61, %v4450_v43  ;;  %v4210_v39 = vshll.u32 %v7279_v23, 16  ;;  %v6050_v61 = vrot.slane %v4673_v56, 9  ;;  %v4220_v43 = vshll.u32 %v7293_v12, 16  ;;  %v6169_v56 = vld [vmem:[#allocation2 + $0x9c] sm:$0xff]  ;;  %v7693_v12 = vld [vmem:[#allocation2 + $0xac] sm:$0xf] }
 0x256   : > { %v7660_v10 = vadd.f32 %v3906_v40, %v3693_v42  ;;  %v4207_v40 = vor.u32 %v4206_v62, %v4203_v46  ;;  %v3004_v42 = vsel %vm6543_vm9, %v2999_v27, %v3003_v20  ;;  %v3019_v46 = vshrl.u32 %v7639_v44, 16 }
 0x257   : > { %v2617_v41 = vpop.f32.mrf.mxu0  ;;  %v5920_v62 = vrot.slane %v3335_v13, 9  ;;  %v4806_v57 = vsel %vm6532_vm8, %v6050_v61, %v4805_v38  ;;  %v3477_v27 = vsel %vm6532_vm8, %v3475_v28, %v3476_v31  ;;  %v3126_v20 = vunpack.c.l.b16 %v3004_v42  ;;  %v4674_v61 = vld [vmem:[#allocation2 + $0xa8] sm:$0xe]  ;;  %v8413_v28 = vld [vmem:[#allocation19_spill] sm:$0xff] }
 0x258   : > { %v7665_v53 = vadd.f32 %v2617_v41, %v7265_v0  ;;  %v3015_v0 = vshll.u32 %v7639_v44, 16  ;;  %v3009_v23 = vshll.u32 %v2705_v6, 16  ;;  %v3526_v42 = vunpack.c.l.b16 %v3477_v27 }
 0x259   : > { %v3223_v15 = vpop.f32.mrf.mxu1  ;;  %v3474_v44 = vsel %vm6532_vm8, %v5920_v62, %v3473_v47  ;;  %v7701_v31 = vrot.slane %v4207_v40, 4  ;;  %v7703_v47 = vrot.slane %v4210_v39, 5  ;;  %v7705_v62 = vld [vmem:[#allocation2 + $0xb0] sm:$0x1]  ;;  %v6051_v27 = vrot.slane %v4674_v61, 9 }
 0x25a   : > { %8412 = vst [vmem:[#allocation33_spill] sm:$0xff] %v7665_v53  ;;  %v3908_v17 = vpop.f32.mrf.mxu3  ;;  %6027 = vmatmul.msk.bf16.gmra.mxu0 %vm505_vm1, %v4478_v37  ;;  %v3296_v14 = vadd.f32 %v3223_v15, %v7135_v63  ;;  %v3624_v45 = vpop.f32.mrf.mxu2  ;;  %v2994_v63 = vsel %vm6543_vm9, %v2989_v16, %v7627_v8  ;;  %v3006_v37 = vshrl.u32 %v2705_v6, 16  ;;  %v7691_v13 = vrot.slane %v3015_v0, 5  ;;  %v8416_v40 = vld [vmem:[#allocation9_spill] sm:$0xff] }
 0x25b   : > { %v3021_v15 = vrot.slane %v3019_v46, 4  ;;  %v4862_v8 = vunpack.c.l.b16 %v4806_v57  ;;  %v4863_v16 = vunpack.c.l.b16 %v4809_v52  ;;  %v3125_v6 = vunpack.c.l.b16 %v2994_v63  ;;  %8417 = vst [vmem:[#allocation9_spill] sm:$0xff] %v7718_v60 }
 0x25c   : > { %v3694_v41 = vadd.f32 %v3621_v34, %v3296_v14  ;;  %v4216_v0 = vrot.slane %v4214_v1, 4  ;;  %v3525_v52 = vunpack.c.l.b16 %v3474_v44  ;;  %v3011_v54 = vrot.slane %v3009_v23, 5 }
 0x25d   : > { %v3146_v39 = vpack.c.b16 %v3126_v20, %v3125_v6  ;;  %v3022_v1 = vor.u32 %v3021_v15, %v7691_v13  ;;  %v7714_v63 = vrot.slane %v4220_v43, 5  ;;  %v4815_v23 = vrot.slane %v7705_v62, 5  ;;  %v4029_v6 = vld [vmem:[#allocation2 + $0x6c] sm:$0xf] }
 0x25e   : > { %v7695_v38 = vadd.f32 %v3908_v17, %v3694_v41  ;;  %v7707_v17 = vpack.c.b16 %v4863_v16, %v4862_v8  ;;  %v4812_v41 = vrot.slane %v7693_v12, 5  ;;  %v4675_v8 = vld [vmem:[#allocation2 + $0xb4] sm:$0xe]  ;;  %v3545_v16 = vpack.c.b16 %v3526_v42, %v3525_v52 }
 0x25f   : > { %6017 = vmatmul.msk.bf16.gmra.mxu3 %vm505_vm1, %v6169_v56  ;;  %v2619_v34 = vpop.f32.mrf.mxu0  ;;  %v3008_v56 = vrot.slane %v3006_v37, 4  ;;  %v3025_v20 = vshll.u32 %v7668_v18, 16  ;;  %v4217_v15 = vor.u32 %v4216_v0, %v7703_v47  ;;  %v6052_v52 = vrot.slane %v4675_v8, 9  ;;  %v7737_v0 = vld [vmem:[#allocation2 + $0xb0] sm:$0x1] }
 0x260   : > { %v7699_v14 = vadd.f32 %v2619_v34, %v8413_v28  ;;  %8415 = vst [vmem:[#allocation34_spill] sm:$0xff] %v7707_v17  ;;  %v7710_v34 = vld [vmem:[#allocation2 + $0xac] sm:$0xf]  ;;  %v7716_v17 = vld [vmem:[#allocation2 + $0xb8] sm:$0xf]  ;;  %v4813_v37 = vsel %vm6532_vm8, %v6051_v27, %v4812_v41  ;;  %v4814_v44 = vrot.slane %v4812_v41, 4 }
 0x261   : > { %v3226_v46 = vpop.f32.mrf.mxu1  ;;  %v3480_v43 = vrot.slane %v7710_v34, 5  ;;  %v3012_v42 = vor.u32 %v3011_v54, %v3008_v56  ;;  %v4819_v41 = vrot.slane %v7716_v17, 5  ;;  %v4822_v18 = vrot.slane %v7718_v60, 5 }
 0x262   : > { %8414 = vst [vmem:[#allocation19_spill] sm:$0xff] %v7699_v14  ;;  %v3911_v57 = vpop.f32.mrf.mxu3  ;;  %v3297_v28 = vadd.f32 %v3226_v46, %v8416_v40  ;;  %v3626_v7 = vpop.f32.mrf.mxu2  ;;  %v4816_v46 = vsel %vm6532_vm8, %v4814_v44, %v4815_v23  ;;  %v3023_v40 = vrot.slane %v3022_v1, 4  ;;  %v3027_v8 = vrot.slane %v3025_v20, 5 }
 0x263   : > { %v4865_v54 = vunpack.c.l.b16 %v4816_v46  ;;  %v4820_v56 = vsel %vm6532_vm8, %v6052_v52, %v4819_v41  ;;  %v3482_v44 = vrot.slane %v3480_v43, 4  ;;  %v4218_v23 = vrot.slane %v4217_v15, 4  ;;  %v8421_v52 = vld [vmem:[#allocation11_spill] sm:$0xff] }
 0x264   : > { %v3695_v61 = vadd.f32 %v3624_v45, %v3297_v28  ;;  %5903 = vmatmul.msk.bf16.gmra.mxu1 %vm505_vm1, %v3146_v39  ;;  %v4864_v28 = vunpack.c.l.b16 %v4813_v37  ;;  %v8418_v39 = vld [vmem:[#allocation21_spill] sm:$0xff]  ;;  %v8420_v1 = vpack.c.b16 %v7646_v19, %v7662_v25  ;;  %v3336_v37 = vld [vmem:[#allocation2 + $0xa8] sm:$0xe]  ;;  %v3043_v46 = vshrl.u32 %v7710_v34, 16 }
 0x265   : > { %5937 = vmatmul.msk.bf16.gmra.mxu2 %vm505_vm1, %v3545_v16  ;;  %v4821_v16 = vrot.slane %v4819_v41, 4  ;;  %v4866_v36 = vunpack.c.l.b16 %v4820_v56  ;;  %v3013_v19 = vrot.slane %v3012_v42, 4  ;;  %v3028_v25 = vsel %vm6543_vm9, %v3023_v40, %v3027_v8  ;;  %v6224_v40 = vld [vmem:[#allocation2 + $0x70] sm:$0xf] }
 0x266   : > { %v7731_v27 = vadd.f32 %v3911_v57, %v3695_v61  ;;  %v4225_v57 = vshrl.u32 %v4029_v6, 16  ;;  %v4234_v60 = vshll.u32 %v7340_v59, 16 }
 0x267   : > { %v2622_v45 = vpop.f32.mrf.mxu0  ;;  %v4823_v20 = vsel %vm6532_vm8, %v4821_v16, %v4822_v18  ;;  %v2708_v16 = vld [vmem:[#allocation2 + $0xa8] sm:$0xf]  ;;  %v3018_v56 = vsel %vm6543_vm9, %v3013_v19, %v7691_v13 }
 0x268   : > { %v7735_v14 = vadd.f32 %v2622_v45, %v8418_v39  ;;  %v3039_v45 = vshll.u32 %v7710_v34, 16  ;;  %v7747_v39 = vpack.c.b16 %v4865_v54, %v4864_v28  ;;  %v4867_v29 = vunpack.c.l.b16 %v4823_v20  ;;  %v6170_v28 = vld [vmem:[#allocation2 + $0xa8] sm:$0xff] }
 0x269   : > { %v3228_v61 = vpop.f32.mrf.mxu1  ;;  %v5921_v54 = vrot.slane %v3336_v37, 9  ;;  %v3045_v20 = vrot.slane %v3043_v46, 4  ;;  %v3030_v37 = vshrl.u32 %v2708_v16, 16  ;;  %v3127_v46 = vunpack.c.l.b16 %v3018_v56 }
 0x26a   : > { %8419 = vst [vmem:[#allocation21_spill] sm:$0xff] %v7735_v14  ;;  %v3913_v53 = vpop.f32.mrf.mxu3  ;;  %6028 = vmatmul.msk.bf16.gmra.mxu0 %vm505_vm1, %v8420_v1  ;;  %v3298_v15 = vadd.f32 %v3228_v61, %v8421_v52  ;;  %v3629_v41 = vpop.f32.mrf.mxu2  ;;  %v3483_v14 = vrot.slane %v7737_v0, 5  ;;  %v4228_v1 = vshll.u32 %v4029_v6, 16  ;;  %v7758_v61 = vpack.c.b16 %v4867_v29, %v4866_v36  ;;  %v8423_v36 = vld [vmem:[#allocation23_spill] sm:$0xff] }
 0x26b   : > { %v7763_v42 = vrot.slane %v3039_v45, 5  ;;  %v4238_v6 = vshrl.u32 %v6224_v40, 16  ;;  %v4223_v29 = vsel %vm6543_vm9, %v4218_v23, %v7714_v63  ;;  %v3033_v45 = vshll.u32 %v2708_v16, 16  ;;  %v2712_v63 = vld [vmem:[#allocation2 + $0xb8] sm:$0xf] }
 0x26c   : > { %v3696_v34 = vadd.f32 %v3626_v7, %v3298_v15  ;;  %v3484_v18 = vsel %vm6532_vm8, %v3482_v44, %v3483_v14  ;;  %8422 = vst [vmem:[#allocation11_spill] sm:$0xff] %v7758_v61  ;;  %v3128_v7 = vunpack.c.l.b16 %v3028_v25  ;;  %v3481_v14 = vsel %vm6532_vm8, %v5921_v54, %v3480_v43  ;;  %v8424_v54 = vld [vmem:[#allocation12_spill] sm:$0xff] }
 0x26d   : > { %v3528_v44 = vunpack.c.l.b16 %v3484_v18  ;;  %v4227_v52 = vrot.slane %v4225_v57, 4  ;;  %v4230_v15 = vrot.slane %v4228_v1, 5  ;;  %v3527_v25 = vunpack.c.l.b16 %v3481_v14  ;;  %v6225_v14 = vld [vmem:[#allocation2 + $0x74] sm:$0x1] }
 0x26e   : > { %v7765_v8 = vadd.f32 %v3913_v53, %v3696_v34  ;;  %v4213_v53 = vsel %vm6543_vm9, %v7701_v31, %v7703_v47  ;;  %v3046_v34 = vor.u32 %v3045_v20, %v7763_v42  ;;  %v7781_v23 = vrot.slane %v4234_v60, 5 }
 0x26f   : > { %6018 = vmatmul.msk.bf16.gmra.mxu3 %vm505_vm1, %v6170_v28  ;;  %v2624_v59 = vpop.f32.mrf.mxu0  ;;  %v4240_v28 = vrot.slane %v4238_v6, 4  ;;  %v3147_v16 = vpack.c.b16 %v3128_v7, %v3127_v46  ;;  %v4455_v40 = vunpack.c.l.b16 %v4223_v29  ;;  %v3035_v61 = vrot.slane %v3033_v45, 5  ;;  %v7793_v45 = vld [vmem:[#allocation2 + $0xbc] sm:$0x1] }
 0x270   : > { %v7774_v13 = vadd.f32 %v2624_v59, %v8423_v36  ;;  %v3546_v59 = vpack.c.b16 %v3528_v44, %v3527_v25  ;;  %v3032_v36 = vrot.slane %v3030_v37, 4  ;;  %v3049_v31 = vshll.u32 %v7737_v0, 16 }
 0x271   : > { %v3231_v19 = vpop.f32.mrf.mxu1  ;;  %v4454_v57 = vunpack.c.l.b16 %v4213_v53  ;;  %v3487_v1 = vrot.slane %v2712_v63, 5  ;;  %v3047_v60 = vrot.slane %v3046_v34, 4  ;;  %v4231_v20 = vor.u32 %v4230_v15, %v4227_v52  ;;  %v3337_v15 = vld [vmem:[#allocation2 + $0xb4] sm:$0xe] }
 0x272   : > { %v3916_v43 = vpop.f32.mrf.mxu3  ;;  %v3299_v18 = vadd.f32 %v3231_v19, %v8424_v54  ;;  %v3631_v56 = vpop.f32.mrf.mxu2  ;;  %v4241_v6 = vor.u32 %v4240_v28, %v7781_v23  ;;  %v4244_v7 = vshll.u32 %v6225_v14, 16  ;;  %v3051_v37 = vrot.slane %v3049_v31, 5  ;;  %v4032_v19 = vld [vmem:[#allocation2 + $0x78] sm:$0xf] }
 0x273   : > { %v4480_v0 = vpack.c.b16 %v4455_v40, %v4454_v57  ;;  %v3489_v53 = vrot.slane %v3487_v1, 4  ;;  %v2711_v40 = vld [vmem:[#allocation2 + $0xb4] sm:$0xf]  ;;  %v4252_v57 = vshll.u32 %v4032_v19, 16  ;;  %v4258_v14 = vshll.u32 %v7403_v33, 16 }
 0x274   : > { %v3697_v47 = vadd.f32 %v3629_v41, %v3299_v18  ;;  %5904 = vmatmul.msk.bf16.gmra.mxu1 %vm505_vm1, %v3147_v16  ;;  %v3036_v41 = vor.u32 %v3035_v61, %v3032_v36  ;;  %v3052_v52 = vsel %vm6543_vm9, %v3047_v60, %v3051_v37  ;;  %v4242_v28 = vrot.slane %v4241_v6, 4 }
 0x275   : > { %5938 = vmatmul.msk.bf16.gmra.mxu2 %vm505_vm1, %v3546_v59  ;;  %v4246_v54 = vrot.slane %v4244_v7, 5  ;;  %v3490_v61 = vrot.slane %v7793_v45, 5  ;;  %v3063_v59 = vshll.u32 %v2712_v63, 16  ;;  %v3067_v36 = vshrl.u32 %v2712_v63, 16 }
 0x276   : > { %v7788_v46 = vadd.f32 %v3916_v43, %v3697_v47  ;;  %v4232_v43 = vrot.slane %v4231_v20, 4  ;;  %v3037_v31 = vrot.slane %v3036_v41, 4  ;;  %v4249_v47 = vshrl.u32 %v4032_v19, 16 }
 0x277   : > { %v2627_v29 = vpop.f32.mrf.mxu0  ;;  %v5922_v60 = vrot.slane %v3337_v15, 9  ;;  %v3491_v20 = vsel %vm6532_vm8, %v3489_v53, %v3490_v61  ;;  %v4262_v6 = vshrl.u32 %v7403_v33, 16  ;;  %v3130_v37 = vunpack.c.l.b16 %v3052_v52 }
 0x278   : > { %v7791_v44 = vadd.f32 %v2627_v29, %v7371_v11  ;;  %v8425_v11 = vld [vmem:[#allocation14_spill] sm:$0xff]  ;;  %v3042_v7 = vsel %vm6543_vm9, %v3037_v31, %v7763_v42  ;;  %v3057_v63 = vshll.u32 %v2711_v40, 16  ;;  %v7812_v15 = vrot.slane %v3063_v59, 5 }
 0x279   : > { %v3233_v25 = vpop.f32.mrf.mxu1  ;;  %v3069_v53 = vrot.slane %v3067_v36, 4  ;;  %v4237_v42 = vsel %vm6543_vm9, %v4232_v43, %v7781_v23  ;;  %v3129_v52 = vunpack.c.l.b16 %v3042_v7  ;;  %v4254_v61 = vrot.slane %v4252_v57, 5  ;;  %v2715_v43 = vld [vmem:[#allocation2 + $0xc4] sm:$0xf] }
 0x27a   : > { %v3918_v34 = vpop.f32.mrf.mxu3  ;;  %6029 = vmatmul.msk.bf16.gmra.mxu0 %vm505_vm1, %v4480_v0  ;;  %v3300_v18 = vadd.f32 %v3233_v25, %v8425_v11  ;;  %v3634_v16 = vpop.f32.mrf.mxu2  ;;  %v6171_v0 = vld [vmem:[#allocation2 + $0xb4] sm:$0xff]  ;;  %v3054_v25 = vshrl.u32 %v2711_v40, 16  ;;  %v3530_v11 = vunpack.c.l.b16 %v3491_v20  ;;  %v7822_v40 = vrot.slane %v4258_v14, 5 }
 0x27b   : > { %v3148_v20 = vpack.c.b16 %v3130_v37, %v3129_v52  ;;  %v3070_v23 = vor.u32 %v3069_v53, %v7812_v15  ;;  %v4456_v14 = vunpack.c.l.b16 %v4237_v42  ;;  %v3073_v7 = vshll.u32 %v7793_v45, 16 }
 0x27c   : > { %v3698_v29 = vadd.f32 %v3631_v56, %v3300_v18  ;;  %v3488_v56 = vsel %vm6532_vm8, %v5922_v60, %v3487_v1  ;;  %v4251_v18 = vrot.slane %v4249_v47, 4  ;;  %v3056_v36 = vrot.slane %v3054_v25, 4  ;;  %v7828_v25 = vld [vmem:[#allocation2 + $0xc8] sm:$0x1] }
 0x27d   : > { %v3529_v31 = vunpack.c.l.b16 %v3488_v56  ;;  %v3494_v47 = vrot.slane %v2715_v43, 5  ;;  %v6226_v56 = vld [vmem:[#allocation2 + $0x80] sm:$0x1]  ;;  %v3071_v52 = vrot.slane %v3070_v23, 4 }
 0x27e   : > { %v7807_v41 = vadd.f32 %v3918_v34, %v3698_v29  ;;  %v4247_v34 = vsel %vm6543_vm9, %v4242_v28, %v4246_v54  ;;  %v3059_v29 = vrot.slane %v3057_v63, 5  ;;  %v3338_v54 = vld [vmem:[#allocation2 + $0xc0] sm:$0xe]  ;;  %v4255_v37 = vor.u32 %v4254_v61, %v4251_v18 }
 0x27f   : > { %6019 = vmatmul.msk.bf16.gmra.mxu3 %vm505_vm1, %v6171_v0  ;;  %v2629_v19 = vpop.f32.mrf.mxu0  ;;  %v8427_v0 = vld [vmem:[#allocation15_spill] sm:$0xff]  ;;  %v4457_v28 = vunpack.c.l.b16 %v4247_v34  ;;  %v4268_v53 = vshll.u32 %v6226_v56, 16  ;;  %v3496_v45 = vrot.slane %v3494_v47, 4  ;;  %v3091_v56 = vshrl.u32 %v2715_v43, 16 }
 0x280   : > { %8426 = vst [vmem:[#allocation23_spill] sm:$0xff] %v7807_v41  ;;  %v7815_v33 = vadd.f32 %v2629_v19, %v7411_v2  ;;  %v4264_v2 = vrot.slane %v4262_v6, 4  ;;  %v3547_v41 = vpack.c.b16 %v3530_v11, %v3529_v31  ;;  %v3060_v6 = vor.u32 %v3059_v29, %v3056_v36 }
 0x281   : > { %v3236_v1 = vpop.f32.mrf.mxu1  ;;  %v4481_v42 = vpack.c.b16 %v4457_v28, %v4456_v14  ;;  %v3497_v31 = vrot.slane %v7828_v25, 5  ;;  %v4256_v29 = vrot.slane %v4255_v37, 4  ;;  %v6172_v37 = vld [vmem:[#allocation2 + $0xc0] sm:$0xff] }
 0x282   : > { %v3921_v59 = vpop.f32.mrf.mxu3  ;;  %v3301_v60 = vadd.f32 %v3236_v1, %v8427_v0  ;;  %v3636_v19 = vpop.f32.mrf.mxu2  ;;  %v4265_v63 = vor.u32 %v4264_v2, %v7822_v40  ;;  %v3075_v0 = vrot.slane %v3073_v7, 5  ;;  %v3061_v61 = vrot.slane %v3060_v6, 4 }
 0x283   : > { %v4270_v2 = vrot.slane %v4268_v53, 5 }
 0x284   : > { %v3699_v57 = vadd.f32 %v3634_v16, %v3301_v60  ;;  %5905 = vmatmul.msk.bf16.gmra.mxu1 %vm505_vm1, %v3148_v20  ;;  %v5923_v16 = vrot.slane %v3338_v54, 9  ;;  %v8428_v60 = vld [vmem:[#allocation16_spill] sm:$0xff]  ;;  %v3087_v54 = vshll.u32 %v2715_v43, 16 }
 0x285   : > { %5939 = vmatmul.msk.bf16.gmra.mxu2 %vm505_vm1, %v3547_v41  ;;  %v2714_v41 = vld [vmem:[#allocation2 + $0xc0] sm:$0xf] }
 0x286   : > { %v7832_v11 = vadd.f32 %v3921_v59, %v3699_v57  ;;  %v4266_v59 = vrot.slane %v4265_v63, 4  ;;  %v3495_v28 = vsel %vm6532_vm8, %v5923_v16, %v3494_v47  ;;  %v3498_v57 = vsel %vm6532_vm8, %v3496_v45, %v3497_v31 }
 0x287   : > { %v2632_v34 = vpop.f32.mrf.mxu0  ;;  %v3078_v14 = vshrl.u32 %v2714_v41, 16  ;;  %v3081_v7 = vshll.u32 %v2714_v41, 16  ;;  %v3066_v63 = vsel %vm6543_vm9, %v3061_v61, %v7812_v15  ;;  %v3531_v43 = vunpack.c.l.b16 %v3495_v28  ;;  %v4035_v41 = vld [vmem:[#allocation2 + $0x84] sm:$0xf] }
 0x288   : > { %v7835_v1 = vadd.f32 %v2632_v34, %v7448_v22  ;;  %v3076_v22 = vsel %vm6543_vm9, %v3071_v52, %v3075_v0  ;;  %v4261_v34 = vsel %vm6543_vm9, %v4256_v29, %v7822_v40  ;;  %v4271_v47 = vsel %vm6543_vm9, %v4266_v59, %v4270_v2  ;;  %v6227_v40 = vld [vmem:[#allocation2 + $0x88] sm:$0xf] }
 0x289   : > { %v3238_v36 = vpop.f32.mrf.mxu1  ;;  %v3132_v53 = vunpack.c.l.b16 %v3076_v22  ;;  %v3080_v15 = vrot.slane %v3078_v14, 4  ;;  %v3083_v31 = vrot.slane %v3081_v7, 5  ;;  %v3093_v0 = vrot.slane %v3091_v56, 4 }
 0x28a   : > { %v3923_v18 = vpop.f32.mrf.mxu3  ;;  %6030 = vmatmul.msk.bf16.gmra.mxu0 %vm505_vm1, %v4481_v42  ;;  %v3302_v20 = vadd.f32 %v3238_v36, %v8428_v60  ;;  %v3639_v23 = vpop.f32.mrf.mxu2  ;;  %v3089_v42 = vrot.slane %v3087_v54, 5  ;;  %v3131_v36 = vunpack.c.l.b16 %v3066_v63  ;;  %v4282_v61 = vshll.u32 %v6227_v40, 16  ;;  %v8429_v60 = vld [vmem:[#allocation18_spill] sm:$0xff] }
 0x28b   : > { %v4286_v29 = vshrl.u32 %v6227_v40, 16  ;;  %v4458_v2 = vunpack.c.l.b16 %v4261_v34  ;;  %v4273_v54 = vshrl.u32 %v4035_v41, 16  ;;  %v3097_v14 = vshll.u32 %v7828_v25, 16 }
 0x28c   : > { %v3700_v6 = vadd.f32 %v3636_v19, %v3302_v20  ;;  %v3532_v19 = vunpack.c.l.b16 %v3498_v57  ;;  %v3149_v22 = vpack.c.b16 %v3132_v53, %v3131_v36  ;;  %v4459_v57 = vunpack.c.l.b16 %v4271_v47 }
 0x28d   : > { %v4276_v56 = vshll.u32 %v4035_v41, 16  ;;  %v4284_v63 = vrot.slane %v4282_v61, 5  ;;  %v8430_v41 = vld [vmem:[#allocation20_spill] sm:$0xff] }
 0x28e   : > { %v7854_v52 = vadd.f32 %v3923_v18, %v3700_v6  ;;  %v3548_v6 = vpack.c.b16 %v3532_v19, %v3531_v43  ;;  %v4482_v53 = vpack.c.b16 %v4459_v57, %v4458_v2 }
 0x28f   : > { %6020 = vmatmul.msk.bf16.gmra.mxu3 %vm505_vm1, %v6172_v37  ;;  %v2634_v16 = vpop.f32.mrf.mxu0  ;;  %v3094_v37 = vor.u32 %v3093_v0, %v3089_v42  ;;  %v4278_v25 = vrot.slane %v4276_v56, 5 }
 0x290   : > { %v7858_v45 = vadd.f32 %v2634_v16, %v7486_v3  ;;  %v3084_v3 = vor.u32 %v3083_v31, %v3080_v15  ;;  %v4288_v16 = vrot.slane %v4286_v29, 4  ;;  %v3099_v15 = vrot.slane %v3097_v14, 5 }
 0x291   : > { %v3241_v59 = vpop.f32.mrf.mxu1  ;;  %v3095_v19 = vrot.slane %v3094_v37, 4  ;;  %v4275_v31 = vrot.slane %v4273_v54, 4 }
 0x292   : > { %v3926_v18 = vpop.f32.mrf.mxu3  ;;  %v3303_v20 = vadd.f32 %v3241_v59, %v8429_v60  ;;  %v3641_v28 = vpop.f32.mrf.mxu2  ;;  %v3085_v43 = vrot.slane %v3084_v3, 4  ;;  %v6173_v59 = vld [vmem:[#allocation2 + $0xcc] sm:$0xff] }
 0x293   : > { %v3100_v2 = vsel %vm6543_vm9, %v3095_v19, %v3099_v15  ;;  %v8431_v19 = vld [vmem:[#allocation22_spill] sm:$0xff] }
 0x294   : > { %v3701_v7 = vadd.f32 %v3639_v23, %v3303_v20  ;;  %5906 = vmatmul.msk.bf16.gmra.mxu1 %vm505_vm1, %v3149_v22  ;;  %v4289_v23 = vor.u32 %v4288_v16, %v4284_v63  ;;  %v4279_v22 = vor.u32 %v4278_v25, %v4275_v31  ;;  %v3134_v37 = vunpack.c.l.b16 %v3100_v2  ;;  %v4038_v16 = vld [vmem:[#allocation2 + $0x90] sm:$0xf] }
 0x295   : > { %5940 = vmatmul.msk.bf16.gmra.mxu2 %vm505_vm1, %v3548_v6 }
 0x296   : > { %v7864_v34 = vadd.f32 %v3926_v18, %v3701_v7  ;;  %v6228_v18 = vld [vmem:[#allocation2 + $0x8c] sm:$0x1]  ;;  %v4290_v57 = vrot.slane %v4289_v23, 4  ;;  %v4280_v56 = vrot.slane %v4279_v22, 4 }
 0x297   : > { %v4550_v40 = vpop.f32.mrf.mxu0  ;;  %v4292_v60 = vshll.u32 %v6228_v18, 16 }
 0x298   : > { %v7867_v47 = vadd.f32 %v4550_v40, %v7520_v58  ;;  %v3090_v58 = vsel %vm6543_vm9, %v3085_v43, %v3089_v42  ;;  %v4310_v40 = vshrl.u32 %v7561_v51, 16  ;;  %v4285_v23 = vsel %vm6543_vm9, %v4280_v56, %v4284_v63 }
 0x299   : > { %v3243_v0 = vpop.f32.mrf.mxu1  ;;  %v3133_v3 = vunpack.c.l.b16 %v3090_v58  ;;  %v4294_v14 = vrot.slane %v4292_v60, 5  ;;  %v4460_v18 = vunpack.c.l.b16 %v4285_v23 }
 0x29a   : > { %v3928_v36 = vpop.f32.mrf.mxu3  ;;  %6031 = vmatmul.msk.bf16.gmra.mxu0 %vm505_vm1, %v4482_v53  ;;  %v3304_v61 = vadd.f32 %v3243_v0, %v8430_v41  ;;  %v3644_v29 = vpop.f32.mrf.mxu2  ;;  %v4297_v0 = vshrl.u32 %v4038_v16, 16  ;;  %v4300_v41 = vshll.u32 %v4038_v16, 16 }
 0x29b   : > { %v4295_v42 = vsel %vm6543_vm9, %v4290_v57, %v4294_v14  ;;  %v3150_v31 = vpack.c.b16 %v3134_v37, %v3133_v3  ;;  %v4316_v14 = vshll.u32 %v7568_v30, 16  ;;  %v4330_v30 = vshll.u32 %v7629_v26, 16 }
 0x29c   : > { %v3702_v20 = vadd.f32 %v3641_v28, %v3304_v61  ;;  %v4306_v28 = vshll.u32 %v7561_v51, 16  ;;  %v4302_v22 = vrot.slane %v4300_v41, 5 }
 0x29e   : > { %v7875_v54 = vadd.f32 %v3928_v36, %v3702_v20  ;;  %v4308_v61 = vrot.slane %v4306_v28, 5  ;;  %v4299_v20 = vrot.slane %v4297_v0, 4  ;;  %v8433_v0 = vld [vmem:[#allocation26_spill] sm:$0xff] }
 0x29f   : > { %v4552_v6 = vpop.f32.mrf.mxu0  ;;  %6021 = vmatmul.msk.bf16.gmra.mxu3 %vm505_vm1, %v6173_v59  ;;  %v4312_v59 = vrot.slane %v4310_v40, 4  ;;  %v4318_v40 = vrot.slane %v4316_v14, 5 }
 0x2a0   : > { %v7879_v7 = vadd.f32 %v4552_v6, %v7556_v49  ;;  %v4461_v49 = vunpack.c.l.b16 %v4295_v42  ;;  %v4303_v42 = vor.u32 %v4302_v22, %v4299_v20  ;;  %v4332_v22 = vrot.slane %v4330_v30, 5 }
 0x2a1   : > { %v3246_v53 = vpop.f32.mrf.mxu1  ;;  %v4313_v63 = vor.u32 %v4312_v59, %v4308_v61 }
 0x2a2   : > { %v3931_v43 = vpop.f32.mrf.mxu3  ;;  %v3305_v15 = vadd.f32 %v3246_v53, %v8431_v19  ;;  %v3646_v25 = vpop.f32.mrf.mxu2  ;;  %v4483_v2 = vpack.c.b16 %v4461_v49, %v4460_v18  ;;  %v6229_v53 = vld [vmem:[%s6419_s27] sm:$0xff]  ;;  %v4304_v19 = vrot.slane %v4303_v42, 4 }
 0x2a3   : > { %v4314_v16 = vrot.slane %v4313_v63, 4 }
 0x2a4   : > { %v3703_v36 = vadd.f32 %v3644_v29, %v3305_v15  ;;  %5907 = vmatmul.msk.bf16.gmra.mxu1 %vm505_vm1, %v3150_v31  ;;  %v8432_v29 = vld [vmem:[#allocation25_spill] sm:$0xff]  ;;  %v4041_v31 = vld [vmem:[#allocation2 + $0x9c] sm:$0xf]  ;;  %v4309_v59 = vsel %vm6543_vm9, %v4304_v19, %v4308_v61 }
 0x2a5   : > { %v4319_v15 = vsel %vm6543_vm9, %v4314_v16, %v4318_v40  ;;  %v4324_v20 = vshll.u32 %v4041_v31, 16  ;;  %v4340_v40 = vshll.u32 %v7637_v5, 16  ;;  %v4354_v5 = vshll.u32 %v7693_v12, 16 }
 0x2a6   : > { %v7889_v60 = vadd.f32 %v3931_v43, %v3703_v36  ;;  %v4463_v18 = vunpack.c.l.b16 %v4319_v15 }
 0x2a7   : > { %v4555_v51 = vpop.f32.mrf.mxu0  ;;  %v4326_v61 = vrot.slane %v4324_v20, 5  ;;  %v4342_v30 = vrot.slane %v4340_v40, 5 }
 0x2a8   : > { %v7892_v58 = vadd.f32 %v4555_v51, %v7588_v55 }
 0x2a9   : > { %v3248_v57 = vpop.f32.mrf.mxu1 }
 0x2aa   : > { %v3933_v6 = vpop.f32.mrf.mxu3  ;;  %6032 = vmatmul.msk.bf16.gmra.mxu0 %vm505_vm1, %v4483_v2  ;;  %v3306_v3 = vadd.f32 %v3248_v57, %v8432_v29  ;;  %v3649_v37 = vpop.f32.mrf.mxu2  ;;  %v8434_v2 = vld [vmem:[#allocation6_spill] sm:$0xff]  ;;  %v4462_v57 = vunpack.c.l.b16 %v4309_v59 }
 0x2ac   : > { %v3704_v56 = vadd.f32 %v3646_v25, %v3306_v3  ;;  %v4334_v25 = vshrl.u32 %v7629_v26, 16  ;;  %v4484_v3 = vpack.c.b16 %v4463_v18, %v4462_v57 }
 0x2ae   : > { %v7897_v28 = vadd.f32 %v3933_v6, %v3704_v56  ;;  %v4336_v63 = vrot.slane %v4334_v25, 4  ;;  %v6230_v25 = vld [vmem:[%s6419_s27 + $0x8] sm:$0xff] }
 0x2af   : > { %v4557_v55 = vpop.f32.mrf.mxu0  ;;  %6088 = vmatmul.msk.bf16.vlgmr.msra.gmra.mxu3 %vm505_vm1, %v6229_v53 }
 0x2b0   : > { %v7902_v43 = vadd.f32 %v4557_v55, %v7622_v4  ;;  %v4321_v4 = vshrl.u32 %v4041_v31, 16  ;;  %v4337_v56 = vor.u32 %v4336_v63, %v4332_v22  ;;  %v8435_v63 = vld [vmem:[#allocation7_spill] sm:$0xff] }
 0x2b1   : > { %v3251_v23 = vpop.f32.mrf.mxu1 }
 0x2b2   : > { %v3936_v49 = vpop.f32.mrf.mxu3  ;;  %v3307_v36 = vadd.f32 %v3251_v23, %v8433_v0  ;;  %v3651_v41 = vpop.f32.mrf.mxu2  ;;  %v4323_v14 = vrot.slane %v4321_v4, 4  ;;  %v4338_v15 = vrot.slane %v4337_v56, 4  ;;  %v4044_v0 = vld [vmem:[#allocation2 + $0xa8] sm:$0xf] }
 0x2b3   : > { %v4348_v57 = vshll.u32 %v4044_v0, 16 }
 0x2b4   : > { %v3705_v51 = vadd.f32 %v3649_v37, %v3307_v36  ;;  %6056 = vmatmul.msk.bf16.vlgmr.msra.gmra.mxu1 %vm505_vm1, %v8434_v2  ;;  %v4327_v19 = vor.u32 %v4326_v61, %v4323_v14  ;;  %v4358_v36 = vshrl.u32 %v7693_v12, 16 }
 0x2b6   : > { %v7913_v6 = vadd.f32 %v3936_v49, %v3705_v51  ;;  %v4328_v49 = vrot.slane %v4327_v19, 4  ;;  %v4364_v19 = vshll.u32 %v7705_v62, 16  ;;  %v4378_v62 = vshll.u32 %v7716_v17, 16 }
 0x2b7   : > { %v4560_v26 = vpop.f32.mrf.mxu0 }
 0x2b8   : > { %v7916_v29 = vadd.f32 %v4560_v26, %v7660_v10  ;;  %v4333_v51 = vsel %vm6543_vm9, %v4328_v49, %v4332_v22  ;;  %v4356_v26 = vrot.slane %v4354_v5, 5  ;;  %v4350_v22 = vrot.slane %v4348_v57, 5  ;;  %v8436_v57 = vld [vmem:[#allocation8_spill] sm:$0xff] }
 0x2b9   : > { %v3253_v42 = vpop.f32.mrf.mxu1  ;;  %v4464_v14 = vunpack.c.l.b16 %v4333_v51  ;;  %v4366_v49 = vrot.slane %v4364_v19, 5 }
 0x2ba   : > { %v3938_v37 = vpop.f32.mrf.mxu3  ;;  %6033 = vmatmul.msk.bf16.gmra.mxu0 %vm505_vm1, %v4484_v3  ;;  %v3308_v16 = vadd.f32 %v3253_v42, %v7425_v24  ;;  %v3654_v55 = vpop.f32.mrf.mxu2  ;;  %v4343_v24 = vsel %vm6543_vm9, %v4338_v15, %v4342_v30  ;;  %v4360_v3 = vrot.slane %v4358_v36, 4  ;;  %v4047_v36 = vld [vmem:[#allocation2 + $0xb4] sm:$0xf] }
 0x2bb   : > { %v4465_v2 = vunpack.c.l.b16 %v4343_v24  ;;  %v6231_v24 = vld [vmem:[%s6419_s27 + $0x10] sm:$0xff] }
 0x2bc   : > { %v3706_v53 = vadd.f32 %v3651_v41, %v3308_v16 }
 0x2be   : > { %v7921_v31 = vadd.f32 %v3938_v37, %v3706_v53  ;;  %v4361_v37 = vor.u32 %v4360_v3, %v4356_v26  ;;  %v4380_v3 = vrot.slane %v4378_v62, 5 }
 0x2bf   : > { %v4562_v10 = vpop.f32.mrf.mxu0  ;;  %6089 = vmatmul.msk.bf16.gmra.mxu3 %vm505_vm1, %v6230_v25 }
 0x2c0   : > { %v7926_v23 = vadd.f32 %v4562_v10, %v7695_v38  ;;  %v4345_v38 = vshrl.u32 %v4044_v0, 16  ;;  %v4362_v30 = vrot.slane %v4361_v37, 4 }
 0x2c1   : > { %v3256_v41 = vpop.f32.mrf.mxu1 }
 0x2c2   : > { %v3941_v59 = vpop.f32.mrf.mxu3  ;;  %v3309_v18 = vadd.f32 %v3256_v41, %v7461_v21  ;;  %v3656_v4 = vpop.f32.mrf.mxu2  ;;  %v4485_v21 = vpack.c.b16 %v4465_v2, %v4464_v14  ;;  %v4347_v42 = vrot.slane %v4345_v38, 4  ;;  %v4382_v41 = vshrl.u32 %v7716_v17, 16 }
 0x2c4   : > { %v3707_v20 = vadd.f32 %v3654_v55, %v3309_v18  ;;  %6057 = vmatmul.msk.bf16.gmra.mxu1 %vm505_vm1, %v8435_v63  ;;  %v4351_v10 = vor.u32 %v4350_v22, %v4347_v42  ;;  %v4384_v14 = vrot.slane %v4382_v41, 4 }
 0x2c6   : > { %v7937_v61 = vadd.f32 %v3941_v59, %v3707_v20  ;;  %v4352_v5 = vrot.slane %v4351_v10, 4  ;;  %v4372_v20 = vshll.u32 %v4047_v36, 16  ;;  %v4385_v22 = vor.u32 %v4384_v14, %v4380_v3  ;;  %v8439_v14 = vld [vmem:[#allocation10_spill] sm:$0xff] }
 0x2c7   : > { %v4565_v12 = vpop.f32.mrf.mxu0 }
 0x2c8   : > { %v7940_v56 = vadd.f32 %v4565_v12, %v7731_v27  ;;  %v4357_v2 = vsel %vm6543_vm9, %v4352_v5, %v4356_v26  ;;  %v4386_v10 = vrot.slane %v4385_v22, 4  ;;  %v6232_v5 = vld [vmem:[%s6419_s27 + $0x18] sm:$0xff]  ;;  %v7981_v22 = vld [vmem:[#allocation2 + $0xc8] sm:$0x1] }
 0x2c9   : > { %v3258_v16 = vpop.f32.mrf.mxu1  ;;  %v4466_v12 = vunpack.c.l.b16 %v4357_v2 }
 0x2ca   : > { %v3943_v55 = vpop.f32.mrf.mxu3  ;;  %6034 = vmatmul.msk.bf16.gmra.mxu0 %vm505_vm1, %v4485_v21  ;;  %v3310_v40 = vadd.f32 %v3258_v16, %v7501_v9  ;;  %v3659_v53 = vpop.f32.mrf.mxu2  ;;  %v4367_v9 = vsel %vm6543_vm9, %v4362_v30, %v4366_v49  ;;  %v4050_v49 = vld [vmem:[#allocation2 + $0xc0] sm:$0xf] }
 0x2cb   : > { %v4467_v38 = vunpack.c.l.b16 %v4367_v9  ;;  %v4396_v62 = vshll.u32 %v4050_v49, 16 }
 0x2cc   : > { %v3708_v15 = vadd.f32 %v3656_v4, %v3310_v40  ;;  %v8437_v40 = vld [vmem:[#allocation9_spill] sm:$0xff] }
 0x2cd   : > { %v4486_v17 = vpack.c.b16 %v4467_v38, %v4466_v12  ;;  %v4398_v12 = vrot.slane %v4396_v62, 5  ;;  %v7990_v62 = vld [vmem:[#allocation2 + $0xd0] sm:$0xf] }
 0x2ce   : > { %v7945_v25 = vadd.f32 %v3943_v55, %v3708_v15 }
 0x2cf   : > { %v4567_v27 = vpop.f32.mrf.mxu0  ;;  %6090 = vmatmul.msk.bf16.gmra.mxu3 %vm505_vm1, %v6231_v24  ;;  %v7968_v24 = vld [vmem:[#allocation2 + $0xc4] sm:$0xf] }
 0x2d0   : > { %v7950_v0 = vadd.f32 %v4567_v27, %v7765_v8  ;;  %v4369_v8 = vshrl.u32 %v4047_v36, 16  ;;  %v4393_v36 = vshrl.u32 %v4050_v49, 16  ;;  %v4402_v41 = vshll.u32 %v7968_v24, 16 }
 0x2d1   : > { %v3261_v59 = vpop.f32.mrf.mxu1 }
 0x2d2   : > { %v3946_v18 = vpop.f32.mrf.mxu3  ;;  %v3311_v4 = vadd.f32 %v3261_v59, %v7527_v50  ;;  %v3661_v51 = vpop.f32.mrf.mxu2  ;;  %v4371_v42 = vrot.slane %v4369_v8, 4  ;;  %v4374_v50 = vrot.slane %v4372_v20, 5  ;;  %v4406_v59 = vshrl.u32 %v7968_v24, 16 }
 0x2d4   : > { %v3709_v63 = vadd.f32 %v3659_v53, %v3311_v4  ;;  %6058 = vmatmul.msk.bf16.gmra.mxu1 %vm505_vm1, %v8436_v57  ;;  %v4388_v53 = vshll.u32 %v8437_v40, 16  ;;  %v4375_v19 = vor.u32 %v4374_v50, %v4371_v42  ;;  %v4408_v42 = vrot.slane %v4406_v59, 4 }
 0x2d6   : > { %v7961_v21 = vadd.f32 %v3946_v18, %v3709_v63  ;;  %v4390_v27 = vrot.slane %v4388_v53, 5  ;;  %v4376_v9 = vrot.slane %v4375_v19, 4  ;;  %v4395_v63 = vrot.slane %v4393_v36, 4 }
 0x2d8   : > { %v4381_v8 = vsel %vm6543_vm9, %v4376_v9, %v4380_v3  ;;  %v4412_v3 = vshll.u32 %v7981_v22, 16 }
 0x2d9   : > { %v3263_v37 = vpop.f32.mrf.mxu1  ;;  %v4468_v50 = vunpack.c.l.b16 %v4381_v8 }
 0x2da   : > { %v3948_v16 = vpop.f32.mrf.mxu3  ;;  %6035 = vmatmul.msk.bf16.gmra.mxu0 %vm505_vm1, %v4486_v17  ;;  %v3312_v26 = vadd.f32 %v3263_v37, %v7564_v48  ;;  %v3664_v55 = vpop.f32.mrf.mxu2  ;;  %v4391_v48 = vsel %vm6543_vm9, %v4386_v10, %v4390_v27  ;;  %v4404_v17 = vrot.slane %v4402_v41, 5  ;;  %v4414_v9 = vrot.slane %v4412_v3, 5  ;;  %v6233_v41 = vld [vmem:[%s6419_s27 + $0x20] sm:$0xff]  ;;  %v8001_v3 = vld [vmem:[#allocation2 + $0xd4] sm:$0x1] }
 0x2db   : > { %v4469_v20 = vunpack.c.l.b16 %v4391_v48  ;;  %v4053_v48 = vld [vmem:[#allocation2 + $0xcc] sm:$0xf] }
 0x2dc   : > { %v3710_v15 = vadd.f32 %v3661_v51, %v3312_v26  ;;  %v8438_v51 = vld [vmem:[#allocation30_spill] sm:$0xff]  ;;  %v4399_v26 = vor.u32 %v4398_v12, %v4395_v63  ;;  %v4409_v40 = vor.u32 %v4408_v42, %v4404_v17  ;;  %v4417_v59 = vshrl.u32 %v4053_v48, 16 }
 0x2de   : > { %v7966_v30 = vadd.f32 %v3948_v16, %v3710_v15  ;;  %v4487_v16 = vpack.c.b16 %v4469_v20, %v4468_v50  ;;  %v4400_v49 = vrot.slane %v4399_v26, 4  ;;  %v4419_v63 = vrot.slane %v4417_v59, 4 }
 0x2df   : > { %6091 = vmatmul.msk.bf16.gmra.mxu3 %vm505_vm1, %v6232_v5  ;;  %v4410_v5 = vrot.slane %v4409_v40, 4 }
 0x2e1   : > { %v3266_v18 = vpop.f32.mrf.mxu1 }
 0x2e2   : > { %v3951_v4 = vpop.f32.mrf.mxu3  ;;  %v3313_v2 = vadd.f32 %v3266_v18, %v8438_v51  ;;  %v3666_v38 = vpop.f32.mrf.mxu2  ;;  %v4420_v18 = vshll.u32 %v4053_v48, 16  ;;  %v4405_v51 = vsel %vm6543_vm9, %v4400_v49, %v4404_v17  ;;  %v8442_v17 = vld [vmem:[#allocation13_spill] sm:$0xff]  ;;  %v8443_v48 = vld [vmem:[#allocation19_spill] sm:$0xff] }
 0x2e3   : > { %v4470_v26 = vunpack.c.l.b16 %v4405_v51 }
 0x2e4   : > { %v3711_v57 = vadd.f32 %v3664_v55, %v3313_v2  ;;  %6059 = vmatmul.msk.bf16.gmra.mxu1 %vm505_vm1, %v8439_v14  ;;  %v8440_v55 = vld [vmem:[#allocation31_spill] sm:$0xff]  ;;  %v4415_v2 = vsel %vm6543_vm9, %v4410_v5, %v4414_v9  ;;  %v4422_v42 = vrot.slane %v4420_v18, 5 }
 0x2e5   : > { %v4471_v40 = vunpack.c.l.b16 %v4415_v2 }
 0x2e6   : > { %v7983_v37 = vadd.f32 %v3951_v4, %v3711_v57  ;;  %v4426_v4 = vshll.u32 %v7990_v62, 16  ;;  %v8441_v57 = vld [vmem:[#allocation33_spill] sm:$0xff] }
 0x2e7   : > { %v4488_v49 = vpack.c.b16 %v4471_v40, %v4470_v26 }
 0x2e8   : > { %v4428_v50 = vrot.slane %v4426_v4, 5 }
 0x2e9   : > { %v3268_v53 = vpop.f32.mrf.mxu1 }
 0x2ea   : > { %v3953_v19 = vpop.f32.mrf.mxu3  ;;  %6036 = vmatmul.msk.bf16.gmra.mxu0 %vm505_vm1, %v4487_v16  ;;  %v3314_v15 = vadd.f32 %v3268_v53, %v8440_v55  ;;  %v3669_v10 = vpop.f32.mrf.mxu2  ;;  %v4423_v55 = vor.u32 %v4422_v42, %v4419_v63  ;;  %v4826_v63 = vrot.slane %v7968_v24, 5 }
 0x2ec   : > { %v3712_v27 = vadd.f32 %v3666_v38, %v3314_v15  ;;  %v4430_v38 = vshrl.u32 %v7990_v62, 16  ;;  %v4424_v59 = vrot.slane %v4423_v55, 4  ;;  %v4828_v42 = vrot.slane %v4826_v63, 4 }
 0x2ee   : > { %v7988_v36 = vadd.f32 %v3953_v19, %v3712_v27  ;;  %v4432_v16 = vrot.slane %v4430_v38, 4  ;;  %v4436_v27 = vshll.u32 %v8001_v3, 16  ;;  %v4429_v38 = vsel %vm6543_vm9, %v4424_v59, %v4428_v50 }
 0x2ef   : > { %6092 = vmatmul.msk.bf16.gmra.mxu3 %vm505_vm1, %v6233_v41  ;;  %v4472_v40 = vunpack.c.l.b16 %v4429_v38 }
 0x2f0   : > { %v4433_v15 = vor.u32 %v4432_v16, %v4428_v50  ;;  %v4829_v16 = vrot.slane %v7981_v22, 5 }
 0x2f1   : > { %v3271_v8 = vpop.f32.mrf.mxu1 }
 0x2f2   : > { %v3956_v20 = vpop.f32.mrf.mxu3  ;;  %v3315_v14 = vadd.f32 %v3271_v8, %v8441_v57  ;;  %v3671_v12 = vpop.f32.mrf.mxu2  ;;  %v4434_v18 = vrot.slane %v4433_v15, 4  ;;  %v4676_v57 = vld [vmem:[#allocation2 + $0xc0] sm:$0xe]  ;;  %v4830_v50 = vsel %vm6532_vm8, %v4828_v42, %v4829_v16 }
 0x2f3   : > { %v4869_v24 = vunpack.c.l.b16 %v4830_v50 }
 0x2f4   : > { %v3713_v53 = vadd.f32 %v3669_v10, %v3315_v14  ;;  %6060 = vmatmul.msk.bf16.gmra.mxu1 %vm505_vm1, %v8442_v17  ;;  %v4438_v10 = vrot.slane %v4436_v27, 5  ;;  %v6053_v14 = vrot.slane %v4676_v57, 9  ;;  %v8444_v17 = vld [vmem:[#allocation21_spill] sm:$0xff] }
 0x2f6   : > { %v8005_v19 = vadd.f32 %v3956_v20, %v3713_v53  ;;  %v4439_v8 = vsel %vm6543_vm9, %v4434_v18, %v4438_v10  ;;  %v6234_v20 = vld [vmem:[%s6419_s27 + $0x28] sm:$0xff]  ;;  %v4827_v35 = vsel %vm6532_vm8, %v6053_v14, %v4826_v63 }
 0x2f7   : > { %v4473_v53 = vunpack.c.l.b16 %v4439_v8  ;;  %v4868_v15 = vunpack.c.l.b16 %v4827_v35  ;;  %v8446_v14 = vld [vmem:[#allocation24_spill] sm:$0xff] }
 0x2f9   : > { %v3273_v5 = vpop.f32.mrf.mxu1 }
 0x2fa   : > { %v3958_v9 = vpop.f32.mrf.mxu3  ;;  %6037 = vmatmul.msk.bf16.gmra.mxu0 %vm505_vm1, %v4488_v49  ;;  %v3316_v41 = vadd.f32 %v3273_v5, %v8443_v48  ;;  %v3674_v4 = vpop.f32.mrf.mxu2  ;;  %v8445_v49 = vld [vmem:[#allocation17_spill] sm:$0xff]  ;;  %v4489_v5 = vpack.c.b16 %v4473_v53, %v4472_v40 }
 0x2fc   : > { %v3714_v51 = vadd.f32 %v3671_v12, %v3316_v41 }
 0x2fe   : > { %v8010_v2 = vadd.f32 %v3958_v9, %v3714_v51  ;;  %v8027_v9 = vpack.c.b16 %v4869_v24, %v4868_v15  ;;  %v8447_v15 = vld [vmem:[#allocation27_spill] sm:$0xff] }
 0x2ff   : > { %6093 = vmatmul.msk.bf16.gmra.mxu3 %vm505_vm1, %v6234_v20 }
 0x301   : > { %v3276_v26 = vpop.f32.mrf.mxu1 }
 0x302   : > { %v3961_v12 = vpop.f32.mrf.mxu3  ;;  %v3317_v55 = vadd.f32 %v3276_v26, %v8444_v17  ;;  %v3676_v22 = vpop.f32.mrf.mxu2  ;;  %v6236_v17 = vld [vmem:[%s6419_s27 + $0x38] sm:$0xff] }
 0x304   : > { %v3715_v27 = vadd.f32 %v3674_v4, %v3317_v55  ;;  %6061 = vmatmul.msk.bf16.gmra.mxu1 %vm505_vm1, %v8445_v49  ;;  %v6235_v4 = vld [vmem:[%s6419_s27 + $0x30] sm:$0xff] }
 0x306   : > { %v8029_v48 = vadd.f32 %v3961_v12, %v3715_v27 }
 0x309   : > { %v3278_v41 = vpop.f32.mrf.mxu1 }
 0x30a   : > { %v3963_v59 = vpop.f32.mrf.mxu3  ;;  %6038 = vmatmul.msk.bf16.gmra.mxu0 %vm505_vm1, %v4489_v5  ;;  %v3318_v18 = vadd.f32 %v3278_v41, %v7774_v13  ;;  %v3679_v38 = vpop.f32.mrf.mxu2  ;;  %v8448_v41 = vld [vmem:[#allocation28_spill] sm:$0xff] }
 0x30c   : > { %v3716_v10 = vadd.f32 %v3676_v22, %v3318_v18  ;;  %v6237_v22 = vld [vmem:[%s6419_s27 + $0x40] sm:$0xff] }
 0x30e   : > { %v8033_v51 = vadd.f32 %v3963_v59, %v3716_v10  ;;  %v8063_v59 = vld [vmem:[%s8364_s4] ss:$0 sm:$0xff] }
 0x30f   : > { %6094 = vmatmul.msk.bf16.gmra.mxu3 %vm505_vm1, %v6235_v4 }
 0x311   : > { %v3281_v8 = vpop.f32.mrf.mxu1 }
 0x312   : > { %v3966_v20 = vpop.f32.mrf.mxu3  ;;  %v3319_v63 = vadd.f32 %v3281_v8, %v7791_v44  ;;  %v3681_v16 = vpop.f32.mrf.mxu2 }
 0x314   : > { %v3717_v57 = vadd.f32 %v3679_v38, %v3319_v63  ;;  %6062 = vmatmul.msk.bf16.gmra.mxu1 %vm505_vm1, %v8446_v14  ;;  %v4570_v63 = vpop.f32.mrf.mxu0  ;;  %v8449_v14 = vld [vmem:[#allocation29_spill] sm:$0xff] }
 0x316   : > { %v8040_v42 = vadd.f32 %v3966_v20, %v3717_v57  ;;  %v6238_v20 = vld [vmem:[%s6419_s27 + $0x48] sm:$0xff] }
 0x319   : > { %v3283_v13 = vpop.f32.mrf.mxu1 }
 0x31a   : > { %v3320_v26 = vadd.f32 %v3283_v13, %v7815_v33  ;;  %v3968_v12 = vpop.f32.mrf.mxu3  ;;  %v3684_v35 = vpop.f32.mrf.mxu2 }
 0x31c   : > { %v3718_v40 = vadd.f32 %v3681_v16, %v3320_v26  ;;  %v4572_v13 = vpop.f32.mrf.mxu0 }
 0x31e   : > { %v8043_v53 = vadd.f32 %v3968_v12, %v3718_v40 }
 0x31f   : > { %6095 = vmatmul.msk.bf16.gmra.mxu3 %vm505_vm1, %v6236_v17 }
 0x321   : > { %v3286_v55 = vpop.f32.mrf.mxu1 }
 0x322   : > { %v3321_v44 = vadd.f32 %v3286_v55, %v7835_v1  ;;  %v3971_v50 = vpop.f32.mrf.mxu3 }
 0x324   : > { %6063 = vmatmul.msk.bf16.gmra.mxu1 %vm505_vm1, %v8447_v15  ;;  %v3719_v24 = vadd.f32 %v3684_v35, %v3321_v44  ;;  %v6239_v44 = vld [vmem:[%s6419_s27 + $0x50] sm:$0xff]  ;;  %v4575_v15 = vpop.f32.mrf.mxu0 }
 0x326   : > { %v8050_v27 = vadd.f32 %v3971_v50, %v3719_v24 }
 0x329   : > { %v3288_v33 = vpop.f32.mrf.mxu1 }
 0x32a   : > { %v8053_v49 = vadd.f32 %v3288_v33, %v7858_v45 }
 0x32f   : > { %6096 = vmatmul.msk.bf16.gmra.mxu3 %vm505_vm1, %v6237_v22 }
 0x331   : > { %v4948_v5 = vpop.f32.mrf.mxu1 }
 0x332   : > { %v5028_v1 = vadd.f32 %v4948_v5, %v7867_v47 }
 0x334   : > { %6064 = vmatmul.msk.bf16.gmra.mxu1 %vm505_vm1, %v8448_v41  ;;  %v5064_v10 = vadd.f32 %v8063_v59, %v5028_v1  ;;  %v4577_v41 = vpop.f32.mrf.mxu0  ;;  %v8086_v1 = vpop.f32.mrf.mxu3 }
 0x336   : > { %v5096_v38 = vmax.f32 %v5064_v10, 0.0 }
 0x339   : > { %v4950_v18 = vpop.f32.mrf.mxu1 }
 0x33a   : > { %v5029_v45 = vadd.f32 %v4950_v18, %v7879_v7 }
 0x33c   : > { %v5065_v4 = vadd.f32 %v8063_v59, %v5029_v45  ;;  %v6240_v45 = vld [vmem:[%s6419_s27 + $0x58] sm:$0xff]  ;;  %v5306_v32 = vpop.f32.mrf.mxu3 }
 0x33e   : > { %v5097_v8 = vmax.f32 %v5065_v4, 0.0 }
 0x33f   : > { %6097 = vmatmul.msk.bf16.gmra.mxu3 %vm505_vm1, %v6238_v20 }
 0x340   : > { %v5128_v47 = vpack.c.bf16 %v5097_v8, %v5096_v38 }
 0x341   : > { %v4953_v57 = vpop.f32.mrf.mxu1 }
 0x342   : > { %6072 = vmatmul.msk.bf16.vlgmr.msra.gmra.mxu2 %vm505_vm1, %v5128_v47  ;;  %v5030_v16 = vadd.f32 %v4953_v57, %v7892_v58  ;;  %v8450_v58 = vld [vmem:[#allocation32_spill] sm:$0xff] }
 0x344   : > { %6065 = vmatmul.msk.bf16.gmra.mxu1 %vm505_vm1, %v8449_v14  ;;  %v5066_v26 = vadd.f32 %v8063_v59, %v5030_v16 }
 0x346   : > { %v5098_v17 = vmax.f32 %v5066_v26, 0.0 }
 0x349   : > { %v4955_v7 = vpop.f32.mrf.mxu1 }
 0x34a   : > { %v5031_v12 = vadd.f32 %v4955_v7, %v7902_v43 }
 0x34c   : > { %v5067_v40 = vadd.f32 %v8063_v59, %v5031_v12 }
 0x34e   : > { %v5099_v55 = vmax.f32 %v5067_v40, 0.0 }
 0x34f   : > { %6098 = vmatmul.msk.bf16.gmra.mxu3 %vm505_vm1, %v6239_v44 }
 0x350   : > { %v5129_v35 = vpack.c.bf16 %v5099_v55, %v5098_v17  ;;  %v4638_v17 = vadd.f32 %v4570_v63, %v7788_v46  ;;  %v8452_v55 = vld [vmem:[#allocation23_spill] sm:$0xff]  ;;  %v4640_v46 = vadd.f32 %v4575_v15, %v7832_v11  ;;  %v4833_v11 = vrot.slane %v7990_v62, 5  ;;  %v4677_v15 = vld [vmem:[#allocation2 + $0xcc] sm:$0xe] }
 0x351   : > { %v4958_v50 = vpop.f32.mrf.mxu1  ;;  %v4639_v44 = vadd.f32 %v4572_v13, %v8452_v55  ;;  %v8453_v63 = vld [vmem:[#allocation11_spill] sm:$0xff] }
 0x352   : > { %6073 = vmatmul.msk.bf16.gmra.mxu2 %vm505_vm1, %v5129_v35  ;;  %v5032_v24 = vadd.f32 %v4958_v50, %v7916_v29  ;;  %v8451_v29 = vld [vmem:[#allocation34_spill] sm:$0xff] }
 0x354   : > { %6066 = vmatmul.msk.bf16.gmra.mxu1 %vm505_vm1, %v8450_v58  ;;  %v5068_v43 = vadd.f32 %v8063_v59, %v5032_v24 }
 0x356   : > { %v5100_v18 = vmax.f32 %v5068_v43, 0.0 }
 0x359   : > { %v4960_v33 = vpop.f32.mrf.mxu1 }
 0x35a   : > { %v5033_v22 = vadd.f32 %v4960_v33, %v7926_v23  ;;  %v4580_v23 = vpop.f32.mrf.mxu0 }
 0x35c   : > { %v5069_v5 = vadd.f32 %v8063_v59, %v5033_v22 }
 0x35e   : > { %v5101_v10 = vmax.f32 %v5069_v5, 0.0 }
 0x35f   : > { %6099 = vmatmul.msk.bf16.gmra.mxu3 %vm505_vm1, %v6240_v45 }
 0x360   : > { %v5130_v4 = vpack.c.bf16 %v5101_v10, %v5100_v18  ;;  %v4641_v18 = vadd.f32 %v4577_v41, %v7854_v52  ;;  %v6054_v52 = vrot.slane %v4677_v15, 9  ;;  %v4835_v41 = vrot.slane %v4833_v11, 4 }
 0x361   : > { %v4963_v38 = vpop.f32.mrf.mxu1 }
 0x362   : > { %6074 = vmatmul.msk.bf16.gmra.mxu2 %vm505_vm1, %v5130_v4  ;;  %v5034_v8 = vadd.f32 %v4963_v38, %v7940_v56  ;;  %v4582_v12 = vpop.f32.mrf.mxu0  ;;  %v4834_v62 = vsel %vm6532_vm8, %v6054_v52, %v4833_v11 }
 0x363   : > { %v4870_v55 = vunpack.c.l.b16 %v4834_v62 }
 0x364   : > { %6067 = vmatmul.msk.bf16.gmra.mxu1 %vm505_vm1, %v8451_v29  ;;  %v5070_v47 = vadd.f32 %v8063_v59, %v5034_v8 }
 0x366   : > { %v5102_v16 = vmax.f32 %v5070_v47, 0.0 }
 0x369   : > { %v4965_v20 = vpop.f32.mrf.mxu1 }
 0x36a   : > { %v5035_v57 = vadd.f32 %v4965_v20, %v7950_v0  ;;  %v4585_v58 = vpop.f32.mrf.mxu0 }
 0x36c   : > { %v5071_v14 = vadd.f32 %v8063_v59, %v5035_v57 }
 0x36e   : > { %v5103_v7 = vmax.f32 %v5071_v14, 0.0  ;;  %v4642_v14 = vadd.f32 %v4580_v23, %v7864_v34 }
 0x370   : > { %v5131_v26 = vpack.c.bf16 %v5103_v7, %v5102_v16  ;;  %v4836_v16 = vrot.slane %v8001_v3, 5 }
 0x371   : > { %v4968_v40 = vpop.f32.mrf.mxu1 }
 0x372   : > { %6075 = vmatmul.msk.bf16.gmra.mxu2 %vm505_vm1, %v5131_v26  ;;  %v5036_v56 = vadd.f32 %v4968_v40, %v4638_v17  ;;  %v4643_v26 = vadd.f32 %v4582_v12, %v7875_v54 }
 0x374   : > { %6068 = vmatmul.msk.bf16.gmra.mxu1 %vm505_vm1, %v7747_v39  ;;  %v5072_v0 = vadd.f32 %v8063_v59, %v5036_v56  ;;  %v4587_v39 = vpop.f32.mrf.mxu0  ;;  %v4837_v56 = vsel %vm6532_vm8, %v4835_v41, %v4836_v16 }
 0x376   : > { %v5104_v33 = vmax.f32 %v5072_v0, 0.0 }
 0x379   : > { %v4970_v35 = vpop.f32.mrf.mxu1 }
 0x37a   : > { %v5037_v50 = vadd.f32 %v4970_v35, %v4639_v44  ;;  %v4871_v44 = vunpack.c.l.b16 %v4837_v56 }
 0x37c   : > { %v5073_v24 = vadd.f32 %v8063_v59, %v5037_v50  ;;  %v4590_v20 = vpop.f32.mrf.mxu0  ;;  %v4887_v50 = vpack.c.b16 %v4871_v44, %v4870_v55 }
 0x37e   : > { %v5105_v43 = vmax.f32 %v5073_v24, 0.0  ;;  %v4644_v24 = vadd.f32 %v4585_v58, %v7889_v60 }
 0x380   : > { %v5132_v22 = vpack.c.bf16 %v5105_v43, %v5104_v33  ;;  %v4645_v43 = vadd.f32 %v4587_v39, %v7897_v28  ;;  %v4646_v28 = vadd.f32 %v4590_v20, %v7913_v6 }
 0x381   : > { %v4973_v5 = vpop.f32.mrf.mxu1 }
 0x382   : > { %6076 = vmatmul.msk.bf16.gmra.mxu2 %vm505_vm1, %v5132_v22  ;;  %v5038_v13 = vadd.f32 %v4973_v5, %v4640_v46 }
 0x384   : > { %6069 = vmatmul.msk.bf16.gmra.mxu1 %vm505_vm1, %v8453_v63  ;;  %v5074_v45 = vadd.f32 %v8063_v59, %v5038_v13  ;;  %v4592_v40 = vpop.f32.mrf.mxu0 }
 0x386   : > { %v5106_v29 = vmax.f32 %v5074_v45, 0.0  ;;  %v5308_v45 = vpop.f32.mrf.mxu3 }
 0x389   : > { %v4975_v10 = vpop.f32.mrf.mxu1 }
 0x38a   : > { %v5039_v4 = vadd.f32 %v4975_v10, %v4641_v18 }
 0x38c   : > { %v5075_v38 = vadd.f32 %v8063_v59, %v5039_v4  ;;  %v4595_v12 = vpop.f32.mrf.mxu0  ;;  %v6241_v4 = vld [vmem:[%s6419_s27 + $0x60] sm:$0xff] }
 0x38d   : > { %6100 = vmatmul.msk.bf16.gmra.mxu3 %vm505_vm1, %v6241_v4 }
 0x38e   : > { %v5107_v8 = vmax.f32 %v5075_v38, 0.0  ;;  %v5311_v38 = vpop.f32.mrf.mxu3 }
 0x390   : > { %v5133_v47 = vpack.c.bf16 %v5107_v8, %v5106_v29  ;;  %v4647_v8 = vadd.f32 %v4592_v40, %v7921_v31  ;;  %v8144_v31 = vld [vmem:[%s8368_s8] ss:$0 sm:$0xff] }
 0x391   : > { %v4978_v57 = vpop.f32.mrf.mxu1  ;;  %v8150_v40 = vld [vmem:[%s8366_s6] ss:$0 sm:$0xff]  ;;  %v5307_v62 = vadd.f32 %v8144_v31, %v5306_v32 }
 0x392   : > { %6077 = vmatmul.msk.bf16.gmra.mxu2 %vm505_vm1, %v5133_v47  ;;  %v5040_v7 = vadd.f32 %v4978_v57, %v4642_v14  ;;  %v8137_v14 = vpop.f32.mrf.mxu2 }
 0x394   : > { %6070 = vmatmul.msk.bf16.gmra.mxu1 %vm505_vm1, %v8027_v9  ;;  %v5076_v34 = vadd.f32 %v8063_v59, %v5040_v7  ;;  %v4597_v13 = vpop.f32.mrf.mxu0  ;;  %v6242_v7 = vld [vmem:[%s6419_s27 + $0x68] sm:$0xff] }
 0x395   : > { %v4649_v55 = vadd.f32 %v4597_v13, %v7945_v25  ;;  %v5309_v25 = vadd.f32 %v8144_v31, %v5308_v45 }
 0x396   : > { %v5108_v35 = vmax.f32 %v5076_v34, 0.0  ;;  %v5313_v16 = vpop.f32.mrf.mxu3 }
 0x399   : > { %v4980_v17 = vpop.f32.mrf.mxu1 }
 0x39a   : > { %v5041_v23 = vadd.f32 %v4980_v17, %v4643_v26  ;;  %v4648_v17 = vadd.f32 %v4595_v12, %v7937_v61 }
 0x39c   : > { %v5077_v9 = vadd.f32 %v8063_v59, %v5041_v23  ;;  %v4600_v29 = vpop.f32.mrf.mxu0 }
 0x39d   : > { %6101 = vmatmul.msk.bf16.gmra.mxu3 %vm505_vm1, %v6242_v7 }
 0x39e   : > { %v5109_v3 = vmax.f32 %v5077_v9, 0.0  ;;  %v5316_v9 = vpop.f32.mrf.mxu3 }
 0x3a0   : > { %v5134_v0 = vpack.c.bf16 %v5109_v3, %v5108_v35 }
 0x3a1   : > { %v4983_v54 = vpop.f32.mrf.mxu1 }
 0x3a2   : > { %6078 = vmatmul.msk.bf16.gmra.mxu2 %vm505_vm1, %v5134_v0  ;;  %v5042_v33 = vadd.f32 %v4983_v54, %v4644_v24 }
 0x3a4   : > { %6071 = vmatmul.msk.bf16.gmra.mxu1 %vm505_vm1, %v4887_v50  ;;  %v5078_v5 = vadd.f32 %v8063_v59, %v5042_v33  ;;  %v4602_v20 = vpop.f32.mrf.mxu0 }
 0x3a6   : > { %v5110_v18 = vmax.f32 %v5078_v5, 0.0  ;;  %v6243_v5 = vld [vmem:[%s6419_s27 + $0x70] sm:$0xff] }
 0x3a9   : > { %v4985_v22 = vpop.f32.mrf.mxu1 }
 0x3aa   : > { %v5043_v46 = vadd.f32 %v4985_v22, %v4645_v43  ;;  %v5318_v22 = vpop.f32.mrf.mxu3 }
 0x3ac   : > { %v5079_v63 = vadd.f32 %v8063_v59, %v5043_v46  ;;  %v4605_v61 = vpop.f32.mrf.mxu0 }
 0x3ad   : > { %6102 = vmatmul.msk.bf16.gmra.mxu3 %vm505_vm1, %v6243_v5 }
 0x3ae   : > { %v5111_v10 = vmax.f32 %v5079_v63, 0.0 }
 0x3b0   : > { %v5135_v60 = vpack.c.bf16 %v5111_v10, %v5110_v18  ;;  %v4650_v10 = vadd.f32 %v4600_v29, %v7961_v21 }
 0x3b1   : > { %v4988_v58 = vpop.f32.mrf.mxu1 }
 0x3b2   : > { %6079 = vmatmul.msk.bf16.gmra.mxu2 %vm505_vm1, %v5135_v60  ;;  %v5044_v39 = vadd.f32 %v4988_v58, %v4646_v28  ;;  %v5312_v60 = vadd.f32 %v8144_v31, %v5311_v38 }
 0x3b4   : > { %v5080_v57 = vadd.f32 %v8063_v59, %v5044_v39  ;;  %v4607_v45 = vpop.f32.mrf.mxu0 }
 0x3b6   : > { %v5112_v52 = vmax.f32 %v5080_v57, 0.0 }
 0x3b9   : > { %v4990_v47 = vpop.f32.mrf.mxu1 }
 0x3ba   : > { %v5045_v11 = vadd.f32 %v4990_v47, %v4647_v8  ;;  %v5321_v8 = vpop.f32.mrf.mxu3  ;;  %v4651_v47 = vadd.f32 %v4602_v20, %v7966_v30  ;;  %v6244_v20 = vld [vmem:[%s6419_s27 + $0x78] sm:$0xff]  ;;  %s6174_s27 = sshll.u32 %s6383_s13, 7  ;;  %s5516_s13 = scalar_lea.sflag [#allocation4], %s323_s29 }
 0x3bb   : > { %s5527_s22 = scalar_lea.hbm %s8369_s9, %s6174_s27  ;;  %s6265_s27 = scalar_lea.hbm %s8369_s9, 256 }
 0x3bc   : > { %v5081_v15 = vadd.f32 %v8063_v59, %v5045_v11  ;;  %s5530_s24 = sshll.u32 %s5527_s22, 4  ;;  %s5531_s24 = int_to_ptr.hbm [resolvable:$true] %s5530_s24 }
 0x3bd   : > { %s6259_s25 = sshra.s32 %s5531_s24, 4  ;;  %s6260_s25 = int_to_ptr.hbm [resolvable:$true] %s6259_s25 }
 0x3be   : > { %v5113_v41 = vmax.f32 %v5081_v15, 0.0  ;;  %s6261_s26 = scalar_lea.hbm %s6260_s25, 128  ;;  %p6266_p0 = scmp.lt.s32.totalorder %s6260_s25, %s8369_s9 }
 0x3bf   : > { %p6262_p11 = scmp.ne.s32.totalorder %s6260_s25, %s6261_s26  ;;  %p6267_p1 = scmp.lt.s32.totalorder %s6265_s27, %s6261_s26 }
 0x3c0   : > { %v5136_v6 = vpack.c.bf16 %v5113_v41, %v5112_v52 }
 0x3c1   : > { %v4993_v26 = vpop.f32.mrf.mxu1  ;;  %p6263_p12 = pnand %p6262_p11, %p6400_p5  ;;  %p6268_p2 = por %p6267_p1, %p6266_p0 }
 0x3c2   : > { %6080 = vmatmul.msk.bf16.gmra.mxu2 %vm505_vm1, %v5136_v6  ;;  %v5046_v34 = vadd.f32 %v4993_v26, %v4648_v17  ;;  %v5314_v6 = vadd.f32 %v8144_v31, %v5313_v16  ;;  %v5323_v30 = vpop.f32.mrf.mxu3  ;;  %6103 = vmatmul.msk.bf16.gmra.mxu3 %vm505_vm1, %v6244_v20  ;;  %v5317_v16 = vadd.f32 %v8144_v31, %v5316_v9 }
 0x3c3   : > { %v5324_v20 = vadd.f32 %v8144_v31, %v5323_v30  ;;  %p6264_p13 = pneg %p6263_p12 }
 0x3c4   : > { %v5082_v3 = vadd.f32 %v8063_v59, %v5046_v34 }
 0x3c5   : > { %v5209_v56 = vpop.f32.mrf.mxu2  ;;  %p6269_p3 = pnand %p6268_p2, %p6264_p13 }
 0x3c6   : > { %v5210_v23 = vadd.f32 %v8150_v40, %v5209_v56  ;;  %v5114_v32 = vmax.f32 %v5082_v3, 0.0 }
 0x3c8   : > { %v5386_v44 = vadd.f32 %v5307_v62, %v5210_v23  ;;  %v4610_v62 = vpop.f32.mrf.mxu0 }
 0x3c9   : > { %v4995_v35 = vpop.f32.mrf.mxu1 }
 0x3ca   : > { %v5418_v0 = vmax.f32 %v5386_v44, 0.0  ;;  %v5047_v50 = vadd.f32 %v4995_v35, %v4649_v55  ;;  %v4652_v44 = vadd.f32 %v4605_v61, %v7983_v37 }
 0x3cc   : > { %v5450_v54 = vpack.c.bf16 %v5418_v0, %v5418_v0  ;;  %v5083_v12 = vadd.f32 %v8063_v59, %v5047_v50 }
 0x3cd   : > { %v5211_v24 = vpop.f32.mrf.mxu2 }
 0x3ce   : > { %5483 = vst.msk [vmem:[%s8161_s16] sm:$0xf] %vm5482_vm0, %v5450_v54  ;;  %v5115_v33 = vmax.f32 %v5083_v12, 0.0  ;;  %v5212_v43 = vadd.f32 %v8150_v40, %v5211_v24  ;;  %v5326_v54 = vpop.f32.mrf.mxu3  ;;  %v4653_v12 = vadd.f32 %v4607_v45, %v7988_v36 }
 0x3d0   : > { %v5137_v46 = vpack.c.bf16 %v5115_v33, %v5114_v32  ;;  %v5387_v63 = vadd.f32 %v5309_v25, %v5212_v43  ;;  %v4612_v32 = vpop.f32.mrf.mxu0 }
 0x3d1   : > { %v4998_v13 = vpop.f32.mrf.mxu1 }
 0x3d2   : > { %v5419_v18 = vmax.f32 %v5387_v63, 0.0  ;;  %6081 = vmatmul.msk.bf16.gmra.mxu2 %vm505_vm1, %v5137_v46  ;;  %v5048_v28 = vadd.f32 %v4998_v13, %v4650_v10  ;;  %v5319_v63 = vadd.f32 %v8144_v31, %v5318_v22 }
 0x3d4   : > { %v5451_v4 = vpack.c.bf16 %v5419_v18, %v5419_v18  ;;  %v5084_v15 = vadd.f32 %v8063_v59, %v5048_v28  ;;  %v4654_v28 = vadd.f32 %v4610_v62, %v8005_v19 }
 0x3d5   : > { %v5214_v58 = vpop.f32.mrf.mxu2 }
 0x3d6   : > { %5484 = vst.msk [vmem:[%s8161_s16 + $0x4] sm:$0xf] %vm5482_vm0, %v5451_v4  ;;  %v5215_v39 = vadd.f32 %v8150_v40, %v5214_v58  ;;  %v5116_v7 = vmax.f32 %v5084_v15, 0.0  ;;  %v5328_v18 = vpop.f32.mrf.mxu3 }
 0x3d8   : > { %v5388_v57 = vadd.f32 %v5312_v60, %v5215_v39  ;;  %v4615_v58 = vpop.f32.mrf.mxu0 }
 0x3d9   : > { %v5000_v11 = vpop.f32.mrf.mxu1 }
 0x3da   : > { %v5420_v21 = vmax.f32 %v5388_v57, 0.0  ;;  %v5049_v29 = vadd.f32 %v5000_v11, %v4651_v47  ;;  %v5322_v47 = vadd.f32 %v8144_v31, %v5321_v8 }
 0x3dc   : > { %v5452_v52 = vpack.c.bf16 %v5420_v21, %v5420_v21  ;;  %v5085_v38 = vadd.f32 %v8063_v59, %v5049_v29  ;;  %v4655_v21 = vadd.f32 %v4612_v32, %v8010_v2 }
 0x3dd   : > { %v5216_v41 = vpop.f32.mrf.mxu2 }
 0x3de   : > { %5485 = vst.msk [vmem:[%s8161_s16 + $0x8] sm:$0xf] %vm5482_vm0, %v5452_v52  ;;  %v5117_v26 = vmax.f32 %v5085_v38, 0.0  ;;  %v5217_v17 = vadd.f32 %v8150_v40, %v5216_v41  ;;  %v5331_v15 = vpop.f32.mrf.mxu3 }
 0x3e0   : > { %v5138_v56 = vpack.c.bf16 %v5117_v26, %v5116_v7  ;;  %v5389_v34 = vadd.f32 %v5314_v6, %v5217_v17  ;;  %v4617_v8 = vpop.f32.mrf.mxu0 }
 0x3e1   : > { %v5003_v23 = vpop.f32.mrf.mxu1  ;;  %v4657_v32 = vadd.f32 %v4617_v8, %v8033_v51 }
 0x3e2   : > { %v5421_v55 = vmax.f32 %v5389_v34, 0.0  ;;  %6082 = vmatmul.msk.bf16.gmra.mxu2 %vm505_vm1, %v5138_v56  ;;  %v5050_v0 = vadd.f32 %v5003_v23, %v4652_v44 }
 0x3e4   : > { %v5453_v35 = vpack.c.bf16 %v5421_v55, %v5421_v55  ;;  %v5086_v33 = vadd.f32 %v8063_v59, %v5050_v0 }
 0x3e5   : > { %v5219_v3 = vpop.f32.mrf.mxu2 }
 0x3e6   : > { %5486 = vst.msk [vmem:[%s8161_s16 + $0xc] sm:$0xf] %vm5482_vm0, %v5453_v35  ;;  %v5220_v50 = vadd.f32 %v8150_v40, %v5219_v3  ;;  %v5118_v46 = vmax.f32 %v5086_v33, 0.0  ;;  %v5333_v56 = vpop.f32.mrf.mxu3  ;;  %v4656_v35 = vadd.f32 %v4615_v58, %v8029_v48  ;;  %v5327_v3 = vadd.f32 %v8144_v31, %v5326_v54 }
 0x3e7   : > { %v5334_v8 = vadd.f32 %v8144_v31, %v5333_v56 }
 0x3e8   : > { %v5390_v24 = vadd.f32 %v5317_v16, %v5220_v50 }
 0x3e9   : > { %v5005_v25 = vpop.f32.mrf.mxu1 }
 0x3ea   : > { %v5422_v43 = vmax.f32 %v5390_v24, 0.0  ;;  %v5051_v37 = vadd.f32 %v5005_v25, %v4653_v12  ;;  %v4620_v24 = vpop.f32.mrf.mxu0 }
 0x3eb   : > { %v4658_v58 = vadd.f32 %v4620_v24, %v8040_v42 }
 0x3ec   : > { %v5454_v61 = vpack.c.bf16 %v5422_v43, %v5422_v43  ;;  %v5087_v9 = vadd.f32 %v8063_v59, %v5051_v37 }
 0x3ed   : > { %v5221_v5 = vpop.f32.mrf.mxu2 }
 0x3ee   : > { %5487 = vst.msk [vmem:[%s8161_s16 + $0x10] sm:$0xf] %vm5482_vm0, %v5454_v61  ;;  %v5119_v13 = vmax.f32 %v5087_v9, 0.0  ;;  %v5222_v36 = vadd.f32 %v8150_v40, %v5221_v5  ;;  %v5336_v12 = vpop.f32.mrf.mxu3 }
 0x3f0   : > { %v5139_v10 = vpack.c.bf16 %v5119_v13, %v5118_v46  ;;  %v5391_v4 = vadd.f32 %v5319_v63, %v5222_v36  ;;  %v5329_v46 = vadd.f32 %v8144_v31, %v5328_v18 }
 0x3f1   : > { %v5008_v60 = vpop.f32.mrf.mxu1 }
 0x3f2   : > { %v5423_v45 = vmax.f32 %v5391_v4, 0.0  ;;  %6083 = vmatmul.msk.bf16.gmra.mxu2 %vm505_vm1, %v5139_v10  ;;  %v5052_v22 = vadd.f32 %v5008_v60, %v4654_v28  ;;  %v4622_v4 = vpop.f32.mrf.mxu0 }
 0x3f4   : > { %v5455_v39 = vpack.c.bf16 %v5423_v45, %v5423_v45  ;;  %v5088_v38 = vadd.f32 %v8063_v59, %v5052_v22 }
 0x3f5   : > { %v5224_v57 = vpop.f32.mrf.mxu2 }
 0x3f6   : > { %5488 = vst.msk [vmem:[%s8161_s16 + $0x14] sm:$0xf] %vm5482_vm0, %v5455_v39  ;;  %v5225_v11 = vadd.f32 %v8150_v40, %v5224_v57  ;;  %v5120_v17 = vmax.f32 %v5088_v38, 0.0  ;;  %v5338_v51 = vpop.f32.mrf.mxu3  ;;  %v5332_v39 = vadd.f32 %v8144_v31, %v5331_v15 }
 0x3f8   : > { %v5392_v29 = vadd.f32 %v5322_v47, %v5225_v11  ;;  %v4659_v11 = vadd.f32 %v4622_v4, %v8043_v53 }
 0x3f9   : > { %v5010_v52 = vpop.f32.mrf.mxu1 }
 0x3fa   : > { %v5424_v41 = vmax.f32 %v5392_v29, 0.0  ;;  %v5053_v7 = vadd.f32 %v5010_v52, %v4655_v21  ;;  %v4625_v42 = vpop.f32.mrf.mxu0 }
 0x3fc   : > { %v5456_v19 = vpack.c.bf16 %v5424_v41, %v5424_v41  ;;  %v5089_v6 = vadd.f32 %v8063_v59, %v5053_v7 }
 0x3fd   : > { %v5226_v26 = vpop.f32.mrf.mxu2 }
 0x3fe   : > { %5489 = vst.msk [vmem:[%s8161_s16 + $0x18] sm:$0xf] %vm5482_vm0, %v5456_v19  ;;  %v5121_v62 = vmax.f32 %v5089_v6, 0.0  ;;  %v5227_v2 = vadd.f32 %v8150_v40, %v5226_v26  ;;  %v5341_v22 = vpop.f32.mrf.mxu3 }
 0x400   : > { %v5140_v34 = vpack.c.bf16 %v5121_v62, %v5120_v17  ;;  %v5393_v23 = vadd.f32 %v5324_v20, %v5227_v2 }
 0x401   : > { %v5013_v55 = vpop.f32.mrf.mxu1 }
 0x402   : > { %v5425_v44 = vmax.f32 %v5393_v23, 0.0  ;;  %6084 = vmatmul.msk.bf16.gmra.mxu2 %vm505_vm1, %v5140_v34  ;;  %v5054_v30 = vadd.f32 %v5013_v55, %v4656_v35  ;;  %v3720_v34 = vadd.f32 %v8137_v14, %v8053_v49  ;;  %v4660_v55 = vadd.f32 %v4625_v42, %v8050_v27  ;;  %v4627_v56 = vpop.f32.mrf.mxu0 }
 0x403   : > { %v5337_v35 = vadd.f32 %v8144_v31, %v5336_v12 }
 0x404   : > { %v5457_v16 = vpack.c.bf16 %v5425_v44, %v5425_v44  ;;  %v5090_v43 = vadd.f32 %v8063_v59, %v5054_v30 }
 0x405   : > { %v5229_v0 = vpop.f32.mrf.mxu2 }
 0x406   : > { %5490 = vst.msk [vmem:[%s8161_s16 + $0x1c] sm:$0xf] %vm5482_vm0, %v5457_v16  ;;  %v5230_v50 = vadd.f32 %v8150_v40, %v5229_v0  ;;  %v5122_v5 = vmax.f32 %v5090_v43, 0.0  ;;  %v5343_v17 = vpop.f32.mrf.mxu3 }
 0x408   : > { %v5394_v25 = vadd.f32 %v5327_v3, %v5230_v50  ;;  %v4007_v3 = vadd.f32 %v8086_v1, %v3720_v34  ;;  %v5339_v1 = vadd.f32 %v8144_v31, %v5338_v51 }
 0x409   : > { %v5015_v33 = vpop.f32.mrf.mxu1 }
 0x40a   : > { %v5426_v37 = vmax.f32 %v5394_v25, 0.0  ;;  %v5055_v48 = vadd.f32 %v5015_v33, %v4657_v32  ;;  %v4661_v49 = vadd.f32 %v4627_v56, %v4007_v3 }
 0x40c   : > { %v5458_v61 = vpack.c.bf16 %v5426_v37, %v5426_v37  ;;  %v5091_v54 = vadd.f32 %v8063_v59, %v5055_v48 }
 0x40d   : > { %v5231_v9 = vpop.f32.mrf.mxu2 }
 0x40e   : > { %5491 = vst.msk [vmem:[%s8161_s16 + $0x20] sm:$0xf] %vm5482_vm0, %v5458_v61  ;;  %v5123_v63 = vmax.f32 %v5091_v54, 0.0  ;;  %v5232_v13 = vadd.f32 %v8150_v40, %v5231_v9  ;;  %v5346_v50 = vpop.f32.mrf.mxu3 }
 0x410   : > { %v5141_v36 = vpack.c.bf16 %v5123_v63, %v5122_v5  ;;  %v5395_v10 = vadd.f32 %v5329_v46, %v5232_v13  ;;  %v5342_v13 = vadd.f32 %v8144_v31, %v5341_v22  ;;  %v5347_v22 = vadd.f32 %v8144_v31, %v5346_v50 }
 0x411   : > { %v5018_v60 = vpop.f32.mrf.mxu1 }
 0x412   : > { %v5427_v45 = vmax.f32 %v5395_v10, 0.0  ;;  %6085 = vmatmul.msk.bf16.gmra.mxu2 %vm505_vm1, %v5141_v36  ;;  %v5056_v18 = vadd.f32 %v5018_v60, %v4658_v58  ;;  %v5344_v58 = vadd.f32 %v8144_v31, %v5343_v17 }
 0x414   : > { %v5459_v28 = vpack.c.bf16 %v5427_v45, %v5427_v45  ;;  %v5092_v52 = vadd.f32 %v8063_v59, %v5056_v18 }
 0x415   : > { %v5234_v47 = vpop.f32.mrf.mxu2 }
 0x416   : > { %5492 = vst.msk [vmem:[%s8161_s16 + $0x24] sm:$0xf] %vm5482_vm0, %v5459_v28  ;;  %v5235_v57 = vadd.f32 %v8150_v40, %v5234_v47  ;;  %v5124_v6 = vmax.f32 %v5092_v52, 0.0  ;;  %v5348_v54 = vpop.f32.mrf.mxu3 }
 0x418   : > { %v5396_v21 = vadd.f32 %v5332_v39, %v5235_v57 }
 0x419   : > { %v5020_v29 = vpop.f32.mrf.mxu1 }
 0x41a   : > { %v5428_v38 = vmax.f32 %v5396_v21, 0.0  ;;  %v5057_v41 = vadd.f32 %v5020_v29, %v4659_v11 }
 0x41c   : > { %v5460_v7 = vpack.c.bf16 %v5428_v38, %v5428_v38  ;;  %v5093_v15 = vadd.f32 %v8063_v59, %v5057_v41 }
 0x41d   : > { %v5236_v19 = vpop.f32.mrf.mxu2 }
 0x41e   : > { %5493 = vst.msk [vmem:[%s8161_s16 + $0x28] sm:$0xf] %vm5482_vm0, %v5460_v7  ;;  %v5125_v26 = vmax.f32 %v5093_v15, 0.0  ;;  %v5237_v53 = vadd.f32 %v8150_v40, %v5236_v19  ;;  %v5351_v10 = vpop.f32.mrf.mxu3  ;;  %v5349_v7 = vadd.f32 %v8144_v31, %v5348_v54 }
 0x420   : > { %v5142_v20 = vpack.c.bf16 %v5125_v26, %v5124_v6  ;;  %v5397_v62 = vadd.f32 %v5334_v8, %v5237_v53  ;;  %v5352_v26 = vadd.f32 %v8144_v31, %v5351_v10 }
 0x421   : > { %v5023_v2 = vpop.f32.mrf.mxu1 }
 0x422   : > { %v5429_v23 = vmax.f32 %v5397_v62, 0.0  ;;  %6086 = vmatmul.msk.bf16.gmra.mxu2 %vm505_vm1, %v5142_v20  ;;  %v5058_v0 = vadd.f32 %v5023_v2, %v4660_v55 }
 0x424   : > { %v5461_v44 = vpack.c.bf16 %v5429_v23, %v5429_v23  ;;  %v5094_v32 = vadd.f32 %v8063_v59, %v5058_v0 }
 0x425   : > { %v5239_v16 = vpop.f32.mrf.mxu2 }
 0x426   : > { %5494 = vst.msk [vmem:[%s8161_s16 + $0x2c] sm:$0xf] %vm5482_vm0, %v5461_v44  ;;  %v5240_v30 = vadd.f32 %v8150_v40, %v5239_v16  ;;  %v5126_v37 = vmax.f32 %v5094_v32, 0.0  ;;  %v5353_v18 = vpop.f32.mrf.mxu3 }
 0x427   : > { %v5354_v55 = vadd.f32 %v8144_v31, %v5353_v18 }
 0x428   : > { %v5398_v14 = vadd.f32 %v5337_v35, %v5240_v30 }
 0x429   : > { %v5025_v24 = vpop.f32.mrf.mxu1 }
 0x42a   : > { %v5430_v27 = vmax.f32 %v5398_v14, 0.0  ;;  %v5059_v25 = vadd.f32 %v5025_v24, %v4661_v49 }
 0x42c   : > { %v5462_v33 = vpack.c.bf16 %v5430_v27, %v5430_v27  ;;  %v5095_v12 = vadd.f32 %v8063_v59, %v5059_v25 }
 0x42d   : > { %v5241_v43 = vpop.f32.mrf.mxu2 }
 0x42e   : > { %5495 = vst.msk [vmem:[%s8161_s16 + $0x30] sm:$0xf] %vm5482_vm0, %v5462_v33  ;;  %v5127_v48 = vmax.f32 %v5095_v12, 0.0  ;;  %v5242_v61 = vadd.f32 %v8150_v40, %v5241_v43  ;;  %v5356_v42 = vpop.f32.mrf.mxu3 }
 0x42f   : > { %v5357_v0 = vadd.f32 %v8144_v31, %v5356_v42 }
 0x430   : > { %v5143_v9 = vpack.c.bf16 %v5127_v48, %v5126_v37  ;;  %v5399_v5 = vadd.f32 %v5339_v1, %v5242_v61 }
 0x432   : > { %v5431_v46 = vmax.f32 %v5399_v5, 0.0  ;;  %6087 = vmatmul.msk.bf16.gmra.mxu2 %vm505_vm1, %v5143_v9 }
 0x434   : > { %v5463_v63 = vpack.c.bf16 %v5431_v46, %v5431_v46 }
 0x435   : > { %v5244_v59 = vpop.f32.mrf.mxu2 }
 0x436   : > { %5496 = vst.msk [vmem:[%s8161_s16 + $0x34] sm:$0xf] %vm5482_vm0, %v5463_v63  ;;  %v5245_v36 = vadd.f32 %v8150_v40, %v5244_v59  ;;  %v5358_v20 = vpop.f32.mrf.mxu3 }
 0x437   : > { %v5359_v25 = vadd.f32 %v8144_v31, %v5358_v20 }
 0x438   : > { %v5400_v51 = vadd.f32 %v5342_v13, %v5245_v36 }
 0x43a   : > { %v5432_v4 = vmax.f32 %v5400_v51, 0.0 }
 0x43c   : > { %v5464_v60 = vpack.c.bf16 %v5432_v4, %v5432_v4 }
 0x43d   : > { %v5246_v45 = vpop.f32.mrf.mxu2 }
 0x43e   : > { %5497 = vst.msk [vmem:[%s8161_s16 + $0x38] sm:$0xf] %vm5482_vm0, %v5464_v60  ;;  %v5247_v28 = vadd.f32 %v8150_v40, %v5246_v45  ;;  %v5361_v56 = vpop.f32.mrf.mxu3 }
 0x43f   : > { %v5362_v1 = vadd.f32 %v8144_v31, %v5361_v56 }
 0x440   : > { %v5401_v39 = vadd.f32 %v5344_v58, %v5247_v28 }
 0x442   : > { %v5433_v47 = vmax.f32 %v5401_v39, 0.0 }
 0x444   : > { %v5465_v57 = vpack.c.bf16 %v5433_v47, %v5433_v47 }
 0x445   : > { %v5249_v11 = vpop.f32.mrf.mxu2 }
 0x446   : > { %5498 = vst.msk [vmem:[%s8161_s16 + $0x3c] sm:$0xf] %vm5482_vm0, %v5465_v57  ;;  %v5250_v21 = vadd.f32 %v8150_v40, %v5249_v11  ;;  %v5363_v24 = vpop.f32.mrf.mxu3 }
 0x447   : > { %v5364_v13 = vadd.f32 %v8144_v31, %v5363_v24 }
 0x448   : > { %v5402_v29 = vadd.f32 %v5347_v22, %v5250_v21 }
 0x44a   : > { %v5434_v52 = vmax.f32 %v5402_v29, 0.0 }
 0x44c   : > { %v5466_v38 = vpack.c.bf16 %v5434_v52, %v5434_v52 }
 0x44d   : > { %v5251_v41 = vpop.f32.mrf.mxu2 }
 0x44e   : > { %5499 = vst.msk [vmem:[%s8161_s16 + $0x40] sm:$0xf] %vm5482_vm0, %v5466_v38  ;;  %v5252_v15 = vadd.f32 %v8150_v40, %v5251_v41  ;;  %v5366_v61 = vpop.f32.mrf.mxu3 }
 0x44f   : > { %v5367_v60 = vadd.f32 %v8144_v31, %v5366_v61 }
 0x450   : > { %v5403_v19 = vadd.f32 %v5349_v7, %v5252_v15 }
 0x452   : > { %v5435_v6 = vmax.f32 %v5403_v19, 0.0 }
 0x454   : > { %v5467_v8 = vpack.c.bf16 %v5435_v6, %v5435_v6 }
 0x455   : > { %v5254_v53 = vpop.f32.mrf.mxu2 }
 0x456   : > { %5500 = vst.msk [vmem:[%s8161_s16 + $0x44] sm:$0xf] %vm5482_vm0, %v5467_v8  ;;  %v5255_v17 = vadd.f32 %v8150_v40, %v5254_v53  ;;  %v5368_v36 = vpop.f32.mrf.mxu3 }
 0x457   : > { %v5369_v22 = vadd.f32 %v8144_v31, %v5368_v36 }
 0x458   : > { %v5404_v62 = vadd.f32 %v5352_v26, %v5255_v17 }
 0x45a   : > { %v5436_v2 = vmax.f32 %v5404_v62, 0.0 }
 0x45c   : > { %v5468_v34 = vpack.c.bf16 %v5436_v2, %v5436_v2 }
 0x45d   : > { %v5256_v23 = vpop.f32.mrf.mxu2 }
 0x45e   : > { %5501 = vst.msk [vmem:[%s8161_s16 + $0x48] sm:$0xf] %vm5482_vm0, %v5468_v34  ;;  %v5257_v44 = vadd.f32 %v8150_v40, %v5256_v23  ;;  %v5371_v39 = vpop.f32.mrf.mxu3 }
 0x45f   : > { %v5372_v41 = vadd.f32 %v8144_v31, %v5371_v39 }
 0x460   : > { %v5405_v35 = vadd.f32 %v5354_v55, %v5257_v44 }
 0x462   : > { %v5437_v16 = vmax.f32 %v5405_v35, 0.0 }
 0x464   : > { %v5469_v3 = vpack.c.bf16 %v5437_v16, %v5437_v16 }
 0x465   : > { %v5259_v30 = vpop.f32.mrf.mxu2 }
 0x466   : > { %5502 = vst.msk [vmem:[%s8161_s16 + $0x4c] sm:$0xf] %vm5482_vm0, %v5469_v3  ;;  %v5260_v50 = vadd.f32 %v8150_v40, %v5259_v30  ;;  %v5373_v52 = vpop.f32.mrf.mxu3 }
 0x467   : > { %v5374_v53 = vadd.f32 %v8144_v31, %v5373_v52 }
 0x468   : > { %v5406_v49 = vadd.f32 %v5357_v0, %v5260_v50 }
 0x46a   : > { %v5438_v14 = vmax.f32 %v5406_v49, 0.0 }
 0x46c   : > { %v5470_v32 = vpack.c.bf16 %v5438_v14, %v5438_v14 }
 0x46d   : > { %v5261_v27 = vpop.f32.mrf.mxu2 }
 0x46e   : > { %5503 = vst.msk [vmem:[%s8161_s16 + $0x50] sm:$0xf] %vm5482_vm0, %v5470_v32  ;;  %v5262_v33 = vadd.f32 %v8150_v40, %v5261_v27  ;;  %v5376_v26 = vpop.f32.mrf.mxu3 }
 0x46f   : > { %v5377_v34 = vadd.f32 %v8144_v31, %v5376_v26 }
 0x470   : > { %v5407_v12 = vadd.f32 %v5359_v25, %v5262_v33 }
 0x472   : > { %v5439_v43 = vmax.f32 %v5407_v12, 0.0 }
 0x474   : > { %v5471_v37 = vpack.c.bf16 %v5439_v43, %v5439_v43 }
 0x475   : > { %v5264_v48 = vpop.f32.mrf.mxu2 }
 0x476   : > { %5504 = vst.msk [vmem:[%s8161_s16 + $0x54] sm:$0xf] %vm5482_vm0, %v5471_v37  ;;  %v5265_v54 = vadd.f32 %v8150_v40, %v5264_v48  ;;  %v5378_v44 = vpop.f32.mrf.mxu3 }
 0x477   : > { %v5379_v0 = vadd.f32 %v8144_v31, %v5378_v44 }
 0x478   : > { %v5408_v9 = vadd.f32 %v5362_v1, %v5265_v54 }
 0x47a   : > { %v5440_v5 = vmax.f32 %v5408_v9, 0.0 }
 0x47c   : > { %v5472_v46 = vpack.c.bf16 %v5440_v5, %v5440_v5 }
 0x47d   : > { %v5266_v63 = vpop.f32.mrf.mxu2 }
 0x47e   : > { %5505 = vst.msk [vmem:[%s8161_s16 + $0x58] sm:$0xf] %vm5482_vm0, %v5472_v46  ;;  %v5267_v59 = vadd.f32 %v8150_v40, %v5266_v63  ;;  %v5381_v49 = vpop.f32.mrf.mxu3 }
 0x47f   : > { %v5382_v32 = vadd.f32 %v8144_v31, %v5381_v49 }
 0x480   : > { %v5409_v51 = vadd.f32 %v5364_v13, %v5267_v59 }
 0x482   : > { %v5441_v10 = vmax.f32 %v5409_v51, 0.0 }
 0x484   : > { %v5473_v4 = vpack.c.bf16 %v5441_v10, %v5441_v10 }
 0x485   : > { %v5269_v45 = vpop.f32.mrf.mxu2 }
 0x486   : > { %5506 = vst.msk [vmem:[%s8161_s16 + $0x5c] sm:$0xf] %vm5482_vm0, %v5473_v4  ;;  %v5270_v58 = vadd.f32 %v8150_v40, %v5269_v45  ;;  %v5383_v43 = vpop.f32.mrf.mxu3 }
 0x487   : > { %v5384_v48 = vadd.f32 %v8144_v31, %v5383_v43 }
 0x488   : > { %v5410_v28 = vadd.f32 %v5367_v60, %v5270_v58 }
 0x48a   : > { %v5442_v47 = vmax.f32 %v5410_v28, 0.0 }
 0x48c   : > { %v5474_v18 = vpack.c.bf16 %v5442_v47, %v5442_v47 }
 0x48d   : > { %v5271_v57 = vpop.f32.mrf.mxu2 }
 0x48e   : > { %5507 = vst.msk [vmem:[%s8161_s16 + $0x60] sm:$0xf] %vm5482_vm0, %v5474_v18  ;;  %v5272_v11 = vadd.f32 %v8150_v40, %v5271_v57 }
 0x490   : > { %v5411_v21 = vadd.f32 %v5369_v22, %v5272_v11 }
 0x492   : > { %v5443_v29 = vmax.f32 %v5411_v21, 0.0 }
 0x494   : > { %v5475_v38 = vpack.c.bf16 %v5443_v29, %v5443_v29 }
 0x495   : > { %v5274_v42 = vpop.f32.mrf.mxu2 }
 0x496   : > { %5508 = vst.msk [vmem:[%s8161_s16 + $0x64] sm:$0xf] %vm5482_vm0, %v5475_v38  ;;  %v5275_v7 = vadd.f32 %v8150_v40, %v5274_v42 }
 0x498   : > { %v5412_v15 = vadd.f32 %v5372_v41, %v5275_v7 }
 0x49a   : > { %v5444_v19 = vmax.f32 %v5412_v15, 0.0 }
 0x49c   : > { %v5476_v6 = vpack.c.bf16 %v5444_v19, %v5444_v19 }
 0x49d   : > { %v5276_v8 = vpop.f32.mrf.mxu2 }
 0x49e   : > { %5509 = vst.msk [vmem:[%s8161_s16 + $0x68] sm:$0xf] %vm5482_vm0, %v5476_v6  ;;  %v5277_v17 = vadd.f32 %v8150_v40, %v5276_v8 }
 0x4a0   : > { %v5413_v20 = vadd.f32 %v5374_v53, %v5277_v17 }
 0x4a2   : > { %v5445_v62 = vmax.f32 %v5413_v20, 0.0 }
 0x4a4   : > { %v5477_v2 = vpack.c.bf16 %v5445_v62, %v5445_v62 }
 0x4a5   : > { %v5279_v23 = vpop.f32.mrf.mxu2 }
 0x4a6   : > { %5510 = vst.msk [vmem:[%s8161_s16 + $0x6c] sm:$0xf] %vm5482_vm0, %v5477_v2  ;;  %v5280_v55 = vadd.f32 %v8150_v40, %v5279_v23 }
 0x4a8   : > { %v5414_v35 = vadd.f32 %v5377_v34, %v5280_v55 }
 0x4aa   : > { %v5446_v56 = vmax.f32 %v5414_v35, 0.0 }
 0x4ac   : > { %v5478_v16 = vpack.c.bf16 %v5446_v56, %v5446_v56 }
 0x4ad   : > { %v5281_v3 = vpop.f32.mrf.mxu2 }
 0x4ae   : > { %5511 = vst.msk [vmem:[%s8161_s16 + $0x70] sm:$0xf] %vm5482_vm0, %v5478_v16  ;;  %v5282_v30 = vadd.f32 %v8150_v40, %v5281_v3 }
 0x4b0   : > { %v5415_v50 = vadd.f32 %v5379_v0, %v5282_v30 }
 0x4b2   : > { %v5447_v14 = vmax.f32 %v5415_v50, 0.0 }
 0x4b4   : > { %v5479_v24 = vpack.c.bf16 %v5447_v14, %v5447_v14 }
 0x4b5   : > { %v5284_v27 = vpop.f32.mrf.mxu2 }
 0x4b6   : > { %5512 = vst.msk [vmem:[%s8161_s16 + $0x74] sm:$0xf] %vm5482_vm0, %v5479_v24  ;;  %v5285_v25 = vadd.f32 %v8150_v40, %v5284_v27 }
 0x4b8   : > { %v5416_v33 = vadd.f32 %v5382_v32, %v5285_v25 }
 0x4ba   : > { %v5448_v12 = vmax.f32 %v5416_v33, 0.0 }
 0x4bc   : > { %v5480_v37 = vpack.c.bf16 %v5448_v12, %v5448_v12 }
 0x4bd   : > { %v5286_v1 = vpop.f32.mrf.mxu2 }
 0x4be   : > { %5513 = vst.msk [vmem:[%s8161_s16 + $0x78] sm:$0xf] %vm5482_vm0, %v5480_v37  ;;  %v5287_v61 = vadd.f32 %v8150_v40, %v5286_v1 }
 0x4c0   : > { %v5417_v54 = vadd.f32 %v5384_v48, %v5287_v61 }
 0x4c2   : > { %v5449_v9 = vmax.f32 %v5417_v54, 0.0 }
 0x4c4   : > { %v5481_v5 = vpack.c.bf16 %v5449_v9, %v5449_v9 }
 0x4c6   : > { %5514 = vst.msk [vmem:[%s8161_s16 + $0x7c] sm:$0xf] %vm5482_vm0, %v5481_v5 }
 0x4c7   : > { %6272 = shalt.err (!%p6269_p3)
}
 0x4c8   : > { %s6310_s29 = smov 64   ;;  %s6311_s16 = smov 4  }
 0x4c9   : > { %6175 = dma.vmem_to_hbm [thread:$0]  (%p6400_p5), %s5529_s23, 2048, %s5531_s24, %s5516_s13, %s6310_s29, %s6310_s29, %s6311_s16  }
 0x4ca PF: > { %p6181_p4 = scmp.ge.s32.totalorder %s6307_s12, 2  ;;  %s5545_s22 = sand.u32 1, %s6295_s30  }
 0x4cb   : > { %s5546_s28 = scalar_lea.sflag [#allocation4], %s5545_s22 }
 0x4cc   : > { %p6178_p7 = pnand %p6181_p4, %p6404_p6 }
 0x4ce   : > { %p6179_p8 = pneg %p6178_p7 }
 0x4d0   : > { %6290 = dma.done.wait (%p6179_p8), %s5546_s28, 2048  }
 0x4d1   : > { %6292 = vsyncadd (%p6179_p8), %s5546_s28, 4294965248  ;;  %p19_p9 = scmp.ge.s32.totalorder %s6387_s15, 4   ;;  %s8454_s30 = smov %s6299_s10 }
 0x4d2   : > { %s8455_s10 = smov %s6303_s11  ;;  %s8456_s11 = smov %s6398_s18 }
 0x4d3   : > { %s8457_s12 = smov %s6387_s15  ;;  %21 = sbr.rel (!%p19_p9) target bundleno = 3 (0x3), region = 101 }
 0x4d8   :  { %5552 = vsyncpa [#allocation4], 1 }
 0x4d9   :  { %5554 = vsyncpa [#allocation4 + $0x1], 1 }

</bundles_post_ra>
